<compile_context>
chip_gen: v7x
topology: tpu7x:2x2x1
jax: 0.10.0
libtpu: 0.0.40
codegen_flags: <defaults>
</compile_context>

<pallas_src>
import jax
import jax.numpy as jnp
from jax.experimental import pallas as pl
from jax.experimental.pallas import tpu as pltpu


# ---------------------------------------------------------------------------
# In-kernel helpers (traced inline inside the Pallas kernel)
# ---------------------------------------------------------------------------
def _pad_hw(x, p):
    """Zero-pad a (N, H, W, C) value by p on H and W (in-kernel, no HBM traffic)."""
    n, h, w, c = x.shape
    zr = jnp.zeros((n, p, w, c), x.dtype)
    x = jnp.concatenate([zr, x, zr], axis=1)
    zc = jnp.zeros((n, h + 2 * p, p, c), x.dtype)
    return jnp.concatenate([zc, x, zc], axis=2)


def _conv3x3_bn(xpad, w_slab, scale, bias, relu):
    """3x3 conv (stride 1) + folded-BN affine (+ReLU).

    xpad:   (N, H+2, W+2, Cin) bf16 value (already halo-padded)
    w_slab: (3, 3*Cin, Cout)   bf16 value, rows ordered (dx, cin)
    Per dy, the 3 dx-shifted patches are concatenated on channels -> one
    K=3*Cin MXU matmul (f32 accumulation).
    Returns (N*H*W, Cout) f32.
    """
    n, hp, wp, cin = xpad.shape
    h, w = hp - 2, wp - 2
    cout = w_slab.shape[-1]
    acc = jnp.zeros((n * h * w, cout), jnp.float32)
    for dy in range(3):
        patch = jnp.concatenate(
            [xpad[:, dy:dy + h, dx:dx + w, :] for dx in range(3)], axis=-1)
        acc = acc + jnp.dot(patch.reshape(n * h * w, 3 * cin), w_slab[dy],
                            preferred_element_type=jnp.float32)
    out = acc * scale + bias
    if relu:
        out = jnp.maximum(out, 0.0)
    return out


# ---------------------------------------------------------------------------
# Fused BasicBlock kernel (one batch tile per grid step)
# ---------------------------------------------------------------------------
def basic_block_kernel(x_ref, w1_ref, s1_ref, b1_ref, w2_ref, s2_ref, b2_ref,
                       fc1_ref, fc2_ref, tsa_ref, o_ref):
    TN, H, W, Cin = x_ref.shape
    Cout = w1_ref.shape[-1]

    x = x_ref[...]                                          # (TN,H,W,Cin) f32

    # ---- conv1 + bn1 + relu ------------------------------------------------
    xpad = _pad_hw(x.astype(jnp.bfloat16), 1)
    h1 = _conv3x3_bn(xpad, w1_ref[...], s1_ref[...], b1_ref[...], relu=True)

    # ---- conv2 + bn2 ---------------------------------------------------------
    h1pad = _pad_hw(h1.reshape(TN, H, W, Cout).astype(jnp.bfloat16), 1)
    out3 = _conv3x3_bn(h1pad, w2_ref[...], s2_ref[...], b2_ref[...], relu=False)
    # out3: (TN*H*W, Cout) f32

    # ---- channel attention (avg/max pool -> shared MLP, one pass) ------------
    o3 = out3.reshape(TN, H * W, Cout)
    avg_p = jnp.mean(o3, axis=1)                            # (TN, Cout)
    max_p = jnp.max(o3, axis=1)                             # (TN, Cout)
    pooled = jnp.concatenate([avg_p, max_p], axis=0).astype(jnp.bfloat16)
    hid = jnp.maximum(
        jnp.dot(pooled, fc1_ref[...], preferred_element_type=jnp.float32), 0.0)
    att = jnp.dot(hid.astype(jnp.bfloat16), fc2_ref[...],
                  preferred_element_type=jnp.float32)       # (2*TN, Cout)
    ca = jax.nn.sigmoid(att[:TN] + att[TN:])                # (TN, Cout)
    o_ca = o3 * ca[:, None, :]                              # (TN, H*W, Cout)

    # ---- spatial attention: lane-dense Toeplitz matmul -----------------------
    # channel-mean / channel-max maps, W on the lane axis, row-padded by 3.
    avg_c = jnp.mean(o_ca, axis=-1).reshape(TN, H, W)
    max_c = jnp.max(o_ca, axis=-1).reshape(TN, H, W)
    zrow = jnp.zeros((TN, 3, W), jnp.float32)
    avg_pd = jnp.concatenate([zrow, avg_c, zrow], axis=1)   # (TN, H+6, W)
    max_pd = jnp.concatenate([zrow, max_c, zrow], axis=1)
    cols = []
    for dy in range(7):                                     # order must match tsa
        cols.append(avg_pd[:, dy:dy + H, :])
        cols.append(max_pd[:, dy:dy + H, :])
    sa_patch = jnp.concatenate(cols, axis=-1).reshape(TN * H, 14 * W)
    sa_logit = jnp.dot(sa_patch, tsa_ref[...],
                       preferred_element_type=jnp.float32)  # (TN*H, W)
    sa = jax.nn.sigmoid(sa_logit).reshape(TN, H, W, 1)

    # ---- apply SA + identity shortcut (stride=1; no final ReLU in the spec) --
    out4 = o_ca.reshape(TN, H, W, Cout) * sa + x.astype(jnp.float32)
    # lane-dense store: (TN, H, W*Cout)
    o_ref[...] = out4.reshape(TN, H, W * Cout).astype(o_ref.dtype)


# ---------------------------------------------------------------------------
# Host-side helpers
# ---------------------------------------------------------------------------
def build_sa_toeplitz(wsa, width):
    """Stacked Toeplitz matrix for the 7x7 2-channel spatial-attention conv.

    wsa: (2, 7, 7) = (channel[avg,max], ky, kx).
    Returns (14*width, width); row blocks ordered (dy, channel) to match the
    in-kernel patch concatenation. Column zero-padding of the conv is encoded
    in the band structure of each block.
    """
    blocks = []
    for dy in range(7):
        for c in range(2):
            t = jnp.zeros((width, width), jnp.float32)
            for dx in range(7):
                t = t + wsa[c, dy, dx] * jnp.eye(width, width, k=3 - dx,
                                                 dtype=jnp.float32)
            blocks.append(t)
    return jnp.concatenate(blocks, axis=0)


def basic_block_forward(x_nchw, params, *, block_n=1):
    """Full BasicBlock forward. Accepts/returns NCHW (like the PyTorch module)."""
    N, Cin, H, W = x_nchw.shape
    Cout = params["w1"].shape[-1]
    hidden = params["fc1"].shape[-1]
    assert Cin == Cout, "stride=1 identity shortcut requires in_planes == planes"
    assert N % block_n == 0
    TN = block_n

    x = jnp.transpose(x_nchw, (0, 2, 3, 1))                 # NCHW -> NHWC

    # bf16 weights for the MXU path (accumulation stays f32 in-kernel).
    w1r = params["w1"].reshape(3, 3 * Cin, Cout).astype(jnp.bfloat16)
    w2r = params["w2"].reshape(3, 3 * Cout, Cout).astype(jnp.bfloat16)
    fc1 = params["fc1"].astype(jnp.bfloat16)
    fc2 = params["fc2"].astype(jnp.bfloat16)
    tsa = build_sa_toeplitz(params["wsa"], W)               # (14*W, W) f32

    const2 = lambda i: (0, 0)
    const3 = lambda i: (0, 0, 0)

    out_flat = pl.pallas_call(
        basic_block_kernel,
        out_shape=jax.ShapeDtypeStruct((N, H, W * Cout), x.dtype),
        grid=(N // TN,),
        in_specs=[
            pl.BlockSpec((TN, H, W, Cin), lambda i: (i, 0, 0, 0)),   # x (+shortcut)
            pl.BlockSpec((3, 3 * Cin, Cout), const3),                # conv1 weights
            pl.BlockSpec((1, Cout), const2),                         # bn1 scale
            pl.BlockSpec((1, Cout), const2),                         # bn1 bias
            pl.BlockSpec((3, 3 * Cout, Cout), const3),               # conv2 weights
            pl.BlockSpec((1, Cout), const2),                         # bn2 scale
            pl.BlockSpec((1, Cout), const2),                         # bn2 bias
            pl.BlockSpec((Cout, hidden), const2),                    # CA fc1
            pl.BlockSpec((hidden, Cout), const2),                    # CA fc2
            pl.BlockSpec((14 * W, W), const2),                       # SA Toeplitz
        ],
        out_specs=pl.BlockSpec((TN, H, W * Cout), lambda i: (i, 0, 0)),
        compiler_params=pltpu.CompilerParams(
            dimension_semantics=("parallel",)),
    )(x, w1r, params["s1"], params["b1"], w2r, params["s2"], params["b2"],
      fc1, fc2, tsa)

    out = out_flat.reshape(N, H, W, Cout)
    return jnp.transpose(out, (0, 3, 1, 2))                 # NHWC -> NCHW


# ---------------------------------------------------------------------------
# Pure-JAX reference (same bf16 rounding points as the kernel) for validation
# ---------------------------------------------------------------------------
def reference_forward(x_nchw, params):
    hi = jax.lax.Precision.HIGHEST
    bf = lambda a: a.astype(jnp.bfloat16).astype(jnp.float32)
    x = jnp.transpose(x_nchw, (0, 2, 3, 1)).astype(jnp.float32)
    w1, w2 = bf(params["w1"]), bf(params["w2"])
    fc1, fc2 = bf(params["fc1"]), bf(params["fc2"])
    s1 = params["s1"].reshape(1, 1, 1, -1); b1 = params["b1"].reshape(1, 1, 1, -1)
    s2 = params["s2"].reshape(1, 1, 1, -1); b2 = params["b2"].reshape(1, 1, 1, -1)

    def conv3(inp, w):
        return jax.lax.conv_general_dilated(
            inp, w, window_strides=(1, 1), padding=((1, 1), (1, 1)),
            dimension_numbers=("NHWC", "HWIO", "NHWC"), precision=hi)

    out = jnp.maximum(conv3(bf(x), w1) * s1 + b1, 0.0)
    out = conv3(bf(out), w2) * s2 + b2

    avg_p = jnp.mean(out, axis=(1, 2)); max_p = jnp.max(out, axis=(1, 2))
    mlp = lambda v: jnp.dot(
        bf(jnp.maximum(jnp.dot(bf(v), fc1, precision=hi), 0.0)), fc2, precision=hi)
    ca = jax.nn.sigmoid(mlp(avg_p) + mlp(max_p))[:, None, None, :]
    out = out * ca

    avg_c = jnp.mean(out, axis=-1, keepdims=True)
    max_c = jnp.max(out, axis=-1, keepdims=True)
    sa_in = jnp.concatenate([avg_c, max_c], axis=-1)
    wsa_hwio = jnp.transpose(params["wsa"], (1, 2, 0))[:, :, :, None]
    sa = jax.nn.sigmoid(jax.lax.conv_general_dilated(
        sa_in, wsa_hwio, (1, 1), ((3, 3), (3, 3)),
        dimension_numbers=("NHWC", "HWIO", "NHWC"), precision=hi))
    out = out * sa + x
    return jnp.transpose(out, (0, 3, 1, 2))


# ---------------------------------------------------------------------------
# Deterministic synthetic parameters (shapes follow the PyTorch __init__)
# ---------------------------------------------------------------------------
def make_params(key, in_planes, planes):
    hidden = planes // 16
    assert hidden >= 1, "planes must be >= 16 for the channel-attention MLP"
    keys = jax.random.split(key, 7)

    w1 = 0.1 * jax.random.normal(keys[0], (3, 3, in_planes, planes), jnp.float32)
    w2 = 0.1 * jax.random.normal(keys[1], (3, 3, planes, planes), jnp.float32)
    fc1 = 0.1 * jax.random.normal(keys[2], (planes, hidden), jnp.float32)
    fc2 = 0.1 * jax.random.normal(keys[3], (hidden, planes), jnp.float32)
    wsa = 0.1 * jax.random.normal(keys[4], (2, 7, 7), jnp.float32)  # (avg/max, 7, 7)

    def folded_bn(k, c):
        k1, k2, k3, k4 = jax.random.split(k, 4)
        gamma = 1.0 + 0.1 * jax.random.normal(k1, (c,), jnp.float32)
        beta = 0.1 * jax.random.normal(k2, (c,), jnp.float32)
        mean = 0.1 * jax.random.normal(k3, (c,), jnp.float32)
        var = 1.0 + 0.1 * jax.random.uniform(k4, (c,), jnp.float32)
        scale = gamma / jnp.sqrt(var + 1e-5)
        bias = beta - mean * scale
        return scale.reshape(1, c), bias.reshape(1, c)

    s1, b1 = folded_bn(keys[5], planes)
    s2, b2 = folded_bn(keys[6], planes)
    return dict(w1=w1, s1=s1, b1=b1, w2=w2, s2=s2, b2=b2,
                fc1=fc1, fc2=fc2, wsa=wsa)


if __name__ == "__main__":
    key = jax.random.PRNGKey(0)
    kx, kp = jax.random.split(key)

    N, C, H, W = 2, 32, 16, 16       # planes=32 -> planes//16 = 2 (valid CA MLP)
    x = jax.random.normal(kx, (N, C, H, W), jnp.float32)
    params = make_params(kp, C, C)

    out = jax.block_until_ready(basic_block_forward(x, params, block_n=1))
    ref = jax.block_until_ready(reference_forward(x, params))

    assert out.shape == (N, C, H, W)
    assert bool(jnp.all(jnp.isfinite(out)))
    max_err = float(jnp.max(jnp.abs(out - ref)))
    assert max_err < 5e-2, f"mismatch vs reference: max abs err {max_err}"
    print("KERNEL_OK")
</pallas_src>

<mosaic_0001>
module attributes {stable_mosaic.version = 11 : i64} {
  func.func @basic_block_kernel(%arg0: i32, %arg1: memref<1x16x16x32xf32, #tpu.memory_space<vmem>>, %arg2: memref<3x96x32xbf16, #tpu.memory_space<vmem>>, %arg3: memref<1x32xf32, #tpu.memory_space<vmem>>, %arg4: memref<1x32xf32, #tpu.memory_space<vmem>>, %arg5: memref<3x96x32xbf16, #tpu.memory_space<vmem>>, %arg6: memref<1x32xf32, #tpu.memory_space<vmem>>, %arg7: memref<1x32xf32, #tpu.memory_space<vmem>>, %arg8: memref<32x2xbf16, #tpu.memory_space<vmem>>, %arg9: memref<2x32xbf16, #tpu.memory_space<vmem>>, %arg10: memref<224x16xf32, #tpu.memory_space<vmem>>, %arg11: memref<1x16x512xf32, #tpu.memory_space<vmem>>) attributes {dimension_semantics = [#tpu.dimension_semantics<parallel>], iteration_bounds = array<i64: 2>, scalar_prefetch = 0 : i64, scratch_operands = 0 : i64, tpu.core_type = #tpu.core_type<tc>, window_params = [{transform_indices = @transform_0, window_bounds = array<i64: 1, 16, 16, 32>}, {pipeline_mode = #tpu.pipeline_mode<synchronous>, transform_indices = @transform_1, window_bounds = array<i64: 3, 96, 32>}, {pipeline_mode = #tpu.pipeline_mode<synchronous>, transform_indices = @transform_2, window_bounds = array<i64: 1, 32>}, {pipeline_mode = #tpu.pipeline_mode<synchronous>, transform_indices = @transform_3, window_bounds = array<i64: 1, 32>}, {pipeline_mode = #tpu.pipeline_mode<synchronous>, transform_indices = @transform_4, window_bounds = array<i64: 3, 96, 32>}, {pipeline_mode = #tpu.pipeline_mode<synchronous>, transform_indices = @transform_5, window_bounds = array<i64: 1, 32>}, {pipeline_mode = #tpu.pipeline_mode<synchronous>, transform_indices = @transform_6, window_bounds = array<i64: 1, 32>}, {pipeline_mode = #tpu.pipeline_mode<synchronous>, transform_indices = @transform_7, window_bounds = array<i64: 32, 2>}, {pipeline_mode = #tpu.pipeline_mode<synchronous>, transform_indices = @transform_8, window_bounds = array<i64: 2, 32>}, {pipeline_mode = #tpu.pipeline_mode<synchronous>, transform_indices = @transform_9, window_bounds = array<i64: 224, 16>}, {transform_indices = @transform_10, window_bounds = array<i64: 1, 16, 512>}]} {
    %c0 = arith.constant 0 : index
    %c0_0 = arith.constant 0 : index
    %c0_1 = arith.constant 0 : index
    %c0_2 = arith.constant 0 : index
    %0 = vector.load %arg1[%c0, %c0_0, %c0_1, %c0_2] : memref<1x16x16x32xf32, #tpu.memory_space<vmem>>, vector<1x16x16x32xf32>
    %1 = arith.truncf %0 : vector<1x16x16x32xf32> to vector<1x16x16x32xbf16>
    %cst = arith.constant 0.000000e+00 : bf16
    %2 = vector.broadcast %cst : bf16 to vector<1x1x16x32xbf16>
    %3 = tpu.concatenate %2, %1, %2 in 1 : vector<1x1x16x32xbf16>, vector<1x16x16x32xbf16>, vector<1x1x16x32xbf16> -> vector<1x18x16x32xbf16>
    %cst_3 = arith.constant 0.000000e+00 : bf16
    %4 = vector.broadcast %cst_3 : bf16 to vector<1x18x1x32xbf16>
    %5 = tpu.concatenate %4, %3, %4 in 2 : vector<1x18x1x32xbf16>, vector<1x18x16x32xbf16>, vector<1x18x1x32xbf16> -> vector<1x18x18x32xbf16>
    %c0_4 = arith.constant 0 : index
    %c0_5 = arith.constant 0 : index
    %c0_6 = arith.constant 0 : index
    %6 = vector.load %arg2[%c0_4, %c0_5, %c0_6] : memref<3x96x32xbf16, #tpu.memory_space<vmem>>, vector<3x96x32xbf16>
    %c0_7 = arith.constant 0 : index
    %c0_8 = arith.constant 0 : index
    %7 = vector.load %arg3[%c0_7, %c0_8] : memref<1x32xf32, #tpu.memory_space<vmem>>, vector<1x32xf32>
    %c0_9 = arith.constant 0 : index
    %c0_10 = arith.constant 0 : index
    %8 = vector.load %arg4[%c0_9, %c0_10] : memref<1x32xf32, #tpu.memory_space<vmem>>, vector<1x32xf32>
    %cst_11 = arith.constant 0.000000e+00 : f32
    %9 = vector.broadcast %cst_11 : f32 to vector<256x32xf32>
    %10 = vector.extract_strided_slice %5 {offsets = [0, 0, 0, 0], sizes = [1, 16, 16, 32], strides = [1, 1, 1, 1]} : vector<1x18x18x32xbf16> to vector<1x16x16x32xbf16>
    %11 = vector.extract_strided_slice %5 {offsets = [0, 0, 1, 0], sizes = [1, 16, 16, 32], strides = [1, 1, 1, 1]} : vector<1x18x18x32xbf16> to vector<1x16x16x32xbf16>
    %12 = vector.extract_strided_slice %5 {offsets = [0, 0, 2, 0], sizes = [1, 16, 16, 32], strides = [1, 1, 1, 1]} : vector<1x18x18x32xbf16> to vector<1x16x16x32xbf16>
    %13 = tpu.concatenate %10, %11, %12 in 3 : vector<1x16x16x32xbf16>, vector<1x16x16x32xbf16>, vector<1x16x16x32xbf16> -> vector<1x16x16x96xbf16>
    %14 = vector.shape_cast %13 : vector<1x16x16x96xbf16> to vector<256x96xbf16>
    %15 = vector.extract_strided_slice %6 {offsets = [0, 0, 0], sizes = [1, 96, 32], strides = [1, 1, 1]} : vector<3x96x32xbf16> to vector<1x96x32xbf16>
    %16 = vector.shape_cast %15 : vector<1x96x32xbf16> to vector<96x32xbf16>
    %cst_12 = arith.constant dense<0.000000e+00> : vector<256x32xf32>
    %17 = tpu.matmul %14, %16, %cst_12 {dimension_numbers = #tpu.dot_dimension_numbers<[1], [0], [0], [1], [0, 0, 1, 1], [], []>} : vector<256x96xbf16>, vector<96x32xbf16>, vector<256x32xf32> -> vector<256x32xf32>
    %18 = arith.addf %9, %17 : vector<256x32xf32>
    %19 = vector.extract_strided_slice %5 {offsets = [0, 1, 0, 0], sizes = [1, 16, 16, 32], strides = [1, 1, 1, 1]} : vector<1x18x18x32xbf16> to vector<1x16x16x32xbf16>
    %20 = vector.extract_strided_slice %5 {offsets = [0, 1, 1, 0], sizes = [1, 16, 16, 32], strides = [1, 1, 1, 1]} : vector<1x18x18x32xbf16> to vector<1x16x16x32xbf16>
    %21 = vector.extract_strided_slice %5 {offsets = [0, 1, 2, 0], sizes = [1, 16, 16, 32], strides = [1, 1, 1, 1]} : vector<1x18x18x32xbf16> to vector<1x16x16x32xbf16>
    %22 = tpu.concatenate %19, %20, %21 in 3 : vector<1x16x16x32xbf16>, vector<1x16x16x32xbf16>, vector<1x16x16x32xbf16> -> vector<1x16x16x96xbf16>
    %23 = vector.shape_cast %22 : vector<1x16x16x96xbf16> to vector<256x96xbf16>
    %24 = vector.extract_strided_slice %6 {offsets = [1, 0, 0], sizes = [1, 96, 32], strides = [1, 1, 1]} : vector<3x96x32xbf16> to vector<1x96x32xbf16>
    %25 = vector.shape_cast %24 : vector<1x96x32xbf16> to vector<96x32xbf16>
    %cst_13 = arith.constant dense<0.000000e+00> : vector<256x32xf32>
    %26 = tpu.matmul %23, %25, %cst_13 {dimension_numbers = #tpu.dot_dimension_numbers<[1], [0], [0], [1], [0, 0, 1, 1], [], []>} : vector<256x96xbf16>, vector<96x32xbf16>, vector<256x32xf32> -> vector<256x32xf32>
    %27 = arith.addf %18, %26 : vector<256x32xf32>
    %28 = vector.extract_strided_slice %5 {offsets = [0, 2, 0, 0], sizes = [1, 16, 16, 32], strides = [1, 1, 1, 1]} : vector<1x18x18x32xbf16> to vector<1x16x16x32xbf16>
    %29 = vector.extract_strided_slice %5 {offsets = [0, 2, 1, 0], sizes = [1, 16, 16, 32], strides = [1, 1, 1, 1]} : vector<1x18x18x32xbf16> to vector<1x16x16x32xbf16>
    %30 = vector.extract_strided_slice %5 {offsets = [0, 2, 2, 0], sizes = [1, 16, 16, 32], strides = [1, 1, 1, 1]} : vector<1x18x18x32xbf16> to vector<1x16x16x32xbf16>
    %31 = tpu.concatenate %28, %29, %30 in 3 : vector<1x16x16x32xbf16>, vector<1x16x16x32xbf16>, vector<1x16x16x32xbf16> -> vector<1x16x16x96xbf16>
    %32 = vector.shape_cast %31 : vector<1x16x16x96xbf16> to vector<256x96xbf16>
    %33 = vector.extract_strided_slice %6 {offsets = [2, 0, 0], sizes = [1, 96, 32], strides = [1, 1, 1]} : vector<3x96x32xbf16> to vector<1x96x32xbf16>
    %34 = vector.shape_cast %33 : vector<1x96x32xbf16> to vector<96x32xbf16>
    %cst_14 = arith.constant dense<0.000000e+00> : vector<256x32xf32>
    %35 = tpu.matmul %32, %34, %cst_14 {dimension_numbers = #tpu.dot_dimension_numbers<[1], [0], [0], [1], [0, 0, 1, 1], [], []>} : vector<256x96xbf16>, vector<96x32xbf16>, vector<256x32xf32> -> vector<256x32xf32>
    %36 = arith.addf %27, %35 : vector<256x32xf32>
    %37 = vector.broadcast %7 : vector<1x32xf32> to vector<256x32xf32>
    %38 = arith.mulf %36, %37 : vector<256x32xf32>
    %39 = vector.broadcast %8 : vector<1x32xf32> to vector<256x32xf32>
    %40 = arith.addf %38, %39 : vector<256x32xf32>
    %cst_15 = arith.constant 0.000000e+00 : f32
    %41 = vector.broadcast %cst_15 : f32 to vector<256x32xf32>
    %42 = arith.maximumf %40, %41 : vector<256x32xf32>
    %43 = vector.shape_cast %42 : vector<256x32xf32> to vector<1x16x16x32xf32>
    %44 = arith.truncf %43 : vector<1x16x16x32xf32> to vector<1x16x16x32xbf16>
    %cst_16 = arith.constant 0.000000e+00 : bf16
    %45 = vector.broadcast %cst_16 : bf16 to vector<1x1x16x32xbf16>
    %46 = tpu.concatenate %45, %44, %45 in 1 : vector<1x1x16x32xbf16>, vector<1x16x16x32xbf16>, vector<1x1x16x32xbf16> -> vector<1x18x16x32xbf16>
    %cst_17 = arith.constant 0.000000e+00 : bf16
    %47 = vector.broadcast %cst_17 : bf16 to vector<1x18x1x32xbf16>
    %48 = tpu.concatenate %47, %46, %47 in 2 : vector<1x18x1x32xbf16>, vector<1x18x16x32xbf16>, vector<1x18x1x32xbf16> -> vector<1x18x18x32xbf16>
    %c0_18 = arith.constant 0 : index
    %c0_19 = arith.constant 0 : index
    %c0_20 = arith.constant 0 : index
    %49 = vector.load %arg5[%c0_18, %c0_19, %c0_20] : memref<3x96x32xbf16, #tpu.memory_space<vmem>>, vector<3x96x32xbf16>
    %c0_21 = arith.constant 0 : index
    %c0_22 = arith.constant 0 : index
    %50 = vector.load %arg6[%c0_21, %c0_22] : memref<1x32xf32, #tpu.memory_space<vmem>>, vector<1x32xf32>
    %c0_23 = arith.constant 0 : index
    %c0_24 = arith.constant 0 : index
    %51 = vector.load %arg7[%c0_23, %c0_24] : memref<1x32xf32, #tpu.memory_space<vmem>>, vector<1x32xf32>
    %cst_25 = arith.constant 0.000000e+00 : f32
    %52 = vector.broadcast %cst_25 : f32 to vector<256x32xf32>
    %53 = vector.extract_strided_slice %48 {offsets = [0, 0, 0, 0], sizes = [1, 16, 16, 32], strides = [1, 1, 1, 1]} : vector<1x18x18x32xbf16> to vector<1x16x16x32xbf16>
    %54 = vector.extract_strided_slice %48 {offsets = [0, 0, 1, 0], sizes = [1, 16, 16, 32], strides = [1, 1, 1, 1]} : vector<1x18x18x32xbf16> to vector<1x16x16x32xbf16>
    %55 = vector.extract_strided_slice %48 {offsets = [0, 0, 2, 0], sizes = [1, 16, 16, 32], strides = [1, 1, 1, 1]} : vector<1x18x18x32xbf16> to vector<1x16x16x32xbf16>
    %56 = tpu.concatenate %53, %54, %55 in 3 : vector<1x16x16x32xbf16>, vector<1x16x16x32xbf16>, vector<1x16x16x32xbf16> -> vector<1x16x16x96xbf16>
    %57 = vector.shape_cast %56 : vector<1x16x16x96xbf16> to vector<256x96xbf16>
    %58 = vector.extract_strided_slice %49 {offsets = [0, 0, 0], sizes = [1, 96, 32], strides = [1, 1, 1]} : vector<3x96x32xbf16> to vector<1x96x32xbf16>
    %59 = vector.shape_cast %58 : vector<1x96x32xbf16> to vector<96x32xbf16>
    %cst_26 = arith.constant dense<0.000000e+00> : vector<256x32xf32>
    %60 = tpu.matmul %57, %59, %cst_26 {dimension_numbers = #tpu.dot_dimension_numbers<[1], [0], [0], [1], [0, 0, 1, 1], [], []>} : vector<256x96xbf16>, vector<96x32xbf16>, vector<256x32xf32> -> vector<256x32xf32>
    %61 = arith.addf %52, %60 : vector<256x32xf32>
    %62 = vector.extract_strided_slice %48 {offsets = [0, 1, 0, 0], sizes = [1, 16, 16, 32], strides = [1, 1, 1, 1]} : vector<1x18x18x32xbf16> to vector<1x16x16x32xbf16>
    %63 = vector.extract_strided_slice %48 {offsets = [0, 1, 1, 0], sizes = [1, 16, 16, 32], strides = [1, 1, 1, 1]} : vector<1x18x18x32xbf16> to vector<1x16x16x32xbf16>
    %64 = vector.extract_strided_slice %48 {offsets = [0, 1, 2, 0], sizes = [1, 16, 16, 32], strides = [1, 1, 1, 1]} : vector<1x18x18x32xbf16> to vector<1x16x16x32xbf16>
    %65 = tpu.concatenate %62, %63, %64 in 3 : vector<1x16x16x32xbf16>, vector<1x16x16x32xbf16>, vector<1x16x16x32xbf16> -> vector<1x16x16x96xbf16>
    %66 = vector.shape_cast %65 : vector<1x16x16x96xbf16> to vector<256x96xbf16>
    %67 = vector.extract_strided_slice %49 {offsets = [1, 0, 0], sizes = [1, 96, 32], strides = [1, 1, 1]} : vector<3x96x32xbf16> to vector<1x96x32xbf16>
    %68 = vector.shape_cast %67 : vector<1x96x32xbf16> to vector<96x32xbf16>
    %cst_27 = arith.constant dense<0.000000e+00> : vector<256x32xf32>
    %69 = tpu.matmul %66, %68, %cst_27 {dimension_numbers = #tpu.dot_dimension_numbers<[1], [0], [0], [1], [0, 0, 1, 1], [], []>} : vector<256x96xbf16>, vector<96x32xbf16>, vector<256x32xf32> -> vector<256x32xf32>
    %70 = arith.addf %61, %69 : vector<256x32xf32>
    %71 = vector.extract_strided_slice %48 {offsets = [0, 2, 0, 0], sizes = [1, 16, 16, 32], strides = [1, 1, 1, 1]} : vector<1x18x18x32xbf16> to vector<1x16x16x32xbf16>
    %72 = vector.extract_strided_slice %48 {offsets = [0, 2, 1, 0], sizes = [1, 16, 16, 32], strides = [1, 1, 1, 1]} : vector<1x18x18x32xbf16> to vector<1x16x16x32xbf16>
    %73 = vector.extract_strided_slice %48 {offsets = [0, 2, 2, 0], sizes = [1, 16, 16, 32], strides = [1, 1, 1, 1]} : vector<1x18x18x32xbf16> to vector<1x16x16x32xbf16>
    %74 = tpu.concatenate %71, %72, %73 in 3 : vector<1x16x16x32xbf16>, vector<1x16x16x32xbf16>, vector<1x16x16x32xbf16> -> vector<1x16x16x96xbf16>
    %75 = vector.shape_cast %74 : vector<1x16x16x96xbf16> to vector<256x96xbf16>
    %76 = vector.extract_strided_slice %49 {offsets = [2, 0, 0], sizes = [1, 96, 32], strides = [1, 1, 1]} : vector<3x96x32xbf16> to vector<1x96x32xbf16>
    %77 = vector.shape_cast %76 : vector<1x96x32xbf16> to vector<96x32xbf16>
    %cst_28 = arith.constant dense<0.000000e+00> : vector<256x32xf32>
    %78 = tpu.matmul %75, %77, %cst_28 {dimension_numbers = #tpu.dot_dimension_numbers<[1], [0], [0], [1], [0, 0, 1, 1], [], []>} : vector<256x96xbf16>, vector<96x32xbf16>, vector<256x32xf32> -> vector<256x32xf32>
    %79 = arith.addf %70, %78 : vector<256x32xf32>
    %80 = vector.broadcast %50 : vector<1x32xf32> to vector<256x32xf32>
    %81 = arith.mulf %79, %80 : vector<256x32xf32>
    %82 = vector.broadcast %51 : vector<1x32xf32> to vector<256x32xf32>
    %83 = arith.addf %81, %82 : vector<256x32xf32>
    %84 = vector.shape_cast %83 : vector<256x32xf32> to vector<1x256x32xf32>
    %cst_29 = arith.constant dense<0.000000e+00> : vector<1x32xf32>
    %85 = vector.multi_reduction <add>, %84, %cst_29 [1] : vector<1x256x32xf32> to vector<1x32xf32>
    %cst_30 = arith.constant 2.560000e+02 : f32
    %86 = vector.broadcast %cst_30 : f32 to vector<1x32xf32>
    %87 = arith.divf %85, %86 : vector<1x32xf32>
    %cst_31 = arith.constant dense<0xFF800000> : vector<1x32xf32>
    %88 = vector.multi_reduction <maximumf>, %84, %cst_31 [1] : vector<1x256x32xf32> to vector<1x32xf32>
    %89 = tpu.concatenate %87, %88 in 0 : vector<1x32xf32>, vector<1x32xf32> -> vector<2x32xf32>
    %90 = arith.truncf %89 : vector<2x32xf32> to vector<2x32xbf16>
    %c0_32 = arith.constant 0 : index
    %c0_33 = arith.constant 0 : index
    %91 = vector.load %arg8[%c0_32, %c0_33] : memref<32x2xbf16, #tpu.memory_space<vmem>>, vector<32x2xbf16>
    %cst_34 = arith.constant dense<0.000000e+00> : vector<2x2xf32>
    %92 = tpu.matmul %90, %91, %cst_34 {dimension_numbers = #tpu.dot_dimension_numbers<[1], [0], [0], [1], [0, 0, 1, 1], [], []>} : vector<2x32xbf16>, vector<32x2xbf16>, vector<2x2xf32> -> vector<2x2xf32>
    %cst_35 = arith.constant 0.000000e+00 : f32
    %93 = vector.broadcast %cst_35 : f32 to vector<2x2xf32>
    %94 = arith.maximumf %92, %93 : vector<2x2xf32>
    %95 = arith.truncf %94 : vector<2x2xf32> to vector<2x2xbf16>
    %c0_36 = arith.constant 0 : index
    %c0_37 = arith.constant 0 : index
    %96 = vector.load %arg9[%c0_36, %c0_37] : memref<2x32xbf16, #tpu.memory_space<vmem>>, vector<2x32xbf16>
    %cst_38 = arith.constant dense<0.000000e+00> : vector<2x32xf32>
    %97 = tpu.matmul %95, %96, %cst_38 {dimension_numbers = #tpu.dot_dimension_numbers<[1], [0], [0], [1], [0, 0, 1, 1], [], []>} : vector<2x2xbf16>, vector<2x32xbf16>, vector<2x32xf32> -> vector<2x32xf32>
    %98 = vector.extract_strided_slice %97 {offsets = [0, 0], sizes = [1, 32], strides = [1, 1]} : vector<2x32xf32> to vector<1x32xf32>
    %99 = vector.extract_strided_slice %97 {offsets = [1, 0], sizes = [1, 32], strides = [1, 1]} : vector<2x32xf32> to vector<1x32xf32>
    %100 = arith.addf %98, %99 : vector<1x32xf32>
    %101 = arith.negf %100 : vector<1x32xf32>
    %102 = math.exp %101 : vector<1x32xf32>
    %cst_39 = arith.constant 1.000000e+00 : f32
    %103 = vector.broadcast %cst_39 : f32 to vector<1x32xf32>
    %104 = arith.addf %103, %102 : vector<1x32xf32>
    %105 = arith.divf %103, %104 : vector<1x32xf32>
    %106 = vector.shape_cast %105 : vector<1x32xf32> to vector<1x1x32xf32>
    %107 = vector.broadcast %106 : vector<1x1x32xf32> to vector<1x256x32xf32>
    %108 = arith.mulf %84, %107 : vector<1x256x32xf32>
    %cst_40 = arith.constant dense<0.000000e+00> : vector<1x256xf32>
    %109 = vector.multi_reduction <add>, %108, %cst_40 [2] : vector<1x256x32xf32> to vector<1x256xf32>
    %cst_41 = arith.constant 3.200000e+01 : f32
    %110 = vector.broadcast %cst_41 : f32 to vector<1x256xf32>
    %111 = arith.divf %109, %110 : vector<1x256xf32>
    %112 = vector.shape_cast %111 : vector<1x256xf32> to vector<1x16x16xf32>
    %cst_42 = arith.constant dense<0xFF800000> : vector<1x256xf32>
    %113 = vector.multi_reduction <maximumf>, %108, %cst_42 [2] : vector<1x256x32xf32> to vector<1x256xf32>
    %114 = vector.shape_cast %113 : vector<1x256xf32> to vector<1x16x16xf32>
    %cst_43 = arith.constant 0.000000e+00 : f32
    %115 = vector.broadcast %cst_43 : f32 to vector<1x3x16xf32>
    %116 = tpu.concatenate %115, %112, %115 in 1 : vector<1x3x16xf32>, vector<1x16x16xf32>, vector<1x3x16xf32> -> vector<1x22x16xf32>
    %117 = tpu.concatenate %115, %114, %115 in 1 : vector<1x3x16xf32>, vector<1x16x16xf32>, vector<1x3x16xf32> -> vector<1x22x16xf32>
    %118 = vector.extract_strided_slice %116 {offsets = [0, 0, 0], sizes = [1, 16, 16], strides = [1, 1, 1]} : vector<1x22x16xf32> to vector<1x16x16xf32>
    %119 = vector.extract_strided_slice %117 {offsets = [0, 0, 0], sizes = [1, 16, 16], strides = [1, 1, 1]} : vector<1x22x16xf32> to vector<1x16x16xf32>
    %120 = vector.extract_strided_slice %116 {offsets = [0, 1, 0], sizes = [1, 16, 16], strides = [1, 1, 1]} : vector<1x22x16xf32> to vector<1x16x16xf32>
    %121 = vector.extract_strided_slice %117 {offsets = [0, 1, 0], sizes = [1, 16, 16], strides = [1, 1, 1]} : vector<1x22x16xf32> to vector<1x16x16xf32>
    %122 = vector.extract_strided_slice %116 {offsets = [0, 2, 0], sizes = [1, 16, 16], strides = [1, 1, 1]} : vector<1x22x16xf32> to vector<1x16x16xf32>
    %123 = vector.extract_strided_slice %117 {offsets = [0, 2, 0], sizes = [1, 16, 16], strides = [1, 1, 1]} : vector<1x22x16xf32> to vector<1x16x16xf32>
    %124 = vector.extract_strided_slice %116 {offsets = [0, 3, 0], sizes = [1, 16, 16], strides = [1, 1, 1]} : vector<1x22x16xf32> to vector<1x16x16xf32>
    %125 = vector.extract_strided_slice %117 {offsets = [0, 3, 0], sizes = [1, 16, 16], strides = [1, 1, 1]} : vector<1x22x16xf32> to vector<1x16x16xf32>
    %126 = vector.extract_strided_slice %116 {offsets = [0, 4, 0], sizes = [1, 16, 16], strides = [1, 1, 1]} : vector<1x22x16xf32> to vector<1x16x16xf32>
    %127 = vector.extract_strided_slice %117 {offsets = [0, 4, 0], sizes = [1, 16, 16], strides = [1, 1, 1]} : vector<1x22x16xf32> to vector<1x16x16xf32>
    %128 = vector.extract_strided_slice %116 {offsets = [0, 5, 0], sizes = [1, 16, 16], strides = [1, 1, 1]} : vector<1x22x16xf32> to vector<1x16x16xf32>
    %129 = vector.extract_strided_slice %117 {offsets = [0, 5, 0], sizes = [1, 16, 16], strides = [1, 1, 1]} : vector<1x22x16xf32> to vector<1x16x16xf32>
    %130 = vector.extract_strided_slice %116 {offsets = [0, 6, 0], sizes = [1, 16, 16], strides = [1, 1, 1]} : vector<1x22x16xf32> to vector<1x16x16xf32>
    %131 = vector.extract_strided_slice %117 {offsets = [0, 6, 0], sizes = [1, 16, 16], strides = [1, 1, 1]} : vector<1x22x16xf32> to vector<1x16x16xf32>
    %132 = tpu.concatenate %118, %119, %120, %121, %122, %123, %124, %125, %126, %127, %128, %129, %130, %131 in 2 : vector<1x16x16xf32>, vector<1x16x16xf32>, vector<1x16x16xf32>, vector<1x16x16xf32>, vector<1x16x16xf32>, vector<1x16x16xf32>, vector<1x16x16xf32>, vector<1x16x16xf32>, vector<1x16x16xf32>, vector<1x16x16xf32>, vector<1x16x16xf32>, vector<1x16x16xf32>, vector<1x16x16xf32>, vector<1x16x16xf32> -> vector<1x16x224xf32>
    %133 = vector.shape_cast %132 : vector<1x16x224xf32> to vector<16x224xf32>
    %c0_44 = arith.constant 0 : index
    %c0_45 = arith.constant 0 : index
    %134 = vector.load %arg10[%c0_44, %c0_45] : memref<224x16xf32, #tpu.memory_space<vmem>>, vector<224x16xf32>
    %cst_46 = arith.constant dense<0.000000e+00> : vector<16x16xf32>
    %135 = tpu.matmul %133, %134, %cst_46 {dimension_numbers = #tpu.dot_dimension_numbers<[1], [0], [0], [1], [0, 0, 1, 1], [], []>} : vector<16x224xf32>, vector<224x16xf32>, vector<16x16xf32> -> vector<16x16xf32>
    %136 = arith.negf %135 : vector<16x16xf32>
    %137 = math.exp %136 : vector<16x16xf32>
    %cst_47 = arith.constant 1.000000e+00 : f32
    %138 = vector.broadcast %cst_47 : f32 to vector<16x16xf32>
    %139 = arith.addf %138, %137 : vector<16x16xf32>
    %140 = arith.divf %138, %139 : vector<16x16xf32>
    %141 = vector.shape_cast %140 : vector<16x16xf32> to vector<1x16x16x1xf32>
    %142 = vector.shape_cast %108 : vector<1x256x32xf32> to vector<1x16x16x32xf32>
    %143 = vector.broadcast %141 : vector<1x16x16x1xf32> to vector<1x16x16x32xf32>
    %144 = arith.mulf %142, %143 : vector<1x16x16x32xf32>
    %145 = arith.addf %144, %0 : vector<1x16x16x32xf32>
    %146 = vector.shape_cast %145 : vector<1x16x16x32xf32> to vector<1x16x512xf32>
    %c0_48 = arith.constant 0 : index
    %c0_49 = arith.constant 0 : index
    %c0_50 = arith.constant 0 : index
    %147 = vector.load %arg11[%c0_48, %c0_49, %c0_50] : memref<1x16x512xf32, #tpu.memory_space<vmem>>, vector<1x16x512xf32>
    tpu.vector_store %arg11[%c0_48, %c0_49, %c0_50], %146 {strides = array<i32>} : memref<1x16x512xf32, #tpu.memory_space<vmem>>, vector<1x16x512xf32>,
    return
  }
  func.func @transform_0(%arg0: i32) -> (i32, i32, i32, i32) {
    %c0_i32 = arith.constant 0 : i32
    %c0_i32_0 = arith.constant 0 : i32
    %c0_i32_1 = arith.constant 0 : i32
    %c0_i32_2 = arith.constant 0 : i32
    return %arg0, %c0_i32, %c0_i32_0, %c0_i32_1 : i32, i32, i32, i32
  }
  func.func @transform_1(%arg0: i32) -> (i32, i32, i32) {
    %c0_i32 = arith.constant 0 : i32
    %c0_i32_0 = arith.constant 0 : i32
    %c0_i32_1 = arith.constant 0 : i32
    %c0_i32_2 = arith.constant 0 : i32
    return %c0_i32, %c0_i32_0, %c0_i32_1 : i32, i32, i32
  }
  func.func @transform_2(%arg0: i32) -> (i32, i32) {
    %c0_i32 = arith.constant 0 : i32
    %c0_i32_0 = arith.constant 0 : i32
    %c0_i32_1 = arith.constant 0 : i32
    return %c0_i32, %c0_i32_0 : i32, i32
  }
  func.func @transform_3(%arg0: i32) -> (i32, i32) {
    %c0_i32 = arith.constant 0 : i32
    %c0_i32_0 = arith.constant 0 : i32
    %c0_i32_1 = arith.constant 0 : i32
    return %c0_i32, %c0_i32_0 : i32, i32
  }
  func.func @transform_4(%arg0: i32) -> (i32, i32, i32) {
    %c0_i32 = arith.constant 0 : i32
    %c0_i32_0 = arith.constant 0 : i32
    %c0_i32_1 = arith.constant 0 : i32
    %c0_i32_2 = arith.constant 0 : i32
    return %c0_i32, %c0_i32_0, %c0_i32_1 : i32, i32, i32
  }
  func.func @transform_5(%arg0: i32) -> (i32, i32) {
    %c0_i32 = arith.constant 0 : i32
    %c0_i32_0 = arith.constant 0 : i32
    %c0_i32_1 = arith.constant 0 : i32
    return %c0_i32, %c0_i32_0 : i32, i32
  }
  func.func @transform_6(%arg0: i32) -> (i32, i32) {
    %c0_i32 = arith.constant 0 : i32
    %c0_i32_0 = arith.constant 0 : i32
    %c0_i32_1 = arith.constant 0 : i32
    return %c0_i32, %c0_i32_0 : i32, i32
  }
  func.func @transform_7(%arg0: i32) -> (i32, i32) {
    %c0_i32 = arith.constant 0 : i32
    %c0_i32_0 = arith.constant 0 : i32
    %c0_i32_1 = arith.constant 0 : i32
    return %c0_i32, %c0_i32_0 : i32, i32
  }
  func.func @transform_8(%arg0: i32) -> (i32, i32) {
    %c0_i32 = arith.constant 0 : i32
    %c0_i32_0 = arith.constant 0 : i32
    %c0_i32_1 = arith.constant 0 : i32
    return %c0_i32, %c0_i32_0 : i32, i32
  }
  func.func @transform_9(%arg0: i32) -> (i32, i32) {
    %c0_i32 = arith.constant 0 : i32
    %c0_i32_0 = arith.constant 0 : i32
    %c0_i32_1 = arith.constant 0 : i32
    return %c0_i32, %c0_i32_0 : i32, i32
  }
  func.func @transform_10(%arg0: i32) -> (i32, i32, i32) {
    %c0_i32 = arith.constant 0 : i32
    %c0_i32_0 = arith.constant 0 : i32
    %c0_i32_1 = arith.constant 0 : i32
    return %arg0, %c0_i32, %c0_i32_0 : i32, i32, i32
  }
}

</mosaic_0001>

<bundles_post_ra>
// kernel: tpu_custom_call.1
= control target key start
LH: loop header
LB: loop body
LE: loop exit
PB: predicated region body
PF: predicated region fallthrough
CT: control target
= control target key end

     0   :  { %15 = vsyncpa [#allocation3], 0  ;;  %s9650_s0 = inlined_call_operand.vmem [shape: f32[2,16,16,32], index: 0, kind: input, shape index: {}]   ;;  %s9651_s1 = inlined_call_operand.vmem [shape: bf16[3,96,32], index: 1, kind: input, shape index: {}]   ;;  %s9652_s2 = inlined_call_operand.vmem [shape: f32[1,32], index: 2, kind: input, shape index: {}]   ;;  %s9653_s3 = inlined_call_operand.vmem [shape: f32[1,32], index: 3, kind: input, shape index: {}]   ;;  %s9654_s4 = inlined_call_operand.vmem [shape: bf16[3,96,32], index: 4, kind: input, shape index: {}]   ;;  %s9655_s5 = inlined_call_operand.vmem [shape: f32[1,32], index: 5, kind: input, shape index: {}]   ;;  %s9656_s6 = inlined_call_operand.vmem [shape: f32[1,32], index: 6, kind: input, shape index: {}]   ;;  %s9657_s7 = inlined_call_operand.vmem [shape: bf16[32,2], index: 7, kind: input, shape index: {}]   ;;  %s9658_s8 = inlined_call_operand.vmem [shape: bf16[2,32], index: 8, kind: input, shape index: {}]   ;;  %s9659_s9 = inlined_call_operand.vmem [shape: f32[224,16], index: 9, kind: input, shape index: {}]   ;;  %s9660_s10 = inlined_call_operand.hbm [shape: f32[2,16,512], index: 10, kind: output, shape index: {}]  }
   0x1   :  { %17 = vsyncpa [#allocation3 + $0x1], 0  ;;  %s6835_s13 = smov 0   ;;  %s6837_s14 = smov 0  }
   0x2   :  { %s6839_s15 = smov 0   ;;  %s6841_s16 = smov 0  }
   0x3 LB: > { %s6856_s17 = sadd.s32 4294967295, %s6763_s16   ;;  %s5790_s18 = sadd.s32 4294967294, %s6763_s16   ;;  %s6763_s16 = sphi %s6841_s16, %s9773_s16   ;;  %s6759_s15 = sphi %s6839_s15, %s9772_s15   ;;  %s6755_s14 = sphi %s6837_s14, %s9771_s14   ;;  %s6751_s13 = sphi %s6835_s13, %s9770_s13  }
   0x4   : > { %s6860_s19 = sadd.s32 1, %s6763_s16   ;;  %s245_s20 = sadd.s32 1, %s6759_s15 }
   0x5   : > { %s242_s21 = ssub.s32 %s6763_s16, %s6860_s19  ;;  %p255_p0 = scmp.ne.s32.totalorder %s6759_s15, %s6755_s14 }
   0x6   : > { %p243_p1 = scmp.eq.s32.totalorder %s242_s21, 0  ;;  %p256_p2 = scmp.eq.s32.totalorder %s6856_s17, 1 }
   0x7   : > { %p261_p3 = scmp.ne.s32.totalorder %s6755_s14, %s6751_s13  ;;  %p262_p4 = scmp.eq.s32.totalorder %s5790_s18, 1 }
   0x8   : > { %s6871_s22 = scalar_select %p243_p1, %s6759_s15, %s245_s20  }
   0x9   : > { %p6873_p5 = por %p256_p2, %p255_p0  ;;  %p6877_p6 = por %p262_p4, %p261_p3 }
   0xa   : > { %p5793_p7 = scmp.ge.s32.totalorder %s6763_s16, 1  ;;  %p315_p8 = scmp.lt.s32.totalorder %s6763_s16, 3 }
   0xc   : > { %p316_p9 = pnand %p5793_p7, %p315_p8 }
   0xe   : > { %319 = sbr.rel (%p316_p9) target bundleno = 2800 (0xaf0), region = 60 }
  0x15   : > { %p353_p10 = scmp.lt.s32.totalorder %s6856_s17, 1  ;;  %v6619_v0 = vld [vmem:[%s9651_s1 + $0x30] sm:$0xff]   ;;  %v6620_v1 = vld [vmem:[%s9651_s1 + $0x38] sm:$0xff]   ;;  %v6765_v2 = vmov 0   ;;  %v6621_v3 = vld [vmem:[%s9651_s1 + $0x40] sm:$0xff]   ;;  %vm560_vm0 = vcmask 1040384  }
  0x16   : > { %6587 = vset.pattern.permute.xlu0 %v6765_v2  ;;  %6588 = vset.pattern.permute.xlu1 %v6765_v2  ;;  %vm561_vm1 = vsmask.f32 256  ;;  %vm892_vm2 = vcmask 1046528   ;;  %v6911_v22 = vrot.slane %v6765_v2, 7  ;;  %vm635_vm3 = vsmask.f32 7424 }
  0x17   : > { %s354_s25 = scalar_select %p353_p10, %s6856_s17, 1  ;;  %6086 = vmatprep.subr.bf16.mxu0 %v6619_v0  ;;  %vm6919_vm4 = vmand %vm560_vm0, %vm561_vm1  ;;  %v6622_v58 = vld [vmem:[%s9651_s1 + $0x48] sm:$0xff]   ;;  %v6623_v63 = vld [vmem:[%s9651_s1 + $0x50] sm:$0xff]   ;;  %vm973_vm5 = vcmask 261120   ;;  %vm1006_vm6 = vcmask 523264   ;;  %vm1100_vm7 = vcmask 785408  }
  0x18   : > { %6087 = vmatpush3.bf16.msra.mxu0 %v6619_v0  ;;  %s6766_s29 = smov 64   ;;  %s6767_s12 = smov 32   ;;  %vm6769_vm8 = vmmov 0   ;;  %vm3396_vm9 = vcmask 15360   ;;  %vm3757_vm10 = vcmask 130112   ;;  %vm4492_vm11 = vcmask 1042432  }
  0x19   : > { %s5947_s30 = sshll.u32 %s354_s25, 8  ;;  %6088 = vmatprep.subr.bf16.mxu0 %v6620_v1  ;;  %s6773_s25 = smov 16   ;;  %vm4543_vm12 = vcmask 1045504   ;;  %vm4589_vm13 = vcmask 1043456   ;;  %vm4630_vm14 = vcmask 1041408   ;;  %vm4566_vm15 = vcmask 1044480  }
  0x1a   : > { %s6894_s18 = scalar_lea.vmem %s9650_s0, %s5947_s30  ;;  %s6774_s26 = smov 48   ;;  %vm4658_vm1 = vcmask 392192  }
  0x1b   : > { %v359_v4 = vld [vmem:[%s6894_s18] sm:$0xff]  ;;  %v360_v5 = vld [vmem:[%s6894_s18 + $0x8] sm:$0xff]  ;;  %v361_v6 = vld [vmem:[%s6894_s18 + $0x10] sm:$0xff]  ;;  %s6775_s30 = smov 80   ;;  %s6777_s27 = smov 96  }
  0x1c   : > { %v391_v7 = vpack.c.bf16 %v360_v5, %v359_v4  ;;  %v362_v8 = vld [vmem:[%s6894_s18 + $0x18] sm:$0xff]  ;;  %v365_v9 = vld [vmem:[%s6894_s18 + $0x30] sm:$0xff]  ;;  %v363_v13 = vld [vmem:[%s6894_s18 + $0x20] sm:$0xff]  ;;  %6089 = vmatpush3.bf16.msra.mxu0 %v6620_v1 }
  0x1d   : > { %v366_v10 = vld [vmem:[%s6894_s18 + $0x38] sm:$0xff]  ;;  %v392_v11 = vpack.c.bf16 %v362_v8, %v361_v6  ;;  %v364_v14 = vld [vmem:[%s6894_s18 + $0x28] sm:$0xff]  ;;  %v369_v15 = vld [vmem:[%s6894_s18 + $0x50] sm:$0xff]  ;;  %6090 = vmatprep.subr.bf16.mxu0 %v6621_v3 }
  0x1e   : > { %v394_v12 = vpack.c.bf16 %v366_v10, %v365_v9  ;;  %v415_v16 = vshrl.u32 %v391_v7, 16  ;;  %v418_v17 = vshll.u32 %v391_v7, 16  ;;  %v393_v18 = vpack.c.bf16 %v364_v14, %v363_v13  ;;  %v370_v19 = vld [vmem:[%s6894_s18 + $0x58] sm:$0xff]  ;;  %v367_v20 = vld [vmem:[%s6894_s18 + $0x40] sm:$0xff]  ;;  %v368_v21 = vld [vmem:[%s6894_s18 + $0x48] sm:$0xff] }
  0x1f   : > { %v422_v23 = vshrl.u32 %v392_v11, 16  ;;  %v425_v24 = vshll.u32 %v392_v11, 16  ;;  %v373_v27 = vld [vmem:[%s6894_s18 + $0x70] sm:$0xff]  ;;  %v374_v28 = vld [vmem:[%s6894_s18 + $0x78] sm:$0xff]  ;;  %v6915_v32 = vpack.c.bf16 %v370_v19, %v369_v15  ;;  %v6923_v36 = vpack.c.bf16 %v368_v21, %v367_v20 }
  0x20   : > { %v436_v25 = vshrl.u32 %v394_v12, 16  ;;  %v439_v26 = vshll.u32 %v394_v12, 16  ;;  %v417_v29 = vrot.slane %v415_v16, 7  ;;  %v429_v30 = vshrl.u32 %v393_v18, 16  ;;  %6091 = vmatpush3.bf16.msra.mxu0 %v6621_v3  ;;  %v6624_v8 = vld [vmem:[%s9651_s1 + $0x58] sm:$0xff]  }
  0x21   : > { %v432_v31 = vshll.u32 %v393_v18, 16  ;;  %v424_v34 = vrot.slane %v422_v23, 7  ;;  %v6925_v37 = vpack.c.bf16 %v374_v28, %v373_v27  ;;  %v450_v41 = vshrl.u32 %v6915_v32, 16  ;;  %6092 = vmatprep.subr.bf16.mxu0 %v6622_v58  ;;  %v6984_v27 = vld [vmem:[%s9651_s1] sm:$0xff]  }
  0x22   : > { %v438_v35 = vrot.slane %v436_v25, 7  ;;  %v420_v38 = vor.u32 %v418_v17, %v417_v29  ;;  %v581_v39 = vsel %vm6919_vm4, %v417_v29, 0  ;;  %v431_v40 = vrot.slane %v429_v30, 7  ;;  %v371_v25 = vld [vmem:[%s6894_s18 + $0x60] sm:$0xff] }
  0x23   : > { %v897_v42 = vrot.slane %v581_v39, 1  ;;  %v656_v43 = vshll.u32 %v581_v39, 16  ;;  %v427_v44 = vor.u32 %v425_v24, %v424_v34  ;;  %v582_v45 = vsel %vm6919_vm4, %v424_v34, 0 }
  0x24   : > { %v6934_v46 = vsel %vm6919_vm4, 0, %v420_v38  ;;  %v900_v47 = vrot.slane %v582_v45, 1  ;;  %v668_v48 = vshll.u32 %v582_v45, 16  ;;  %v441_v49 = vor.u32 %v439_v26, %v438_v35  ;;  %6093 = vmatpush3.bf16.msra.mxu0 %v6622_v58  ;;  %v372_v26 = vld [vmem:[%s6894_s18 + $0x68] sm:$0xff]  ;;  %v378_v45 = vld [vmem:[%s6894_s18 + $0x98] sm:$0xff] }
  0x25   : > { %v896_v50 = vrot.slane %v6934_v46, 1  ;;  %v649_v51 = vshrl.u32 %v6934_v46, 16  ;;  %v651_v52 = vshll.u32 %v6934_v46, 16  ;;  %v658_v53 = vrot.slane %v656_v43, 1  ;;  %6094 = vmatprep.subr.bf16.mxu0 %v6623_v63 }
  0x26   : > { %v6941_v54 = vsel %vm6919_vm4, 0, %v427_v44  ;;  %v670_v55 = vrot.slane %v668_v48, 1  ;;  %v6945_v56 = vsel %vm6919_vm4, 0, %v441_v49  ;;  %v584_v57 = vsel %vm6919_vm4, %v438_v35, 0 }
  0x27   : > { %v898_v59 = vsel %vm892_vm2, %v896_v50, %v897_v42  ;;  %v653_v60 = vrot.slane %v651_v52, 1  ;;  %v899_v61 = vrot.slane %v6941_v54, 1  ;;  %v661_v62 = vshrl.u32 %v6941_v54, 16 }
  0x28   : > { %943 = vrot.lane.b32.xlu1 %v898_v59, %s6766_s29  ;;  %v663_v0 = vshll.u32 %v6941_v54, 16  ;;  %v685_v1 = vshrl.u32 %v6945_v56, 16  ;;  %v687_v2 = vshll.u32 %v6945_v56, 16  ;;  %v692_v3 = vshll.u32 %v584_v57, 16  ;;  %6095 = vmatpush3.bf16.msra.mxu0 %v6623_v63 }
  0x29   : > { %v654_v4 = vor.u32 %v653_v60, %v649_v51  ;;  %v901_v5 = vsel %vm892_vm2, %v899_v61, %v900_v47  ;;  %v434_v6 = vor.u32 %v432_v31, %v431_v40  ;;  %v583_v7 = vsel %vm6919_vm4, %v431_v40, 0  ;;  %6096 = vmatprep.subr.bf16.mxu0 %v6624_v8  ;;  %v377_v40 = vld [vmem:[%s6894_s18 + $0x90] sm:$0xff] }
  0x2a   : > { %v665_v9 = vrot.slane %v663_v0, 1  ;;  %v689_v10 = vrot.slane %v687_v2, 1  ;;  %v694_v11 = vrot.slane %v692_v3, 1  ;;  %v680_v12 = vshll.u32 %v583_v7, 16 }
  0x2b   : > { %v659_v13 = vsel %vm635_vm3, %v654_v4, %v658_v53  ;;  %v6971_v14 = vsel %vm6919_vm4, 0, %v434_v6  ;;  %v905_v15 = vrot.slane %v6945_v56, 1  ;;  %v906_v16 = vrot.slane %v584_v57, 1 }
  0x2c   : > { %830 = vrot.lane.b32.xlu0 %v659_v13, %s6767_s12  ;;  %945 = vrot.lane.b32.xlu1 %v901_v5, %s6766_s29  ;;  %v666_v17 = vor.u32 %v665_v9, %v661_v62  ;;  %v690_v18 = vor.u32 %v689_v10, %v685_v1  ;;  %v673_v19 = vshrl.u32 %v6971_v14, 16  ;;  %v675_v20 = vshll.u32 %v6971_v14, 16 }
  0x2d   : > { %v682_v21 = vrot.slane %v680_v12, 1  ;;  %v902_v23 = vrot.slane %v6971_v14, 1  ;;  %v903_v24 = vrot.slane %v583_v7, 1  ;;  %v452_v31 = vrot.slane %v450_v41, 7  ;;  %6097 = vmatpush3.bf16.msra.mxu0 %v6624_v8 }
  0x2e   : > { %v671_v28 = vsel %vm635_vm3, %v666_v17, %v670_v55  ;;  %v695_v29 = vsel %vm635_vm3, %v690_v18, %v694_v11  ;;  %v677_v30 = vrot.slane %v675_v20, 1  ;;  %v907_v34 = vsel %vm892_vm2, %v905_v15, %v906_v16  ;;  %6130 = vmatprep.subr.bf16.mxu0 %v6984_v27  ;;  %v375_v15 = vld [vmem:[%s6894_s18 + $0x80] sm:$0xff]  ;;  %v376_v20 = vld [vmem:[%s6894_s18 + $0x88] sm:$0xff] }
  0x2f   : > { %v453_v35 = vshll.u32 %v6915_v32, 16  ;;  %v443_v38 = vshrl.u32 %v6923_v36, 16  ;;  %v446_v39 = vshll.u32 %v6923_v36, 16  ;;  %v904_v43 = vsel %vm892_vm2, %v902_v23, %v903_v24 }
  0x30   : > { %832 = vrot.lane.b32.xlu0 %v671_v28, %s6767_s12  ;;  %836 = vrot.lane.b32.xlu1 %v695_v29, %s6767_s12  ;;  %v678_v42 = vor.u32 %v677_v30, %v673_v19  ;;  %v586_v41 = vsel %vm6919_vm4, %v452_v31, 0  ;;  %v464_v44 = vshrl.u32 %v6925_v37, 16  ;;  %v467_v49 = vshll.u32 %v6925_v37, 16  ;;  %v382_v28 = vld [vmem:[%s6894_s18 + $0xb8] sm:$0xff] }
  0x31   : > { %v455_v47 = vor.u32 %v453_v35, %v452_v31  ;;  %v716_v32 = vshll.u32 %v586_v41, 16  ;;  %v445_v48 = vrot.slane %v443_v38, 7  ;;  %v912_v50 = vrot.slane %v586_v41, 1 }
  0x32   : > { %v683_v36 = vsel %vm635_vm3, %v678_v42, %v682_v21  ;;  %v466_v51 = vrot.slane %v464_v44, 7  ;;  %v397_v52 = vpack.c.bf16 %v372_v26, %v371_v25  ;;  %v400_v58 = vpack.c.bf16 %v378_v45, %v377_v40  ;;  %v381_v26 = vld [vmem:[%s6894_s18 + $0xb0] sm:$0xff] }
  0x33   : > { %v7007_v53 = vsel %vm6919_vm4, 0, %v455_v47  ;;  %v448_v55 = vor.u32 %v446_v39, %v445_v48  ;;  %v585_v57 = vsel %vm6919_vm4, %v445_v48, 0  ;;  %v718_v60 = vrot.slane %v716_v32, 1 }
  0x34   : > { %834 = vrot.lane.b32.xlu0 %v683_v36, %s6767_s12  ;;  %949 = vrot.lane.b32.xlu1 %v907_v34, %s6766_s29  ;;  %v709_v37 = vshrl.u32 %v7007_v53, 16  ;;  %v711_v59 = vshll.u32 %v7007_v53, 16  ;;  %v704_v61 = vshll.u32 %v585_v57, 16  ;;  %v911_v63 = vrot.slane %v7007_v53, 1 }
  0x35   : > { %v7017_v62 = vsel %vm6919_vm4, 0, %v448_v55  ;;  %v469_v0 = vor.u32 %v467_v49, %v466_v51  ;;  %v588_v1 = vsel %vm6919_vm4, %v466_v51, 0  ;;  %v909_v5 = vrot.slane %v585_v57, 1 }
  0x36   : > { %v713_v2 = vrot.slane %v711_v59, 1  ;;  %v697_v3 = vshrl.u32 %v7017_v62, 16  ;;  %v699_v4 = vshll.u32 %v7017_v62, 16  ;;  %v706_v6 = vrot.slane %v704_v61, 1 }
  0x37   : > { %v908_v7 = vrot.slane %v7017_v62, 1  ;;  %v7027_v8 = vsel %vm6919_vm4, 0, %v469_v0  ;;  %v740_v9 = vshll.u32 %v588_v1, 16  ;;  %v913_v16 = vsel %vm892_vm2, %v911_v63, %v912_v50 }
  0x38   : > { %947 = vrot.lane.b32.xlu0 %v904_v43, %s6766_s29  ;;  %v714_v10 = vor.u32 %v713_v2, %v709_v37  ;;  %v701_v11 = vrot.slane %v699_v4, 1  ;;  %v733_v12 = vshrl.u32 %v7027_v8, 16  ;;  %v735_v13 = vshll.u32 %v7027_v8, 16  ;;  %v380_v4 = vld [vmem:[%s6894_s18 + $0xa8] sm:$0xff] }
  0x39   : > { %v742_v17 = vrot.slane %v740_v9, 1  ;;  %v457_v18 = vshrl.u32 %v397_v52, 16  ;;  %v460_v19 = vshll.u32 %v397_v52, 16  ;;  %v917_v25 = vrot.slane %v7027_v8, 1 }
  0x3a   : > { %v719_v21 = vsel %vm635_vm3, %v714_v10, %v718_v60  ;;  %v702_v23 = vor.u32 %v701_v11, %v697_v3  ;;  %v737_v24 = vrot.slane %v735_v13, 1  ;;  %v918_v30 = vrot.slane %v588_v1, 1  ;;  %v379_v3 = vld [vmem:[%s6894_s18 + $0xa0] sm:$0xff]  ;;  %v385_v10 = vld [vmem:[%s6894_s18 + $0xd0] sm:$0xff]  ;;  %v386_v11 = vld [vmem:[%s6894_s18 + $0xd8] sm:$0xff] }
  0x3b   : > { %840 = vrot.lane.b32.xlu1 %v719_v21, %s6767_s12  ;;  %v459_v29 = vrot.slane %v457_v18, 7  ;;  %v478_v31 = vshrl.u32 %v400_v58, 16  ;;  %v481_v34 = vshll.u32 %v400_v58, 16  ;;  %v910_v38 = vsel %vm892_vm2, %v908_v7, %v909_v5  ;;  %v384_v18 = vld [vmem:[%s6894_s18 + $0xc8] sm:$0xff] }
  0x3c   : > { %v707_v35 = vsel %vm635_vm3, %v702_v23, %v706_v6  ;;  %v738_v39 = vor.u32 %v737_v24, %v733_v12  ;;  %v399_v40 = vpack.c.bf16 %v376_v20, %v375_v15  ;;  %v402_v44 = vpack.c.bf16 %v382_v28, %v381_v26 }
  0x3d   : > { %838 = vrot.lane.b32.xlu0 %v707_v35, %s6767_s12  ;;  %v462_v42 = vor.u32 %v460_v19, %v459_v29  ;;  %v587_v43 = vsel %vm6919_vm4, %v459_v29, 0  ;;  %v480_v41 = vrot.slane %v478_v31, 7  ;;  %v919_v47 = vsel %vm892_vm2, %v917_v25, %v918_v30 }
  0x3e   : > { %v728_v45 = vshll.u32 %v587_v43, 16  ;;  %v915_v32 = vrot.slane %v587_v43, 1  ;;  %v471_v48 = vshrl.u32 %v399_v40, 16  ;;  %v474_v51 = vshll.u32 %v399_v40, 16 }
  0x3f   : > { %953 = vrot.lane.b32.xlu1 %v913_v16, %s6766_s29  ;;  %v7049_v49 = vsel %vm6919_vm4, 0, %v462_v42  ;;  %v483_v36 = vor.u32 %v481_v34, %v480_v41  ;;  %v590_v50 = vsel %vm6919_vm4, %v480_v41, 0  ;;  %v743_v52 = vsel %vm635_vm3, %v738_v39, %v742_v17  ;;  %v383_v17 = vld [vmem:[%s6894_s18 + $0xc0] sm:$0xff] }
  0x40   : > { %v721_v55 = vshrl.u32 %v7049_v49, 16  ;;  %v723_v57 = vshll.u32 %v7049_v49, 16  ;;  %v914_v58 = vrot.slane %v7049_v49, 1  ;;  %v730_v37 = vrot.slane %v728_v45, 1 }
  0x41   : > { %951 = vrot.lane.b32.xlu0 %v910_v38, %s6766_s29  ;;  %v7060_v59 = vsel %vm6919_vm4, 0, %v483_v36  ;;  %v764_v60 = vshll.u32 %v590_v50, 16  ;;  %v473_v61 = vrot.slane %v471_v48, 7  ;;  %v924_v2 = vrot.slane %v590_v50, 1 }
  0x42   : > { %v725_v63 = vrot.slane %v723_v57, 1  ;;  %v757_v0 = vshrl.u32 %v7060_v59, 16  ;;  %v759_v1 = vshll.u32 %v7060_v59, 16  ;;  %v916_v5 = vsel %vm892_vm2, %v914_v58, %v915_v32 }
  0x43   : > { %844 = vrot.lane.b32.xlu1 %v743_v52, %s6767_s12  ;;  %v476_v6 = vor.u32 %v474_v51, %v473_v61  ;;  %v589_v7 = vsel %vm6919_vm4, %v473_v61, 0  ;;  %v923_v9 = vrot.slane %v7060_v59, 1  ;;  %v766_v15 = vrot.slane %v764_v60, 1 }
  0x44   : > { %v726_v12 = vor.u32 %v725_v63, %v721_v55  ;;  %v761_v13 = vrot.slane %v759_v1, 1  ;;  %v752_v16 = vshll.u32 %v589_v7, 16  ;;  %v921_v20 = vrot.slane %v589_v7, 1 }
  0x45   : > { %v7077_v19 = vsel %vm6919_vm4, 0, %v476_v6  ;;  %v492_v21 = vshrl.u32 %v402_v44, 16  ;;  %v495_v23 = vshll.u32 %v402_v44, 16  ;;  %v925_v30 = vsel %vm892_vm2, %v923_v9, %v924_v2 }
  0x46   : > { %v731_v24 = vsel %vm635_vm3, %v726_v12, %v730_v37  ;;  %v762_v25 = vor.u32 %v761_v13, %v757_v0  ;;  %v745_v26 = vshrl.u32 %v7077_v19, 16  ;;  %v747_v28 = vshll.u32 %v7077_v19, 16 }
  0x47   : > { %842 = vrot.lane.b32.xlu0 %v731_v24, %s6767_s12  ;;  %957 = vrot.lane.b32.xlu1 %v919_v47, %s6766_s29  ;;  %v754_v29 = vrot.slane %v752_v16, 1  ;;  %v494_v31 = vrot.slane %v492_v21, 7  ;;  %v401_v34 = vpack.c.bf16 %v380_v4, %v379_v3  ;;  %v920_v39 = vrot.slane %v7077_v19, 1  ;;  %v388_v16 = vld [vmem:[%s6894_s18 + $0xe8] sm:$0xff] }
  0x48   : > { %v767_v35 = vsel %vm635_vm3, %v762_v25, %v766_v15  ;;  %v749_v38 = vrot.slane %v747_v28, 1  ;;  %v404_v40 = vpack.c.bf16 %v386_v11, %v385_v10  ;;  %v403_v44 = vpack.c.bf16 %v384_v18, %v383_v17  ;;  %v387_v15 = vld [vmem:[%s6894_s18 + $0xe0] sm:$0xff]  ;;  %v389_v28 = vld [vmem:[%s6894_s18 + $0xf0] sm:$0xff] }
  0x49   : > { %v497_v42 = vor.u32 %v495_v23, %v494_v31  ;;  %v592_v43 = vsel %vm6919_vm4, %v494_v31, 0  ;;  %v485_v41 = vshrl.u32 %v401_v34, 16  ;;  %v488_v47 = vshll.u32 %v401_v34, 16  ;;  %v390_v34 = vld [vmem:[%s6894_s18 + $0xf8] sm:$0xff] }
  0x4a   : > { %v750_v45 = vor.u32 %v749_v38, %v745_v26  ;;  %v788_v32 = vshll.u32 %v592_v43, 16  ;;  %v930_v48 = vrot.slane %v592_v43, 1  ;;  %v506_v51 = vshrl.u32 %v404_v40, 16 }
  0x4b   : > { %955 = vrot.lane.b32.xlu0 %v916_v5, %s6766_s29  ;;  %848 = vrot.lane.b32.xlu1 %v767_v35, %s6767_s12  ;;  %v7093_v36 = vsel %vm6919_vm4, 0, %v497_v42  ;;  %v487_v50 = vrot.slane %v485_v41, 7  ;;  %v509_v52 = vshll.u32 %v404_v40, 16  ;;  %v499_v4 = vshrl.u32 %v403_v44, 16 }
  0x4c   : > { %v755_v55 = vsel %vm635_vm3, %v750_v45, %v754_v29  ;;  %v781_v57 = vshrl.u32 %v7093_v36, 16  ;;  %v783_v58 = vshll.u32 %v7093_v36, 16  ;;  %v790_v37 = vrot.slane %v788_v32, 1 }
  0x4d   : > { %v490_v60 = vor.u32 %v488_v47, %v487_v50  ;;  %v591_v61 = vsel %vm6919_vm4, %v487_v50, 0  ;;  %v929_v63 = vrot.slane %v7093_v36, 1  ;;  %v508_v0 = vrot.slane %v506_v51, 7 }
  0x4e   : > { %v785_v1 = vrot.slane %v783_v58, 1  ;;  %v776_v2 = vshll.u32 %v591_v61, 16  ;;  %v927_v3 = vrot.slane %v591_v61, 1  ;;  %v922_v5 = vsel %vm892_vm2, %v920_v39, %v921_v20 }
  0x4f   : > { %846 = vrot.lane.b32.xlu0 %v755_v55, %s6767_s12  ;;  %961 = vrot.lane.b32.xlu1 %v925_v30, %s6766_s29  ;;  %v7106_v6 = vsel %vm6919_vm4, 0, %v490_v60  ;;  %v511_v7 = vor.u32 %v509_v52, %v508_v0  ;;  %v594_v9 = vsel %vm6919_vm4, %v508_v0, 0  ;;  %v501_v21 = vrot.slane %v499_v4, 7 }
  0x50   : > { %v786_v10 = vor.u32 %v785_v1, %v781_v57  ;;  %v769_v11 = vshrl.u32 %v7106_v6, 16  ;;  %v771_v12 = vshll.u32 %v7106_v6, 16  ;;  %v778_v13 = vrot.slane %v776_v2, 1 }
  0x51   : > { %v926_v17 = vrot.slane %v7106_v6, 1  ;;  %v7117_v18 = vsel %vm6919_vm4, 0, %v511_v7  ;;  %v812_v20 = vshll.u32 %v594_v9, 16  ;;  %v931_v29 = vsel %vm892_vm2, %v929_v63, %v930_v48 }
  0x52   : > { %v791_v23 = vsel %vm635_vm3, %v786_v10, %v790_v37  ;;  %v773_v24 = vrot.slane %v771_v12, 1  ;;  %v805_v25 = vshrl.u32 %v7117_v18, 16  ;;  %v807_v26 = vshll.u32 %v7117_v18, 16 }
  0x53   : > { %959 = vrot.lane.b32.xlu0 %v922_v5, %s6766_s29  ;;  %852 = vrot.lane.b32.xlu1 %v791_v23, %s6767_s12  ;;  %v502_v30 = vshll.u32 %v403_v44, 16  ;;  %v593_v31 = vsel %vm6919_vm4, %v501_v21, 0  ;;  %v7132_v35 = vsel %vm6919_vm4, 0, %v6911_v22  ;;  %v928_v39 = vsel %vm892_vm2, %v926_v17, %v927_v3 }
  0x54   : > { %v774_v38 = vor.u32 %v773_v24, %v769_v11  ;;  %v809_v40 = vrot.slane %v807_v26, 1  ;;  %v814_v42 = vrot.slane %v812_v20, 1  ;;  %v800_v41 = vshll.u32 %v593_v31, 16 }
  0x55   : > { %v504_v43 = vor.u32 %v502_v30, %v501_v21  ;;  %v935_v45 = vrot.slane %v7117_v18, 1  ;;  %v405_v32 = vpack.c.bf16 %v388_v16, %v387_v15  ;;  %v936_v48 = vrot.slane %v594_v9, 1 }
  0x56   : > { %v779_v44 = vsel %vm635_vm3, %v774_v38, %v778_v13  ;;  %v810_v47 = vor.u32 %v809_v40, %v805_v25  ;;  %v406_v50 = vpack.c.bf16 %v390_v34, %v389_v28  ;;  %v933_v52 = vrot.slane %v593_v31, 1 }
  0x57   : > { %850 = vrot.lane.b32.xlu0 %v779_v44, %s6767_s12  ;;  %965 = vrot.lane.b32.xlu1 %v931_v29, %s6766_s29  ;;  %v7141_v51 = vsel %vm6919_vm4, 0, %v504_v43  ;;  %v513_v55 = vshrl.u32 %v405_v32, 16  ;;  %v516_v57 = vshll.u32 %v405_v32, 16  ;;  %v802_v3 = vrot.slane %v800_v41, 1 }
  0x58   : > { %v815_v58 = vsel %vm635_vm3, %v810_v47, %v814_v42  ;;  %v793_v37 = vshrl.u32 %v7141_v51, 16  ;;  %v795_v60 = vshll.u32 %v7141_v51, 16  ;;  %v932_v61 = vrot.slane %v7141_v51, 1 }
  0x59   : > { %v515_v63 = vrot.slane %v513_v55, 7  ;;  %v520_v0 = vshrl.u32 %v406_v50, 16  ;;  %v523_v1 = vshll.u32 %v406_v50, 16  ;;  %v580_v4 = vsel %vm6919_vm4, %v6911_v22, 0 }
  0x5a   : > { %v797_v2 = vrot.slane %v795_v60, 1  ;;  %v639_v5 = vshll.u32 %v7132_v35, 16  ;;  %v937_v12 = vsel %vm892_vm2, %v935_v45, %v936_v48  ;;  %v934_v13 = vsel %vm892_vm2, %v932_v61, %v933_v52 }
  0x5b   : > { %963 = vrot.lane.b32.xlu0 %v928_v39, %s6766_s29  ;;  %856 = vrot.lane.b32.xlu1 %v815_v58, %s6767_s12  ;;  %v518_v7 = vor.u32 %v516_v57, %v515_v63  ;;  %v595_v9 = vsel %vm6919_vm4, %v515_v63, 0  ;;  %v522_v10 = vrot.slane %v520_v0, 7  ;;  %v637_v41 = vshrl.u32 %v7132_v35, 16 }
  0x5c   : > { %v798_v11 = vor.u32 %v797_v2, %v793_v37  ;;  %v824_v15 = vshll.u32 %v595_v9, 16  ;;  %v939_v16 = vrot.slane %v595_v9, 1  ;;  %v641_v45 = vrot.slane %v639_v5, 1  ;;  %v6626_v9 = vld [vmem:[%s9651_s1 + $0x8] sm:$0xff]  }
  0x5d   : > { %v7159_v22 = vsel %vm6919_vm4, 0, %v518_v7  ;;  %v525_v17 = vor.u32 %v523_v1, %v522_v10  ;;  %v596_v20 = vsel %vm6919_vm4, %v522_v10, 0  ;;  %v644_v32 = vshll.u32 %v580_v4, 16 }
  0x5e   : > { %v803_v21 = vsel %vm635_vm3, %v798_v11, %v802_v3  ;;  %v817_v23 = vshrl.u32 %v7159_v22, 16  ;;  %v819_v24 = vshll.u32 %v7159_v22, 16  ;;  %v826_v25 = vrot.slane %v824_v15, 1 }
  0x5f   : > { %854 = vrot.lane.b32.xlu0 %v803_v21, %s6767_s12  ;;  %969 = vrot.lane.b32.xlu1 %v937_v12, %s6766_s29  ;;  %v938_v26 = vrot.slane %v7159_v22, 1  ;;  %v7171_v28 = vsel %vm6919_vm4, 0, %v525_v17  ;;  %v1047_v29 = vshll.u32 %v596_v20, 16  ;;  %v1056_v30 = vrot.slane %v596_v20, 1  ;;  %v6627_v12 = vld [vmem:[%s9651_s1 + $0x10] sm:$0xff]   ;;  %v6629_v20 = vld [vmem:[%s9651_s1 + $0x20] sm:$0xff]  }
  0x60   : > { %v821_v31 = vrot.slane %v819_v24, 1  ;;  %v1040_v34 = vshrl.u32 %v7171_v28, 16  ;;  %v1042_v38 = vshll.u32 %v7171_v28, 16  ;;  %v1055_v39 = vrot.slane %v7171_v28, 1 }
  0x61   : > { %v940_v40 = vsel %vm892_vm2, %v938_v26, %v939_v16  ;;  %v893_v44 = vrot.slane %v7132_v35, 1  ;;  %v894_v47 = vrot.slane %v580_v4, 1  ;;  %v1049_v52 = vrot.slane %v1047_v29, 1  ;;  %v6630_v29 = vld [vmem:[%s9651_s1 + $0x28] sm:$0xff]  }
  0x62   : > { %v822_v42 = vor.u32 %v821_v31, %v817_v23  ;;  %v1044_v43 = vrot.slane %v1042_v38, 1  ;;  %v1057_v55 = vsel %vm892_vm2, %v1055_v39, %v1056_v30  ;;  %v642_v58 = vor.u32 %v641_v45, %v637_v41 }
  0x63   : > { %967 = vrot.lane.b32.xlu0 %v934_v13, %s6766_s29  ;;  %971 = vrot.lane.b32.xlu1 %v940_v40, %s6766_s29  ;;  %v646_v37 = vrot.slane %v644_v32, 1  ;;  %v895_v60 = vsel %vm892_vm2, %v893_v44, %v894_v47 }
  0x64   : > { %v827_v48 = vsel %vm635_vm3, %v822_v42, %v826_v25  ;;  %v1045_v50 = vor.u32 %v1044_v43, %v1040_v34 }
  0x65   : > { %v647_v61 = vsel %vm635_vm3, %v642_v58, %v646_v37 }
  0x66   : > { %v1050_v57 = vsel %vm635_vm3, %v1045_v50, %v1049_v52 }
  0x67   : > { %858 = vrot.lane.b32.xlu0 %v827_v48, %s6767_s12  ;;  %1058 = vrot.lane.b32.xlu1 %v1057_v55, %s6766_s29 }
  0x6b   : > { %1051 = vrot.lane.b32.xlu0 %v1050_v57, %s6767_s12  ;;  %941 = vrot.lane.b32.xlu1 %v895_v60, %s6766_s29 }
  0x6f   : > { %828 = vrot.lane.b32.xlu0 %v647_v61, %s6767_s12 }
  0x9a   : > { %v944_v63 = vpop.permute.xlu1 %943 }
  0x9e   : > { %v831_v0 = vpop.permute.xlu0 %830  ;;  %v946_v1 = vpop.permute.xlu1 %945 }
  0x9f   : > { %v977_v2 = vsel %vm973_vm5, %v6934_v46, %v831_v0 }
  0xa0   : > { %v7194_v3 = vsel %vm1006_vm6, %v977_v2, %v944_v63 }
  0xa1   : > { %6098 = vmatprep.mubr.msk.bf16.mxu0 %vm1100_vm7, %v7194_v3 }
  0xa2   : > { %v833_v4 = vpop.permute.xlu0 %832  ;;  %v837_v5 = vpop.permute.xlu1 %836 }
  0xa3   : > { %v979_v7 = vsel %vm973_vm5, %v6941_v54, %v833_v4  ;;  %v983_v54 = vsel %vm973_vm5, %v6945_v56, %v837_v5 }
  0xa4   : > { %v7204_v10 = vsel %vm1006_vm6, %v979_v7, %v946_v1 }
  0xa5   : > { %6099 = vmatmul.mubr.msk.bf16.vlgmr.msra.gmra.mrb[0].mxu0 %vm1100_vm7, %v7204_v10 }
  0xa6   : > { %6131 = vmatpush3.bf16.msra.mxu0 %v6984_v27  ;;  %v835_v46 = vpop.permute.xlu0 %834  ;;  %v950_v11 = vpop.permute.xlu1 %949  ;;  %v6628_v27 = vld [vmem:[%s9651_s1 + $0x18] sm:$0xff]  }
  0xa7   : > { %6132 = vmatprep.subr.bf16.mxu0 %v6626_v9  ;;  %v981_v13 = vsel %vm973_vm5, %v6971_v14, %v835_v46  ;;  %v7223_v17 = vsel %vm1006_vm6, %v983_v54, %v950_v11 }
  0xaa   : > { %v948_v15 = vpop.permute.xlu0 %947  ;;  %6133 = vmatpush3.bf16.msra.mxu0 %v6626_v9 }
  0xab   : > { %v7217_v16 = vsel %vm1006_vm6, %v981_v13, %v948_v15  ;;  %6134 = vmatprep.subr.bf16.mxu0 %v6627_v12  ;;  %v6632_v15 = vld [vmem:[%s9651_s1 + $0x68] sm:$0xff]  }
  0xac   : > { %6102 = vmatprep.mubr.msk.bf16.mxu0 %vm1100_vm7, %v7217_v16 }
  0xad   : > { %v841_v56 = vpop.permute.xlu1 %840  ;;  %6103 = vmatmul.mubr.msk.bf16.gmra.mrb[4].mxu0 %vm1100_vm7, %v7223_v17 }
  0xae   : > { %6135 = vmatpush3.bf16.msra.mxu0 %v6627_v12  ;;  %v987_v23 = vsel %vm973_vm5, %v7007_v53, %v841_v56  ;;  %v6631_v53 = vld [vmem:[%s9651_s1 + $0x60] sm:$0xff]   ;;  %v6640_v56 = vld [vmem:[%s9654_s4 + $0x48] sm:$0xff]  }
  0xaf   : > { %v839_v14 = vpop.permute.xlu0 %838  ;;  %6136 = vmatprep.subr.bf16.mxu0 %v6628_v27 }
  0xb0   : > { %v985_v24 = vsel %vm973_vm5, %v7017_v62, %v839_v14  ;;  %v6641_v14 = vld [vmem:[%s9654_s4 + $0x50] sm:$0xff]  }
  0xb1   : > { %v954_v21 = vpop.permute.xlu1 %953 }
  0xb2   : > { %6137 = vmatpush3.bf16.msra.mxu0 %v6628_v27  ;;  %v7243_v30 = vsel %vm1006_vm6, %v987_v23, %v954_v21  ;;  %v6636_v27 = vld [vmem:[%s9651_s1 + $0x88] sm:$0xff]   ;;  %v7410_v21 = vld [vmem:[%s9653_s3] ss:$0 sm:$0xff] }
  0xb3   : > { %v952_v25 = vpop.permute.xlu0 %951  ;;  %6138 = vmatprep.subr.bf16.mxu0 %v6629_v20 }
  0xb4   : > { %v7237_v26 = vsel %vm1006_vm6, %v985_v24, %v952_v25 }
  0xb5   : > { %v845_v31 = vpop.permute.xlu1 %844  ;;  %6106 = vmatprep.mubr.msk.bf16.mxu0 %vm1100_vm7, %v7237_v26 }
  0xb6   : > { %6107 = vmatmul.mubr.msk.bf16.gmra.mrb[8].mxu0 %vm1100_vm7, %v7243_v30  ;;  %v991_v38 = vsel %vm973_vm5, %v7027_v8, %v845_v31 }
  0xb7   : > { %6139 = vmatpush3.bf16.msra.mxu0 %v6629_v20  ;;  %v7405_v20 = vld [vmem:[%s9652_s2] ss:$0 sm:$0xff] }
  0xb8   : > { %6140 = vmatprep.subr.bf16.mxu0 %v6630_v29 }
  0xb9   : > { %v843_v62 = vpop.permute.xlu0 %842  ;;  %v958_v34 = vpop.permute.xlu1 %957 }
  0xba   : > { %v989_v39 = vsel %vm973_vm5, %v7049_v49, %v843_v62  ;;  %v7260_v41 = vsel %vm1006_vm6, %v991_v38, %v958_v34 }
  0xbb   : > { %6141 = vmatpush3.bf16.msra.mxu0 %v6630_v29 }
  0xbc   : > { %6174 = vmatprep.subr.bf16.mxu0 %v6631_v53 }
  0xbd   : > { %v956_v40 = vpop.permute.xlu0 %955  ;;  %v849_v42 = vpop.permute.xlu1 %848 }
  0xbe   : > { %v7257_v43 = vsel %vm1006_vm6, %v989_v39, %v956_v40  ;;  %v995_v32 = vsel %vm973_vm5, %v7060_v59, %v849_v42 }
  0xbf   : > { %6110 = vmatprep.mubr.msk.bf16.mxu0 %vm1100_vm7, %v7257_v43 }
  0xc0   : > { %6111 = vmatmul.mubr.msk.bf16.gmra.mrb[12].mxu0 %vm1100_vm7, %v7260_v41 }
  0xc1   : > { %v847_v45 = vpop.permute.xlu0 %846  ;;  %v962_v8 = vpop.permute.xlu1 %961 }
  0xc2   : > { %v993_v49 = vsel %vm973_vm5, %v7077_v19, %v847_v45  ;;  %v7274_v50 = vsel %vm1006_vm6, %v995_v32, %v962_v8 }
  0xc5   : > { %v960_v44 = vpop.permute.xlu0 %959  ;;  %v853_v47 = vpop.permute.xlu1 %852 }
  0xc6   : > { %v7271_v48 = vsel %vm1006_vm6, %v993_v49, %v960_v44  ;;  %v999_v59 = vsel %vm973_vm5, %v7093_v36, %v853_v47 }
  0xc7   : > { %6114 = vmatprep.mubr.msk.bf16.mxu0 %vm1100_vm7, %v7271_v48 }
  0xc8   : > { %6115 = vmatmul.mubr.msk.bf16.gmra.mrb[16].mxu0 %vm1100_vm7, %v7274_v50 }
  0xc9   : > { %v851_v52 = vpop.permute.xlu0 %850  ;;  %v966_v55 = vpop.permute.xlu1 %965 }
  0xca   : > { %v997_v19 = vsel %vm973_vm5, %v7106_v6, %v851_v52  ;;  %v7288_v60 = vsel %vm1006_vm6, %v999_v59, %v966_v55 }
  0xcd   : > { %v964_v57 = vpop.permute.xlu0 %963  ;;  %v857_v58 = vpop.permute.xlu1 %856 }
  0xce   : > { %v7285_v37 = vsel %vm1006_vm6, %v997_v19, %v964_v57  ;;  %v1003_v36 = vsel %vm973_vm5, %v7117_v18, %v857_v58 }
  0xcf   : > { %6118 = vmatprep.mubr.msk.bf16.mxu0 %vm1100_vm7, %v7285_v37 }
  0xd0   : > { %6119 = vmatmul.mubr.msk.bf16.gmra.mrb[20].mxu0 %vm1100_vm7, %v7288_v60 }
  0xd1   : > { %v855_v61 = vpop.permute.xlu0 %854  ;;  %v970_v63 = vpop.permute.xlu1 %969 }
  0xd2   : > { %v1001_v6 = vsel %vm973_vm5, %v7141_v51, %v855_v61  ;;  %v1036_v4 = vsel %vm1006_vm6, %v1003_v36, %v970_v63 }
  0xd5   : > { %v968_v0 = vpop.permute.xlu0 %967  ;;  %v972_v2 = vpop.permute.xlu1 %971 }
  0xd6   : > { %v1034_v1 = vsel %vm1006_vm6, %v1001_v6, %v968_v0 }
  0xd7   : > { %6122 = vmatprep.mubr.msk.bf16.mxu0 %vm1100_vm7, %v1034_v1 }
  0xd8   : > { %6123 = vmatmul.mubr.msk.bf16.gmra.mrb[24].mxu0 %vm1100_vm7, %v1036_v4 }
  0xd9   : > { %v859_v5 = vpop.permute.xlu0 %858  ;;  %v1059_v18 = vpop.permute.xlu1 %1058 }
  0xda   : > { %v1005_v7 = vsel %vm973_vm5, %v7159_v22, %v859_v5 }
  0xdb   : > { %v1038_v9 = vsel %vm1006_vm6, %v1005_v7, %v972_v2 }
  0xdc   : > { %6126 = vmatprep.mubr.msk.bf16.mxu0 %vm1100_vm7, %v1038_v9 }
  0xdd   : > { %v1052_v51 = vpop.permute.xlu0 %1051  ;;  %v942_v12 = vpop.permute.xlu1 %941 }
  0xde   : > { %v1061_v46 = vsel %vm973_vm5, %v7171_v28, %v1052_v51  ;;  %v6634_v28 = vld [vmem:[%s9651_s1 + $0x78] sm:$0xff]  }
  0xdf   : > { %v1063_v11 = vsel %vm1006_vm6, %v1061_v46, %v1059_v18 }
  0xe0   : > { %6127 = vmatmul.mubr.msk.bf16.gmra.mrb[28].mxu0 %vm1100_vm7, %v1063_v11 }
  0xe1   : > { %v829_v54 = vpop.permute.xlu0 %828 }
  0xe2   : > { %v975_v13 = vsel %vm973_vm5, %v7132_v35, %v829_v54  ;;  %v6633_v35 = vld [vmem:[%s9651_s1 + $0x70] sm:$0xff]  }
  0xe3   : > { %v7313_v22 = vsel %vm1006_vm6, %v975_v13, %v942_v12 }
  0xe4   : > { %6142 = vmatprep.mubr.msk.bf16.mxu0 %vm1100_vm7, %v7313_v22 }
  0xe8   : > { %6143 = vmatmul.mubr.msk.bf16.vlgmr.msra.gmra.mrb[0].mxu0 %vm1100_vm7, %v7194_v3  ;;  %v6635_v3 = vld [vmem:[%s9651_s1 + $0x80] sm:$0xff]  }
  0xe9   : > { %6175 = vmatpush3.bf16.msra.mxu0 %v6631_v53  ;;  %6146 = vmatprep.mubr.msk.bf16.mxu0 %vm1100_vm7, %v7204_v10 }
  0xea   : > { %6176 = vmatprep.subr.bf16.mxu0 %v6632_v15 }
  0xed   : > { %6177 = vmatpush3.bf16.msra.mxu0 %v6632_v15 }
  0xee   : > { %6178 = vmatprep.subr.bf16.mxu0 %v6633_v35 }
  0xf0   : > { %6147 = vmatmul.mubr.msk.bf16.gmra.mrb[4].mxu0 %vm1100_vm7, %v7217_v16 }
  0xf1   : > { %6150 = vmatprep.mubr.msk.bf16.mxu0 %vm1100_vm7, %v7223_v17  ;;  %6179 = vmatpush3.bf16.msra.mxu0 %v6633_v35 }
  0xf2   : > { %6180 = vmatprep.subr.bf16.mxu0 %v6634_v28 }
  0xf5   : > { %6181 = vmatpush3.bf16.msra.mxu0 %v6634_v28 }
  0xf6   : > { %6182 = vmatprep.subr.bf16.mxu0 %v6635_v3 }
  0xf8   : > { %6151 = vmatmul.mubr.msk.bf16.gmra.mrb[8].mxu0 %vm1100_vm7, %v7237_v26 }
  0xf9   : > { %6154 = vmatprep.mubr.msk.bf16.mxu0 %vm1100_vm7, %v7243_v30  ;;  %6183 = vmatpush3.bf16.msra.mxu0 %v6635_v3  ;;  %v6642_v3 = vld [vmem:[%s9654_s4 + $0x58] sm:$0xff]  }
  0xfa   : > { %6184 = vmatprep.subr.bf16.mxu0 %v6636_v27 }
  0xfd   : > { %6185 = vmatpush3.bf16.msra.mxu0 %v6636_v27 }
 0x100   : > { %6155 = vmatmul.mubr.msk.bf16.gmra.mrb[12].mxu0 %vm1100_vm7, %v7257_v43 }
 0x101   : > { %6158 = vmatprep.mubr.msk.bf16.mxu0 %vm1100_vm7, %v7260_v41 }
 0x108   : > { %6159 = vmatmul.mubr.msk.bf16.gmra.mrb[16].mxu0 %vm1100_vm7, %v7271_v48 }
 0x109   : > { %6162 = vmatprep.mubr.msk.bf16.mxu0 %vm1100_vm7, %v7274_v50 }
 0x110   : > { %6163 = vmatmul.mubr.msk.bf16.gmra.mrb[20].mxu0 %vm1100_vm7, %v7285_v37 }
 0x111   : > { %6166 = vmatprep.mubr.msk.bf16.mxu0 %vm1100_vm7, %v7288_v60 }
 0x118   : > { %6167 = vmatmul.mubr.msk.bf16.gmra.mrb[24].mxu0 %vm1100_vm7, %v1034_v1 }
 0x119   : > { %6170 = vmatprep.mubr.msk.bf16.mxu0 %vm1100_vm7, %v1036_v4 }
 0x120   : > { %6171 = vmatmul.mubr.msk.bf16.gmra.mrb[28].mxu0 %vm1100_vm7, %v1038_v9 }
 0x121   : > { %6186 = vmatprep.mubr.msk.bf16.mxu0 %vm1100_vm7, %v7204_v10  ;;  %v6637_v10 = vld [vmem:[%s9654_s4 + $0x30] sm:$0xff]  }
 0x122   : > { %6218 = vmatprep.subr.bf16.mxu1 %v6637_v10 }
 0x123   : > { %6219 = vmatpush3.bf16.msra.mxu1 %v6637_v10 }
 0x128   : > { %6187 = vmatmul.mubr.msk.bf16.vlgmr.msra.gmra.mrb[0].mxu0 %vm1100_vm7, %v7217_v16  ;;  %v6638_v16 = vld [vmem:[%s9654_s4 + $0x38] sm:$0xff]  }
 0x129   : > { %6190 = vmatprep.mubr.msk.bf16.mxu0 %vm1100_vm7, %v7223_v17  ;;  %6220 = vmatprep.subr.bf16.mxu1 %v6638_v16  ;;  %v6639_v17 = vld [vmem:[%s9654_s4 + $0x40] sm:$0xff]  }
 0x12a   : > { %6221 = vmatpush3.bf16.msra.mxu1 %v6638_v16 }
 0x12b   : > { %6222 = vmatprep.subr.bf16.mxu1 %v6639_v17 }
 0x12e   : > { %6223 = vmatpush3.bf16.msra.mxu1 %v6639_v17 }
 0x12f   : > { %6224 = vmatprep.subr.bf16.mxu1 %v6640_v56 }
 0x130   : > { %6191 = vmatmul.mubr.msk.bf16.gmra.mrb[4].mxu0 %vm1100_vm7, %v7237_v26 }
 0x131   : > { %6194 = vmatprep.mubr.msk.bf16.mxu0 %vm1100_vm7, %v7243_v30 }
 0x132   : > { %6225 = vmatpush3.bf16.msra.mxu1 %v6640_v56 }
 0x133   : > { %6226 = vmatprep.subr.bf16.mxu1 %v6641_v14 }
 0x136   : > { %6227 = vmatpush3.bf16.msra.mxu1 %v6641_v14 }
 0x137   : > { %6228 = vmatprep.subr.bf16.mxu1 %v6642_v3 }
 0x138   : > { %6195 = vmatmul.mubr.msk.bf16.gmra.mrb[8].mxu0 %vm1100_vm7, %v7257_v43 }
 0x139   : > { %6198 = vmatprep.mubr.msk.bf16.mxu0 %vm1100_vm7, %v7260_v41 }
 0x13a   : > { %6229 = vmatpush3.bf16.msra.mxu1 %v6642_v3 }
 0x140   : > { %6199 = vmatmul.mubr.msk.bf16.gmra.mrb[12].mxu0 %vm1100_vm7, %v7271_v48 }
 0x141   : > { %6202 = vmatprep.mubr.msk.bf16.mxu0 %vm1100_vm7, %v7274_v50 }
 0x148   : > { %6203 = vmatmul.mubr.msk.bf16.gmra.mrb[16].mxu0 %vm1100_vm7, %v7285_v37 }
 0x149   : > { %6206 = vmatprep.mubr.msk.bf16.mxu0 %vm1100_vm7, %v7288_v60 }
 0x150   : > { %6207 = vmatmul.mubr.msk.bf16.gmra.mrb[20].mxu0 %vm1100_vm7, %v1034_v1 }
 0x151   : > { %6210 = vmatprep.mubr.msk.bf16.mxu0 %vm1100_vm7, %v1036_v4 }
 0x158   : > { %6211 = vmatmul.mubr.msk.bf16.gmra.mrb[24].mxu0 %vm1100_vm7, %v1038_v9 }
 0x159   : > { %6214 = vmatprep.mubr.msk.bf16.mxu0 %vm1100_vm7, %v1063_v11 }
 0x160   : > { %6215 = vmatmul.mubr.msk.bf16.gmra.mrb[28].mxu0 %vm1100_vm7, %v7313_v22 }
 0x1fb   : > { %v6188_v23 = vpop.f32.mrb[0].mxu0 }
 0x1fc   : > { %v1730_v24 = vmul.f32 %v6188_v23, %v7405_v20  ;;  %v1563_v25 = vpop.f32.mrb[1].mxu0 }
 0x1fd   : > { %v1728_v26 = vmul.f32 %v7405_v20, %v1563_v25  ;;  %v6189_v29 = vpop.f32.mrb[2].mxu0 }
 0x1fe   : > { %v1768_v30 = vadd.f32 %v7410_v21, %v1730_v24  ;;  %v1731_v31 = vmul.f32 %v6189_v29, %v7405_v20  ;;  %v1566_v53 = vpop.f32.mrb[3].mxu0 }
 0x1ff   : > { %v1766_v62 = vadd.f32 %v7410_v21, %v1728_v26  ;;  %v1729_v34 = vmul.f32 %v7405_v20, %v1566_v53 }
 0x200   : > { %v1769_v38 = vadd.f32 %v7410_v21, %v1731_v31  ;;  %v1800_v40 = vmax.f32 %v1768_v30, 0.0 }
 0x201   : > { %v1767_v39 = vadd.f32 %v7410_v21, %v1729_v34  ;;  %v1798_v43 = vmax.f32 %v1766_v62, 0.0 }
 0x202   : > { %v1801_v42 = vmax.f32 %v1769_v38, 0.0 }
 0x203   : > { %v1799_v41 = vmax.f32 %v1767_v39, 0.0  ;;  %v6192_v45 = vpop.f32.mrb[4].mxu0 }
 0x204   : > { %v1831_v8 = vpack.c.bf16 %v1801_v42, %v1800_v40  ;;  %v1734_v32 = vmul.f32 %v6192_v45, %v7405_v20  ;;  %v1579_v49 = vpop.f32.mrb[5].mxu0 }
 0x205   : > { %v1830_v44 = vpack.c.bf16 %v1799_v41, %v1798_v43  ;;  %v1732_v47 = vmul.f32 %v7405_v20, %v1579_v49  ;;  %v6193_v48 = vpop.f32.mrb[6].mxu0  ;;  %v7464_v41 = vld [vmem:[%s9654_s4] sm:$0xff]  }
 0x206   : > { %v1854_v50 = vshrl.u32 %v1831_v8, 16  ;;  %v1772_v52 = vadd.f32 %v7410_v21, %v1734_v32  ;;  %v1735_v55 = vmul.f32 %v6193_v48, %v7405_v20  ;;  %v1582_v59 = vpop.f32.mrb[7].mxu0  ;;  %v1857_v60 = vshll.u32 %v1831_v8, 16  ;;  %6262 = vmatprep.subr.bf16.mxu1 %v7464_v41 }
 0x207   : > { %v1847_v19 = vshrl.u32 %v1830_v44, 16  ;;  %v1770_v57 = vadd.f32 %v7410_v21, %v1732_v47  ;;  %v1733_v58 = vmul.f32 %v7405_v20, %v1582_v59  ;;  %v1850_v36 = vshll.u32 %v1830_v44, 16 }
 0x208   : > { %v1856_v37 = vrot.slane %v1854_v50, 7  ;;  %v1773_v61 = vadd.f32 %v7410_v21, %v1735_v55  ;;  %v1804_v1 = vmax.f32 %v1772_v52, 0.0 }
 0x209   : > { %v1849_v63 = vrot.slane %v1847_v19, 7  ;;  %v1771_v6 = vadd.f32 %v7410_v21, %v1733_v58  ;;  %v1802_v7 = vmax.f32 %v1770_v57, 0.0 }
 0x20a   : > { %v1859_v0 = vor.u32 %v1857_v60, %v1856_v37  ;;  %v1805_v2 = vmax.f32 %v1773_v61, 0.0  ;;  %v7430_v4 = vsel %vm6919_vm4, %v1856_v37, 0 }
 0x20b   : > { %v1852_v5 = vor.u32 %v1850_v36, %v1849_v63  ;;  %v1803_v9 = vmax.f32 %v1771_v6, 0.0  ;;  %v6196_v18 = vpop.f32.mrb[8].mxu0  ;;  %v7434_v51 = vsel %vm6919_vm4, %v1849_v63, 0  ;;  %v2080_v28 = vshll.u32 %v7430_v4, 16 }
 0x20c   : > { %v1833_v46 = vpack.c.bf16 %v1805_v2, %v1804_v1  ;;  %v1738_v11 = vmul.f32 %v6196_v18, %v7405_v20  ;;  %v1595_v12 = vpop.f32.mrb[9].mxu0  ;;  %v7439_v54 = vsel %vm6919_vm4, 0, %v1859_v0  ;;  %v2068_v56 = vshll.u32 %v7434_v51, 16 }
 0x20d   : > { %v1832_v13 = vpack.c.bf16 %v1803_v9, %v1802_v7  ;;  %v1736_v15 = vmul.f32 %v7405_v20, %v1595_v12  ;;  %v6197_v35 = vpop.f32.mrb[10].mxu0  ;;  %v7451_v14 = vsel %vm6919_vm4, 0, %v1852_v5  ;;  %v2073_v30 = vshrl.u32 %v7439_v54, 16 }
 0x20e   : > { %v1868_v27 = vshrl.u32 %v1833_v46, 16  ;;  %v1776_v10 = vadd.f32 %v7410_v21, %v1738_v11  ;;  %v1739_v16 = vmul.f32 %v6197_v35, %v7405_v20  ;;  %v1598_v17 = vpop.f32.mrb[11].mxu0  ;;  %v2075_v31 = vshll.u32 %v7439_v54, 16 }
 0x20f   : > { %v1861_v23 = vshrl.u32 %v1832_v13, 16  ;;  %v1774_v24 = vadd.f32 %v7410_v21, %v1736_v15  ;;  %v1737_v25 = vmul.f32 %v7405_v20, %v1598_v17  ;;  %v1871_v53 = vshll.u32 %v1833_v46, 16 }
 0x210   : > { %v1870_v26 = vrot.slane %v1868_v27, 7  ;;  %v1777_v29 = vadd.f32 %v7410_v21, %v1739_v16  ;;  %v1864_v34 = vshll.u32 %v1832_v13, 16  ;;  %v1808_v39 = vmax.f32 %v1776_v10, 0.0 }
 0x211   : > { %v7458_v62 = vrot.slane %v1861_v23, 7  ;;  %v1775_v38 = vadd.f32 %v7410_v21, %v1737_v25  ;;  %v1806_v40 = vmax.f32 %v1774_v24, 0.0  ;;  %v2077_v43 = vrot.slane %v2075_v31, 1 }
 0x212   : > { %v1809_v42 = vmax.f32 %v1777_v29, 0.0  ;;  %v1873_v45 = vor.u32 %v1871_v53, %v1870_v26  ;;  %v2082_v49 = vrot.slane %v2080_v28, 1  ;;  %v2063_v44 = vshll.u32 %v7451_v14, 16 }
 0x213   : > { %v1807_v8 = vmax.f32 %v1775_v38, 0.0  ;;  %v6200_v32 = vpop.f32.mrb[12].mxu0  ;;  %v2078_v50 = vor.u32 %v2077_v43, %v2073_v30  ;;  %v2061_v55 = vshrl.u32 %v7451_v14, 16  ;;  %v1866_v59 = vor.u32 %v1864_v34, %v7458_v62 }
 0x214   : > { %v1835_v47 = vpack.c.bf16 %v1809_v42, %v1808_v39  ;;  %v1742_v48 = vmul.f32 %v6200_v32, %v7405_v20  ;;  %v1611_v52 = vpop.f32.mrb[13].mxu0  ;;  %v2065_v58 = vrot.slane %v2063_v44, 1  ;;  %v2070_v36 = vrot.slane %v2068_v56, 1 }
 0x215   : > { %v1834_v19 = vpack.c.bf16 %v1807_v8, %v1806_v40  ;;  %v1740_v57 = vmul.f32 %v7405_v20, %v1611_v52  ;;  %v6201_v37 = vpop.f32.mrb[14].mxu0  ;;  %v2083_v63 = vsel %vm635_vm3, %v2078_v50, %v2082_v49  ;;  %v7476_v0 = vsel %vm6919_vm4, 0, %v1873_v45 }
 0x216   : > { %v1882_v60 = vshrl.u32 %v1835_v47, 16  ;;  %v1780_v61 = vadd.f32 %v7410_v21, %v1742_v48  ;;  %v1614_v6 = vpop.f32.mrb[15].mxu0  ;;  %2242 = vrot.lane.b32.xlu1 %v2083_v63, %s6767_s12  ;;  %v2066_v5 = vor.u32 %v2065_v58, %v2061_v55  ;;  %v1885_v9 = vshll.u32 %v1835_v47, 16 }
 0x217   : > { %v1875_v1 = vshrl.u32 %v1834_v19, 16  ;;  %v1778_v2 = vadd.f32 %v7410_v21, %v1740_v57  ;;  %v1743_v18 = vmul.f32 %v6201_v37, %v7405_v20  ;;  %v1741_v46 = vmul.f32 %v7405_v20, %v1614_v6 }
 0x218   : > { %v7480_v7 = vrot.slane %v1882_v60, 7  ;;  %v1878_v11 = vshll.u32 %v1834_v19, 16  ;;  %v1812_v12 = vmax.f32 %v1780_v61, 0.0  ;;  %v2071_v13 = vsel %vm635_vm3, %v2066_v5, %v2070_v36 }
 0x219   : > { %v2303_v15 = vrot.slane %v7439_v54, 1  ;;  %v7486_v35 = vrot.slane %v1875_v1, 7  ;;  %2240 = vrot.lane.b32.xlu0 %v2071_v13, %s6767_s12  ;;  %v1781_v28 = vadd.f32 %v7410_v21, %v1743_v18  ;;  %v1779_v3 = vadd.f32 %v7410_v21, %v1741_v46 }
 0x21a   : > { %v2304_v27 = vrot.slane %v7430_v4, 1  ;;  %v1887_v10 = vor.u32 %v1885_v9, %v7480_v7  ;;  %v1810_v16 = vmax.f32 %v1778_v2, 0.0  ;;  %v2300_v17 = vrot.slane %v7451_v14, 1 }
 0x21b   : > { %v2301_v56 = vrot.slane %v7434_v51, 1  ;;  %v6204_v23 = vpop.f32.mrb[16].mxu0  ;;  %v1813_v24 = vmax.f32 %v1781_v28, 0.0  ;;  %v1811_v25 = vmax.f32 %v1779_v3, 0.0  ;;  %v7498_v30 = vsel %vm6919_vm4, %v1870_v26, 0 }
 0x21c   : > { %v2305_v29 = vsel %vm892_vm2, %v2303_v15, %v2304_v27  ;;  %v1627_v31 = vpop.f32.mrb[17].mxu0  ;;  %v7502_v4 = vsel %vm6919_vm4, 0, %v1866_v59  ;;  %v1746_v51 = vmul.f32 %v6204_v23, %v7405_v20  ;;  %v1880_v38 = vor.u32 %v1878_v11, %v7486_v35 }
 0x21d   : > { %2347 = vrot.lane.b32.xlu1 %v2305_v29, %s6766_s29  ;;  %v2302_v53 = vsel %vm892_vm2, %v2300_v17, %v2301_v56  ;;  %v6205_v34 = vpop.f32.mrb[18].mxu0  ;;  %v1837_v39 = vpack.c.bf16 %v1813_v24, %v1812_v12  ;;  %v1836_v40 = vpack.c.bf16 %v1811_v25, %v1810_v16  ;;  %v2099_v26 = vshll.u32 %v7476_v0, 16 }
 0x21e   : > { %2345 = vrot.lane.b32.xlu0 %v2302_v53, %s6766_s29  ;;  %v1630_v42 = vpop.f32.mrb[19].mxu0  ;;  %v7512_v43 = vsel %vm6919_vm4, 0, %v1887_v10  ;;  %v2104_v45 = vshll.u32 %v7498_v30, 16  ;;  %v1744_v8 = vmul.f32 %v7405_v20, %v1627_v31  ;;  %v2008_v32 = vsel %vm6919_vm4, %v7458_v62, 0 }
 0x21f   : > { %v1896_v49 = vshrl.u32 %v1837_v39, 16  ;;  %v1889_v44 = vshrl.u32 %v1836_v40, 16  ;;  %v1784_v47 = vadd.f32 %v7410_v21, %v1746_v51  ;;  %v2097_v48 = vshrl.u32 %v7476_v0, 16 }
 0x220   : > { %v1899_v50 = vshll.u32 %v1837_v39, 16  ;;  %v2101_v52 = vrot.slane %v2099_v26, 1  ;;  %v1782_v55 = vadd.f32 %v7410_v21, %v1744_v8  ;;  %v2085_v59 = vshrl.u32 %v7502_v4, 16 }
 0x221   : > { %v7523_v19 = vrot.slane %v1896_v49, 7  ;;  %v7525_v57 = vrot.slane %v1889_v44, 7  ;;  %v2087_v58 = vshll.u32 %v7502_v4, 16  ;;  %v2092_v37 = vshll.u32 %v2008_v32, 16 }
 0x222   : > { %v2102_v62 = vor.u32 %v2101_v52, %v2097_v48  ;;  %v2106_v60 = vrot.slane %v2104_v45, 1  ;;  %v1747_v61 = vmul.f32 %v6205_v34, %v7405_v20  ;;  %v1745_v63 = vmul.f32 %v7405_v20, %v1630_v42 }
 0x223   : > { %v6208_v36 = vpop.f32.mrb[20].mxu0  ;;  %v1892_v6 = vshll.u32 %v1836_v40, 16  ;;  %v1816_v1 = vmax.f32 %v1784_v47, 0.0  ;;  %v1814_v2 = vmax.f32 %v1782_v55, 0.0  ;;  %v2089_v5 = vrot.slane %v2087_v58, 1 }
 0x224   : > { %v1643_v9 = vpop.f32.mrb[21].mxu0  ;;  %v2107_v18 = vsel %vm635_vm3, %v2102_v62, %v2106_v60  ;;  %v1785_v46 = vadd.f32 %v7410_v21, %v1747_v61  ;;  %v1783_v11 = vadd.f32 %v7410_v21, %v1745_v63  ;;  %v2309_v12 = vrot.slane %v7476_v0, 1 }
 0x225   : > { %v6209_v13 = vpop.f32.mrb[22].mxu0  ;;  %v1901_v15 = vor.u32 %v1899_v50, %v7523_v19  ;;  %v1894_v28 = vor.u32 %v1892_v6, %v7525_v57  ;;  %2246 = vrot.lane.b32.xlu1 %v2107_v18, %s6767_s12  ;;  %v2090_v3 = vor.u32 %v2089_v5, %v2085_v59  ;;  %v2094_v27 = vrot.slane %v2092_v37, 1 }
 0x226   : > { %v1646_v10 = vpop.f32.mrb[23].mxu0  ;;  %v1817_v16 = vmax.f32 %v1785_v46, 0.0  ;;  %v1815_v17 = vmax.f32 %v1783_v11, 0.0  ;;  %v2310_v56 = vrot.slane %v7498_v30, 1  ;;  %v2306_v23 = vrot.slane %v7502_v4, 1 }
 0x227   : > { %v7541_v24 = vsel %vm6919_vm4, 0, %v1880_v38  ;;  %v2095_v25 = vsel %vm635_vm3, %v2090_v3, %v2094_v27  ;;  %v1750_v29 = vmul.f32 %v6208_v36, %v7405_v20  ;;  %v2011_v31 = vsel %vm6919_vm4, %v7480_v7, 0 }
 0x228   : > { %2244 = vrot.lane.b32.xlu0 %v2095_v25, %s6767_s12  ;;  %v1839_v53 = vpack.c.bf16 %v1817_v16, %v1816_v1  ;;  %v1838_v51 = vpack.c.bf16 %v1815_v17, %v1814_v2  ;;  %v2311_v30 = vsel %vm892_vm2, %v2309_v12, %v2310_v56  ;;  %v2307_v34 = vrot.slane %v2008_v32, 1 }
 0x229   : > { %v7552_v39 = vsel %vm6919_vm4, 0, %v1901_v15  ;;  %2351 = vrot.lane.b32.xlu1 %v2311_v30, %s6766_s29  ;;  %v2123_v38 = vshll.u32 %v7512_v43, 16  ;;  %v2128_v40 = vshll.u32 %v2011_v31, 16  ;;  %v1748_v26 = vmul.f32 %v7405_v20, %v1643_v9 }
 0x22a   : > { %v7559_v7 = vsel %vm6919_vm4, 0, %v1894_v28  ;;  %v1910_v42 = vshrl.u32 %v1839_v53, 16  ;;  %v1903_v45 = vshrl.u32 %v1838_v51, 16  ;;  %v2308_v8 = vsel %vm892_vm2, %v2306_v23, %v2307_v34 }
 0x22b   : > { %v6212_v32 = vpop.f32.mrb[24].mxu0  ;;  %v1913_v49 = vshll.u32 %v1839_v53, 16  ;;  %v1788_v44 = vadd.f32 %v7410_v21, %v1750_v29  ;;  %v2121_v47 = vshrl.u32 %v7512_v43, 16  ;;  %v2125_v48 = vrot.slane %v2123_v38, 1 }
 0x22c   : > { %v1659_v50 = vpop.f32.mrb[25].mxu0  ;;  %v7564_v52 = vrot.slane %v1910_v42, 7  ;;  %2349 = vrot.lane.b32.xlu0 %v2308_v8, %s6766_s29  ;;  %v2130_v55 = vrot.slane %v2128_v40, 1  ;;  %v1786_v59 = vadd.f32 %v7410_v21, %v1748_v26  ;;  %v2010_v58 = vsel %vm6919_vm4, %v7486_v35, 0 }
 0x22d   : > { %v6213_v37 = vpop.f32.mrb[26].mxu0  ;;  %v7571_v62 = vrot.slane %v1903_v45, 7  ;;  %v2126_v60 = vor.u32 %v2125_v48, %v2121_v47  ;;  %v2111_v61 = vshll.u32 %v7541_v24, 16  ;;  %v2116_v63 = vshll.u32 %v2010_v58, 16 }
 0x22e   : > { %v1662_v36 = vpop.f32.mrb[27].mxu0  ;;  %v1906_v6 = vshll.u32 %v1838_v51, 16  ;;  %v2109_v1 = vshrl.u32 %v7541_v24, 16  ;;  %v1751_v2 = vmul.f32 %v6209_v13, %v7405_v20  ;;  %v1749_v5 = vmul.f32 %v7405_v20, %v1646_v10 }
 0x22f   : > { %v1915_v9 = vor.u32 %v1913_v49, %v7564_v52  ;;  %v2131_v18 = vsel %vm635_vm3, %v2126_v60, %v2130_v55  ;;  %v2113_v35 = vrot.slane %v2111_v61, 1  ;;  %v2315_v46 = vrot.slane %v7512_v43, 1 }
 0x230   : > { %v1820_v11 = vmax.f32 %v1788_v44, 0.0  ;;  %2250 = vrot.lane.b32.xlu1 %v2131_v18, %s6767_s12  ;;  %v1818_v12 = vmax.f32 %v1786_v59, 0.0  ;;  %v1789_v15 = vadd.f32 %v7410_v21, %v1751_v2  ;;  %v1787_v28 = vadd.f32 %v7410_v21, %v1749_v5 }
 0x231   : > { %v1908_v3 = vor.u32 %v1906_v6, %v7571_v62  ;;  %v2114_v13 = vor.u32 %v2113_v35, %v2109_v1  ;;  %v2118_v27 = vrot.slane %v2116_v63, 1  ;;  %v2316_v10 = vrot.slane %v2011_v31, 1 }
 0x232   : > { %v1821_v16 = vmax.f32 %v1789_v15, 0.0  ;;  %v1819_v17 = vmax.f32 %v1787_v28, 0.0  ;;  %v2312_v56 = vrot.slane %v7541_v24, 1  ;;  %v7588_v23 = vsel %vm6919_vm4, %v7523_v19, 0 }
 0x233   : > { %v6216_v25 = vpop.f32.mrb[28].mxu0  ;;  %v7592_v29 = vsel %vm6919_vm4, 0, %v1915_v9  ;;  %v2119_v53 = vsel %vm635_vm3, %v2114_v13, %v2118_v27  ;;  %v2317_v51 = vsel %vm892_vm2, %v2315_v46, %v2316_v10  ;;  %v1754_v31 = vmul.f32 %v6212_v32, %v7405_v20 }
 0x234   : > { %v1675_v30 = vpop.f32.mrb[29].mxu0  ;;  %2248 = vrot.lane.b32.xlu0 %v2119_v53, %s6767_s12  ;;  %v1841_v34 = vpack.c.bf16 %v1821_v16, %v1820_v11  ;;  %v1840_v38 = vpack.c.bf16 %v1819_v17, %v1818_v12  ;;  %2355 = vrot.lane.b32.xlu1 %v2317_v51, %s6766_s29  ;;  %v2313_v19 = vrot.slane %v2010_v58, 1  ;;  %v2147_v40 = vshll.u32 %v7552_v39, 16 }
 0x235   : > { %v7600_v26 = vpop.f32.mrb[30].mxu0  ;;  %v7604_v42 = vsel %vm6919_vm4, 0, %v1908_v3  ;;  %v2152_v45 = vshll.u32 %v7588_v23, 16  ;;  %v1752_v8 = vmul.f32 %v7405_v20, %v1659_v50  ;;  %v2012_v32 = vsel %vm6919_vm4, %v7525_v57, 0 }
 0x236   : > { %v7611_v49 = vpop.f32.mrb[31].mxu0  ;;  %v1924_v44 = vshrl.u32 %v1841_v34, 16  ;;  %v1917_v47 = vshrl.u32 %v1840_v38, 16  ;;  %v2314_v48 = vsel %vm892_vm2, %v2312_v56, %v2313_v19  ;;  %v2145_v55 = vshrl.u32 %v7552_v39, 16 }
 0x237   : > { %v1927_v59 = vshll.u32 %v1841_v34, 16  ;;  %v1792_v58 = vadd.f32 %v7410_v21, %v1754_v31  ;;  %v2149_v60 = vrot.slane %v2147_v40, 1  ;;  %v2154_v61 = vrot.slane %v2152_v45, 1 }
 0x238   : > { %v7616_v63 = vrot.slane %v1924_v44, 7  ;;  %2353 = vrot.lane.b32.xlu0 %v2314_v48, %s6766_s29  ;;  %v1790_v50 = vadd.f32 %v7410_v21, %v1752_v8  ;;  %v2135_v57 = vshll.u32 %v7559_v7, 16  ;;  %v2140_v6 = vshll.u32 %v2012_v32, 16 }
 0x239   : > { %v7621_v1 = vrot.slane %v1917_v47, 7  ;;  %v2150_v2 = vor.u32 %v2149_v60, %v2145_v55  ;;  %v1755_v5 = vmul.f32 %v6213_v37, %v7405_v20  ;;  %v1753_v9 = vmul.f32 %v7405_v20, %v1662_v36 }
 0x23a   : > { %v1929_v18 = vor.u32 %v1927_v59, %v7616_v63  ;;  %v1920_v35 = vshll.u32 %v1840_v38, 16  ;;  %v2133_v46 = vshrl.u32 %v7559_v7, 16  ;;  %v2137_v11 = vrot.slane %v2135_v57, 1 }
 0x23b   : > { %v2155_v12 = vsel %vm635_vm3, %v2150_v2, %v2154_v61  ;;  %v1793_v15 = vadd.f32 %v7410_v21, %v1755_v5  ;;  %v1791_v28 = vadd.f32 %v7410_v21, %v1753_v9  ;;  %v2321_v3 = vrot.slane %v7552_v39, 1 }
 0x23c   : > { %v1824_v13 = vmax.f32 %v1792_v58, 0.0  ;;  %2254 = vrot.lane.b32.xlu1 %v2155_v12, %s6767_s12  ;;  %v1822_v37 = vmax.f32 %v1790_v50, 0.0  ;;  %v2138_v27 = vor.u32 %v2137_v11, %v2133_v46  ;;  %v2142_v36 = vrot.slane %v2140_v6, 1 }
 0x23d   : > { %v1922_v10 = vor.u32 %v1920_v35, %v7621_v1  ;;  %v1825_v16 = vmax.f32 %v1793_v15, 0.0  ;;  %v1823_v17 = vmax.f32 %v1791_v28, 0.0  ;;  %v2322_v56 = vrot.slane %v7588_v23, 1 }
 0x23e   : > { %v2143_v53 = vsel %vm635_vm3, %v2138_v27, %v2142_v36  ;;  %v2318_v51 = vrot.slane %v7559_v7, 1  ;;  %v1758_v31 = vmul.f32 %v6216_v25, %v7405_v20  ;;  %v2015_v34 = vsel %vm6919_vm4, %v7564_v52, 0 }
 0x23f   : > { %v7642_v38 = vsel %vm6919_vm4, 0, %v1929_v18  ;;  %2252 = vrot.lane.b32.xlu0 %v2143_v53, %s6767_s12  ;;  %v1843_v19 = vpack.c.bf16 %v1825_v16, %v1824_v13  ;;  %v1842_v40 = vpack.c.bf16 %v1823_v17, %v1822_v37  ;;  %v2323_v23 = vsel %vm892_vm2, %v2321_v3, %v2322_v56 }
 0x240   : > { %2359 = vrot.lane.b32.xlu1 %v2323_v23, %s6766_s29  ;;  %v2319_v45 = vrot.slane %v2012_v32, 1  ;;  %v2171_v8 = vshll.u32 %v7592_v29, 16  ;;  %v2176_v25 = vshll.u32 %v2015_v34, 16  ;;  %v1756_v44 = vmul.f32 %v7405_v20, %v1675_v30 }
 0x241   : > { %v7651_v52 = vsel %vm6919_vm4, 0, %v1922_v10  ;;  %v1938_v47 = vshrl.u32 %v1843_v19, 16  ;;  %v1931_v48 = vshrl.u32 %v1842_v40, 16  ;;  %v1796_v55 = vadd.f32 %v7410_v21, %v1758_v31 }
 0x242   : > { %v1941_v59 = vshll.u32 %v1843_v19, 16  ;;  %v2320_v58 = vsel %vm892_vm2, %v2318_v51, %v2319_v45  ;;  %v2169_v60 = vshrl.u32 %v7592_v29, 16  ;;  %v2173_v61 = vrot.slane %v2171_v8, 1 }
 0x243   : > { %v7656_v32 = vrot.slane %v1938_v47, 7  ;;  %2357 = vrot.lane.b32.xlu0 %v2320_v58, %s6766_s29  ;;  %v2178_v50 = vrot.slane %v2176_v25, 1  ;;  %v1794_v30 = vadd.f32 %v7410_v21, %v1756_v44  ;;  %v2014_v57 = vsel %vm6919_vm4, %v7571_v62, 0 }
 0x244   : > { %v7663_v6 = vrot.slane %v1931_v48, 7  ;;  %v2174_v2 = vor.u32 %v2173_v61, %v2169_v60  ;;  %v2159_v5 = vshll.u32 %v7604_v42, 16  ;;  %v2164_v9 = vshll.u32 %v2014_v57, 16 }
 0x245   : > { %v1934_v18 = vshll.u32 %v1842_v40, 16  ;;  %v1828_v35 = vmax.f32 %v1796_v55, 0.0  ;;  %v1759_v46 = vmul.f32 %v7600_v26, %v7405_v20  ;;  %v1757_v11 = vmul.f32 %v7405_v20, %v7611_v49 }
 0x246   : > { %v2179_v12 = vsel %vm635_vm3, %v2174_v2, %v2178_v50  ;;  %v2157_v15 = vshrl.u32 %v7604_v42, 16  ;;  %v2161_v28 = vrot.slane %v2159_v5, 1  ;;  %v2327_v62 = vrot.slane %v7592_v29, 1 }
 0x247   : > { %v1943_v3 = vor.u32 %v1941_v59, %v7656_v32  ;;  %2258 = vrot.lane.b32.xlu1 %v2179_v12, %s6767_s12  ;;  %v1826_v13 = vmax.f32 %v1794_v30, 0.0  ;;  %v1797_v37 = vadd.f32 %v7410_v21, %v1759_v46  ;;  %v1795_v27 = vadd.f32 %v7410_v21, %v1757_v11 }
 0x248   : > { %v1936_v26 = vor.u32 %v1934_v18, %v7663_v6  ;;  %v2162_v36 = vor.u32 %v2161_v28, %v2157_v15  ;;  %v2166_v20 = vrot.slane %v2164_v9, 1  ;;  %v2328_v49 = vrot.slane %v2015_v34, 1 }
 0x249   : > { %v1829_v10 = vmax.f32 %v1797_v37, 0.0  ;;  %v1827_v16 = vmax.f32 %v1795_v27, 0.0  ;;  %v2324_v17 = vrot.slane %v7604_v42, 1  ;;  %v2017_v56 = vsel %vm6919_vm4, %v7616_v63, 0 }
 0x24a   : > { %v2167_v53 = vsel %vm635_vm3, %v2162_v36, %v2166_v20  ;;  %v2329_v51 = vsel %vm892_vm2, %v2327_v62, %v2328_v49  ;;  %v2325_v31 = vrot.slane %v2014_v57, 1  ;;  %v2195_v21 = vshll.u32 %v7642_v38, 16 }
 0x24b   : > { %2256 = vrot.lane.b32.xlu0 %v2167_v53, %s6767_s12  ;;  %v1845_v19 = vpack.c.bf16 %v1829_v10, %v1828_v35  ;;  %v1844_v40 = vpack.c.bf16 %v1827_v16, %v1826_v13  ;;  %2363 = vrot.lane.b32.xlu1 %v2329_v51, %s6766_s29  ;;  %v2200_v34 = vshll.u32 %v2017_v56, 16  ;;  %v2016_v23 = vsel %vm6919_vm4, %v7621_v1, 0 }
 0x24c   : > { %v2193_v63 = vshrl.u32 %v7642_v38, 16  ;;  %v2197_v45 = vrot.slane %v2195_v21, 1  ;;  %v2183_v8 = vshll.u32 %v7651_v52, 16  ;;  %v2188_v25 = vshll.u32 %v2016_v23, 16 }
 0x24d   : > { %v1952_v44 = vshrl.u32 %v1845_v19, 16  ;;  %v1945_v47 = vshrl.u32 %v1844_v40, 16  ;;  %v2326_v48 = vsel %vm892_vm2, %v2324_v17, %v2325_v31  ;;  %v2202_v59 = vrot.slane %v2200_v34, 1 }
 0x24e   : > { %v2198_v55 = vor.u32 %v2197_v45, %v2193_v63  ;;  %v2181_v58 = vshrl.u32 %v7651_v52, 16  ;;  %v2185_v60 = vrot.slane %v2183_v8, 1  ;;  %v7696_v61 = vsel %vm6919_vm4, 0, %v1943_v3 }
 0x24f   : > { %v7700_v1 = vsel %vm6919_vm4, 0, %v1936_v26  ;;  %v1947_v50 = vrot.slane %v1945_v47, 7  ;;  %v1948_v30 = vshll.u32 %v1844_v40, 16  ;;  %2361 = vrot.lane.b32.xlu0 %v2326_v48, %s6766_s29  ;;  %v2190_v5 = vrot.slane %v2188_v25, 1 }
 0x250   : > { %v2203_v57 = vsel %vm635_vm3, %v2198_v55, %v2202_v59  ;;  %v2186_v2 = vor.u32 %v2185_v60, %v2181_v58  ;;  %v2333_v9 = vrot.slane %v7642_v38, 1  ;;  %v1954_v18 = vrot.slane %v1952_v44, 7 }
 0x251   : > { %v1955_v35 = vshll.u32 %v1845_v19, 16  ;;  %2262 = vrot.lane.b32.xlu1 %v2203_v57, %s6767_s12  ;;  %v2334_v46 = vrot.slane %v2017_v56, 1  ;;  %v2019_v11 = vsel %vm6919_vm4, %v7656_v32, 0  ;;  %v1950_v12 = vor.u32 %v1948_v30, %v1947_v50 }
 0x252   : > { %v2191_v15 = vsel %vm635_vm3, %v2186_v2, %v2190_v5  ;;  %v2330_v28 = vrot.slane %v7651_v52, 1  ;;  %v2219_v62 = vshll.u32 %v7696_v61, 16  ;;  %v2331_v3 = vrot.slane %v2016_v23, 1 }
 0x253   : > { %2260 = vrot.lane.b32.xlu0 %v2191_v15, %s6767_s12  ;;  %v2224_v13 = vshll.u32 %v2019_v11, 16  ;;  %v2018_v37 = vsel %vm6919_vm4, %v7663_v6, 0  ;;  %v2207_v27 = vshll.u32 %v7700_v1, 16  ;;  %v2335_v26 = vsel %vm892_vm2, %v2333_v9, %v2334_v46 }
 0x254   : > { %v2217_v32 = vshrl.u32 %v7696_v61, 16  ;;  %v2221_v36 = vrot.slane %v2219_v62, 1  ;;  %v2212_v20 = vshll.u32 %v2018_v37, 16  ;;  %v1957_v49 = vor.u32 %v1955_v35, %v1954_v18 }
 0x255   : > { %2367 = vrot.lane.b32.xlu1 %v2335_v26, %s6766_s29  ;;  %v2205_v10 = vshrl.u32 %v7700_v1, 16  ;;  %v2209_v16 = vrot.slane %v2207_v27, 1  ;;  %v2332_v17 = vsel %vm892_vm2, %v2330_v28, %v2331_v3  ;;  %v2226_v53 = vrot.slane %v2224_v13, 1 }
 0x256   : > { %v2222_v56 = vor.u32 %v2221_v36, %v2217_v32  ;;  %v7724_v6 = vsel %vm6919_vm4, 0, %v1950_v12  ;;  %v2214_v31 = vrot.slane %v2212_v20, 1  ;;  %v2020_v21 = vsel %vm6919_vm4, %v1947_v50, 0  ;;  %v6644_v20 = vld [vmem:[%s9654_s4 + $0x8] sm:$0xff]  }
 0x257   : > { %2365 = vrot.lane.b32.xlu0 %v2332_v17, %s6766_s29  ;;  %v2210_v51 = vor.u32 %v2209_v16, %v2205_v10  ;;  %v2339_v40 = vrot.slane %v7696_v61, 1  ;;  %v2231_v34 = vshll.u32 %v7724_v6, 16  ;;  %v2340_v63 = vrot.slane %v2019_v11, 1  ;;  %v6646_v10 = vld [vmem:[%s9654_s4 + $0x18] sm:$0xff]  }
 0x258   : > { %v2227_v19 = vsel %vm635_vm3, %v2222_v56, %v2226_v53  ;;  %v7736_v45 = vsel %vm6919_vm4, 0, %v1957_v49  ;;  %v2336_v8 = vrot.slane %v7700_v1, 1  ;;  %v2229_v25 = vshrl.u32 %v7724_v6, 16 }
 0x259   : > { %2266 = vrot.lane.b32.xlu1 %v2227_v19, %s6767_s12  ;;  %v2215_v23 = vsel %vm635_vm3, %v2210_v51, %v2214_v31  ;;  %v2233_v44 = vrot.slane %v2231_v34, 1  ;;  %v2236_v47 = vshll.u32 %v2020_v21, 16  ;;  %v2342_v48 = vrot.slane %v7724_v6, 1  ;;  %v6648_v19 = vld [vmem:[%s9654_s4 + $0x28] sm:$0xff]  }
 0x25a   : > { %v2438_v55 = vshll.u32 %v7736_v45, 16  ;;  %v2341_v59 = vsel %vm892_vm2, %v2339_v40, %v2340_v63  ;;  %v2337_v58 = vrot.slane %v2018_v37, 1  ;;  %v2343_v50 = vrot.slane %v2020_v21, 1 }
 0x25b   : > { %2264 = vrot.lane.b32.xlu0 %v2215_v23, %s6767_s12  ;;  %v2234_v60 = vor.u32 %v2233_v44, %v2229_v25  ;;  %v2021_v30 = vsel %vm6919_vm4, %v1954_v18, 0  ;;  %v2238_v2 = vrot.slane %v2236_v47, 1  ;;  %v2451_v46 = vrot.slane %v7736_v45, 1 }
 0x25c   : > { %v2338_v57 = vsel %vm892_vm2, %v2336_v8, %v2337_v58  ;;  %v2440_v5 = vrot.slane %v2438_v55, 1  ;;  %v2344_v9 = vsel %vm892_vm2, %v2342_v48, %v2343_v50  ;;  %v2436_v11 = vshrl.u32 %v7736_v45, 16 }
 0x25d   : > { %2371 = vrot.lane.b32.xlu1 %v2341_v59, %s6766_s29  ;;  %v2239_v35 = vsel %vm635_vm3, %v2234_v60, %v2238_v2  ;;  %v2443_v12 = vshll.u32 %v2021_v30, 16  ;;  %v2452_v15 = vrot.slane %v2021_v30, 1 }
 0x25e   : > { %v2441_v33 = vor.u32 %v2440_v5, %v2436_v11 }
 0x25f   : > { %2369 = vrot.lane.b32.xlu0 %v2338_v57, %s6766_s29  ;;  %v2453_v18 = vsel %vm892_vm2, %v2451_v46, %v2452_v15  ;;  %v2445_v28 = vrot.slane %v2443_v12, 1 }
 0x261   : > { %2373 = vrot.lane.b32.xlu1 %v2344_v9, %s6766_s29  ;;  %v2446_v62 = vsel %vm635_vm3, %v2441_v33, %v2445_v28  ;;  %vm4668_vm3 = vcmask 916480  }
 0x263   : > { %2268 = vrot.lane.b32.xlu0 %v2239_v35, %s6767_s12 }
 0x265   : > { %2454 = vrot.lane.b32.xlu1 %v2453_v18, %s6766_s29 }
 0x267   : > { %2447 = vrot.lane.b32.xlu0 %v2446_v62, %s6767_s12 }
 0x288   : > { %v2243_v3 = vpop.permute.xlu1 %2242 }
 0x289   : > { %v2378_v32 = vsel %vm973_vm5, %v7439_v54, %v2243_v3  ;;  %v6645_v54 = vld [vmem:[%s9654_s4 + $0x10] sm:$0xff]  }
 0x28b   : > { %v2241_v13 = vpop.permute.xlu0 %2240 }
 0x28c   : > { %v2376_v27 = vsel %vm973_vm5, %v7451_v14, %v2241_v13 }
 0x28f   : > { %v2348_v37 = vpop.permute.xlu1 %2347 }
 0x290   : > { %v2346_v26 = vpop.permute.xlu0 %2345  ;;  %v7770_v49 = vsel %vm1006_vm6, %v2378_v32, %v2348_v37 }
 0x291   : > { %v7764_v36 = vsel %vm1006_vm6, %v2376_v27, %v2346_v26 }
 0x292   : > { %6230 = vmatprep.mubr.msk.bf16.mxu1 %vm1100_vm7, %v7764_v36 }
 0x293   : > { %6231 = vmatmul.mubr.msk.bf16.vlgmr.msra.gmra.mrb[0].mxu1 %vm1100_vm7, %v7770_v49 }
 0x294   : > { %6263 = vmatpush3.bf16.msra.mxu1 %v7464_v41  ;;  %v6647_v41 = vld [vmem:[%s9654_s4 + $0x20] sm:$0xff]  }
 0x295   : > { %6264 = vmatprep.subr.bf16.mxu1 %v6644_v20 }
 0x297   : > { %v2247_v14 = vpop.permute.xlu1 %2246 }
 0x298   : > { %6265 = vmatpush3.bf16.msra.mxu1 %v6644_v20  ;;  %v2382_v51 = vsel %vm973_vm5, %v7476_v0, %v2247_v14  ;;  %v7806_v0 = vld [vmem:[%s9654_s4 + $0x60] sm:$0xff]  }
 0x299   : > { %6266 = vmatprep.subr.bf16.mxu1 %v6645_v54 }
 0x29a   : > { %v2245_v16 = vpop.permute.xlu0 %2244 }
 0x29b   : > { %v2352_v17 = vpop.permute.xlu1 %2351  ;;  %v2380_v56 = vsel %vm973_vm5, %v7502_v4, %v2245_v16  ;;  %v6654_v16 = vld [vmem:[%s9654_s4 + $0x88] sm:$0xff]  }
 0x29c   : > { %6267 = vmatpush3.bf16.msra.mxu1 %v6645_v54  ;;  %v7794_v21 = vsel %vm1006_vm6, %v2382_v51, %v2352_v17  ;;  %v6655_v17 = vld [vmem:[%s9657_s7] sm:$0xff]  }
 0x29d   : > { %6268 = vmatprep.subr.bf16.mxu1 %v6646_v10 }
 0x29e   : > { %v2350_v53 = vpop.permute.xlu0 %2349 }
 0x29f   : > { %v7791_v31 = vsel %vm1006_vm6, %v2380_v56, %v2350_v53  ;;  %v7973_v53 = vld [vmem:[%s9656_s6] ss:$0 sm:$0xff] }
 0x2a0   : > { %6269 = vmatpush3.bf16.msra.mxu1 %v6646_v10  ;;  %6234 = vmatprep.mubr.msk.bf16.mxu1 %vm1100_vm7, %v7791_v31  ;;  %v6652_v10 = vld [vmem:[%s9654_s4 + $0x78] sm:$0xff]  }
 0x2a1   : > { %6270 = vmatprep.subr.bf16.mxu1 %v6647_v41  ;;  %6235 = vmatmul.mubr.msk.bf16.gmra.mrb[4].mxu1 %vm1100_vm7, %v7794_v21 }
 0x2a2   : > { %v2251_v4 = vpop.permute.xlu1 %2250 }
 0x2a3   : > { %v2386_v8 = vsel %vm973_vm5, %v7512_v43, %v2251_v4 }
 0x2a4   : > { %6271 = vmatpush3.bf16.msra.mxu1 %v6647_v41  ;;  %v6656_v41 = vld [vmem:[%s9657_s7 + $0x8] sm:$0xff]  }
 0x2a5   : > { %6272 = vmatprep.subr.bf16.mxu1 %v6648_v19 }
 0x2a6   : > { %v2249_v40 = vpop.permute.xlu0 %2248  ;;  %v2356_v34 = vpop.permute.xlu1 %2355 }
 0x2a7   : > { %v2384_v23 = vsel %vm973_vm5, %v7541_v24, %v2249_v40  ;;  %v7817_v44 = vsel %vm1006_vm6, %v2386_v8, %v2356_v34 }
 0x2a8   : > { %6273 = vmatpush3.bf16.msra.mxu1 %v6648_v19 }
 0x2a9   : > { %6306 = vmatprep.subr.bf16.mxu1 %v7806_v0 }
 0x2aa   : > { %v2354_v63 = vpop.permute.xlu0 %2353 }
 0x2ab   : > { %v7814_v25 = vsel %vm1006_vm6, %v2384_v23, %v2354_v63 }
 0x2ac   : > { %6238 = vmatprep.mubr.msk.bf16.mxu1 %vm1100_vm7, %v7814_v25 }
 0x2ad   : > { %6239 = vmatmul.mubr.msk.bf16.gmra.mrb[8].mxu1 %vm1100_vm7, %v7817_v44 }
 0x2ae   : > { %v2255_v47 = vpop.permute.xlu1 %2254 }
 0x2af   : > { %v2390_v43 = vsel %vm973_vm5, %v7552_v39, %v2255_v47 }
 0x2b1   : > { %v2253_v48 = vpop.permute.xlu0 %2252 }
 0x2b2   : > { %v2360_v55 = vpop.permute.xlu1 %2359  ;;  %v2388_v24 = vsel %vm973_vm5, %v7559_v7, %v2253_v48 }
 0x2b3   : > { %v7831_v60 = vsel %vm1006_vm6, %v2390_v43, %v2360_v55 }
 0x2b5   : > { %v2358_v59 = vpop.permute.xlu0 %2357 }
 0x2b6   : > { %v7828_v58 = vsel %vm1006_vm6, %v2388_v24, %v2358_v59 }
 0x2b7   : > { %6242 = vmatprep.mubr.msk.bf16.mxu1 %vm1100_vm7, %v7828_v58 }
 0x2b8   : > { %6243 = vmatmul.mubr.msk.bf16.gmra.mrb[12].mxu1 %vm1100_vm7, %v7831_v60 }
 0x2b9   : > { %v2259_v50 = vpop.permute.xlu1 %2258 }
 0x2ba   : > { %v2394_v39 = vsel %vm973_vm5, %v7592_v29, %v2259_v50 }
 0x2bd   : > { %v2257_v30 = vpop.permute.xlu0 %2256  ;;  %v2364_v57 = vpop.permute.xlu1 %2363 }
 0x2be   : > { %v2392_v7 = vsel %vm973_vm5, %v7604_v42, %v2257_v30  ;;  %v7845_v9 = vsel %vm1006_vm6, %v2394_v39, %v2364_v57 }
 0x2c1   : > { %v2362_v2 = vpop.permute.xlu0 %2361 }
 0x2c2   : > { %v7842_v5 = vsel %vm1006_vm6, %v2392_v7, %v2362_v2 }
 0x2c3   : > { %6246 = vmatprep.mubr.msk.bf16.mxu1 %vm1100_vm7, %v7842_v5  ;;  %v2263_v35 = vpop.permute.xlu1 %2262 }
 0x2c4   : > { %6247 = vmatmul.mubr.msk.bf16.gmra.mrb[16].mxu1 %vm1100_vm7, %v7845_v9  ;;  %v2398_v29 = vsel %vm973_vm5, %v7642_v38, %v2263_v35 }
 0x2c5   : > { %v2261_v46 = vpop.permute.xlu0 %2260 }
 0x2c6   : > { %v2396_v42 = vsel %vm973_vm5, %v7651_v52, %v2261_v46 }
 0x2c7   : > { %v2368_v11 = vpop.permute.xlu1 %2367 }
 0x2c8   : > { %v7859_v33 = vsel %vm1006_vm6, %v2398_v29, %v2368_v11 }
 0x2c9   : > { %v2366_v12 = vpop.permute.xlu0 %2365 }
 0x2ca   : > { %v7856_v15 = vsel %vm1006_vm6, %v2396_v42, %v2366_v12 }
 0x2cb   : > { %6250 = vmatprep.mubr.msk.bf16.mxu1 %vm1100_vm7, %v7856_v15  ;;  %v2267_v18 = vpop.permute.xlu1 %2266 }
 0x2cc   : > { %6251 = vmatmul.mubr.msk.bf16.gmra.mrb[20].mxu1 %vm1100_vm7, %v7859_v33  ;;  %v2402_v38 = vsel %vm973_vm5, %v7696_v61, %v2267_v18 }
 0x2cd   : > { %v2265_v28 = vpop.permute.xlu0 %2264 }
 0x2ce   : > { %v2400_v52 = vsel %vm973_vm5, %v7700_v1, %v2265_v28 }
 0x2cf   : > { %v2372_v62 = vpop.permute.xlu1 %2371 }
 0x2d0   : > { %v2432_v37 = vsel %vm1006_vm6, %v2402_v38, %v2372_v62 }
 0x2d1   : > { %v2370_v3 = vpop.permute.xlu0 %2369 }
 0x2d2   : > { %v2430_v13 = vsel %vm1006_vm6, %v2400_v52, %v2370_v3 }
 0x2d3   : > { %6254 = vmatprep.mubr.msk.bf16.mxu1 %vm1100_vm7, %v2430_v13  ;;  %v2374_v27 = vpop.permute.xlu1 %2373 }
 0x2d4   : > { %6255 = vmatmul.mubr.msk.bf16.gmra.mrb[24].mxu1 %vm1100_vm7, %v2432_v37 }
 0x2d5   : > { %v2269_v26 = vpop.permute.xlu0 %2268 }
 0x2d6   : > { %v2404_v32 = vsel %vm973_vm5, %v7724_v6, %v2269_v26  ;;  %v6650_v6 = vld [vmem:[%s9654_s4 + $0x68] sm:$0xff]  }
 0x2d7   : > { %v2434_v20 = vsel %vm1006_vm6, %v2404_v32, %v2374_v27  ;;  %v2455_v54 = vpop.permute.xlu1 %2454 }
 0x2d8   : > { %6258 = vmatprep.mubr.msk.bf16.mxu1 %vm1100_vm7, %v2434_v20 }
 0x2d9   : > { %v2448_v1 = vpop.permute.xlu0 %2447 }
 0x2da   : > { %v2457_v61 = vsel %vm973_vm5, %v7736_v45, %v2448_v1  ;;  %v6651_v45 = vld [vmem:[%s9654_s4 + $0x70] sm:$0xff]  }
 0x2db   : > { %v2459_v14 = vsel %vm1006_vm6, %v2457_v61, %v2455_v54 }
 0x2dc   : > { %6259 = vmatmul.mubr.msk.bf16.gmra.mrb[28].mxu1 %vm1100_vm7, %v2459_v14 }
 0x2dd   : > { %6274 = vmatprep.mubr.msk.bf16.mxu1 %vm1100_vm7, %v7313_v22 }
 0x2e4   : > { %6275 = vmatmul.mubr.msk.bf16.vlgmr.msra.gmra.mrb[0].mxu1 %vm1100_vm7, %v7764_v36  ;;  %v6653_v36 = vld [vmem:[%s9654_s4 + $0x80] sm:$0xff]  }
 0x2e5   : > { %6307 = vmatpush3.bf16.msra.mxu1 %v7806_v0  ;;  %6278 = vmatprep.mubr.msk.bf16.mxu1 %vm1100_vm7, %v7770_v49 }
 0x2e6   : > { %6308 = vmatprep.subr.bf16.mxu1 %v6650_v6 }
 0x2e9   : > { %6309 = vmatpush3.bf16.msra.mxu1 %v6650_v6 }
 0x2ea   : > { %6310 = vmatprep.subr.bf16.mxu1 %v6651_v45 }
 0x2ec   : > { %6279 = vmatmul.mubr.msk.bf16.gmra.mrb[4].mxu1 %vm1100_vm7, %v7791_v31 }
 0x2ed   : > { %6282 = vmatprep.mubr.msk.bf16.mxu1 %vm1100_vm7, %v7794_v21  ;;  %6311 = vmatpush3.bf16.msra.mxu1 %v6651_v45 }
 0x2ee   : > { %6312 = vmatprep.subr.bf16.mxu1 %v6652_v10 }
 0x2f1   : > { %6313 = vmatpush3.bf16.msra.mxu1 %v6652_v10 }
 0x2f2   : > { %6314 = vmatprep.subr.bf16.mxu1 %v6653_v36 }
 0x2f4   : > { %6283 = vmatmul.mubr.msk.bf16.gmra.mrb[8].mxu1 %vm1100_vm7, %v7814_v25 }
 0x2f5   : > { %6286 = vmatprep.mubr.msk.bf16.mxu1 %vm1100_vm7, %v7817_v44  ;;  %6315 = vmatpush3.bf16.msra.mxu1 %v6653_v36 }
 0x2f6   : > { %6316 = vmatprep.subr.bf16.mxu1 %v6654_v16 }
 0x2f9   : > { %6317 = vmatpush3.bf16.msra.mxu1 %v6654_v16 }
 0x2fc   : > { %6287 = vmatmul.mubr.msk.bf16.gmra.mrb[12].mxu1 %vm1100_vm7, %v7828_v58 }
 0x2fd   : > { %6290 = vmatprep.mubr.msk.bf16.mxu1 %vm1100_vm7, %v7831_v60 }
 0x304   : > { %6291 = vmatmul.mubr.msk.bf16.gmra.mrb[16].mxu1 %vm1100_vm7, %v7842_v5 }
 0x305   : > { %6294 = vmatprep.mubr.msk.bf16.mxu1 %vm1100_vm7, %v7845_v9 }
 0x30c   : > { %6295 = vmatmul.mubr.msk.bf16.gmra.mrb[20].mxu1 %vm1100_vm7, %v7856_v15 }
 0x30d   : > { %6298 = vmatprep.mubr.msk.bf16.mxu1 %vm1100_vm7, %v7859_v33 }
 0x314   : > { %6299 = vmatmul.mubr.msk.bf16.gmra.mrb[24].mxu1 %vm1100_vm7, %v2430_v13 }
 0x315   : > { %6302 = vmatprep.mubr.msk.bf16.mxu1 %vm1100_vm7, %v2432_v37 }
 0x31c   : > { %6303 = vmatmul.mubr.msk.bf16.gmra.mrb[28].mxu1 %vm1100_vm7, %v2434_v20 }
 0x31d   : > { %6318 = vmatprep.mubr.msk.bf16.mxu1 %vm1100_vm7, %v7770_v49  ;;  %v6768_v49 = vmov 0.0  }
 0x31e   : > { %6350 = vmatprep.subr.bf16.mxu1 %v6768_v49 }
 0x324   : > { %6319 = vmatmul.mubr.msk.bf16.vlgmr.msra.gmra.mrb[0].mxu1 %vm1100_vm7, %v7791_v31 }
 0x325   : > { %6322 = vmatprep.mubr.msk.bf16.mxu1 %vm1100_vm7, %v7794_v21  ;;  %6351 = vmatpush3.bf16.msra.mxu1 %v6655_v17 }
 0x326   : > { %6352 = vmatprep.subr.bf16.mxu1 %v6768_v49 }
 0x329   : > { %6353 = vmatpush3.bf16.msra.mxu1 %v6656_v41 }
 0x32a   : > { %6358 = vmatprep.subr.bf16.mxu1 %v6768_v49 }
 0x32c   : > { %6323 = vmatmul.mubr.msk.bf16.gmra.mrb[4].mxu1 %vm1100_vm7, %v7814_v25 }
 0x32d   : > { %6326 = vmatprep.mubr.msk.bf16.mxu1 %vm1100_vm7, %v7817_v44 }
 0x334   : > { %6327 = vmatmul.mubr.msk.bf16.gmra.mrb[8].mxu1 %vm1100_vm7, %v7828_v58 }
 0x335   : > { %6330 = vmatprep.mubr.msk.bf16.mxu1 %vm1100_vm7, %v7831_v60 }
 0x33c   : > { %6331 = vmatmul.mubr.msk.bf16.gmra.mrb[12].mxu1 %vm1100_vm7, %v7842_v5 }
 0x33d   : > { %6334 = vmatprep.mubr.msk.bf16.mxu1 %vm1100_vm7, %v7845_v9 }
 0x344   : > { %6335 = vmatmul.mubr.msk.bf16.gmra.mrb[16].mxu1 %vm1100_vm7, %v7856_v15 }
 0x345   : > { %6338 = vmatprep.mubr.msk.bf16.mxu1 %vm1100_vm7, %v7859_v33 }
 0x34c   : > { %6339 = vmatmul.mubr.msk.bf16.gmra.mrb[20].mxu1 %vm1100_vm7, %v2430_v13 }
 0x34d   : > { %6342 = vmatprep.mubr.msk.bf16.mxu1 %vm1100_vm7, %v2432_v37 }
 0x354   : > { %6343 = vmatmul.mubr.msk.bf16.gmra.mrb[24].mxu1 %vm1100_vm7, %v2434_v20 }
 0x355   : > { %6346 = vmatprep.mubr.msk.bf16.mxu1 %vm1100_vm7, %v2459_v14 }
 0x35c   : > { %6347 = vmatmul.mubr.msk.bf16.gmra.mrb[28].mxu1 %vm1100_vm7, %v7313_v22  ;;  %v7968_v22 = vld [vmem:[%s9655_s5] ss:$0 sm:$0xff] }
 0x35d   : > { %6354 = vmatprep.mubr.msk.bf16.mxu1 %vm6769_vm8, %v6768_v49 }
 0x3f7   : > { %v6320_v56 = vpop.f32.mrb[0].mxu1 }
 0x3f8   : > { %v2956_v51 = vpop.f32.mrb[1].mxu1  ;;  %v3123_v31 = vmul.f32 %v6320_v56, %v7968_v22 }
 0x3f9   : > { %v3121_v21 = vmul.f32 %v7968_v22, %v2956_v51  ;;  %v6321_v19 = vpop.f32.mrb[2].mxu1 }
 0x3fa   : > { %v2959_v4 = vpop.f32.mrb[3].mxu1  ;;  %v3124_v40 = vmul.f32 %v6321_v19, %v7968_v22  ;;  %v7983_v23 = vadd.f32 %v7973_v53, %v3123_v31 }
 0x3fb   : > { %v7978_v0 = vadd.f32 %v7973_v53, %v3121_v21  ;;  %v3122_v34 = vmul.f32 %v7968_v22, %v2959_v4 }
 0x3fc   : > { %v7991_v25 = vadd.f32 %v7973_v53, %v3124_v40  ;;  %v3194_v24 = vsel %vm973_vm5, %v7983_v23, 0.0 }
 0x3fd   : > { %v7986_v63 = vadd.f32 %v7973_v53, %v3122_v34  ;;  %v3191_v8 = vsel %vm973_vm5, %v7978_v0, 0.0 }
 0x3fe   : > { %v3196_v30 = vsel %vm973_vm5, %v7991_v25, 0.0 }
 0x3ff   : > { %v3192_v44 = vsel %vm973_vm5, %v7986_v63, 0.0  ;;  %v6324_v47 = vpop.f32.mrb[4].mxu1 }
 0x400   : > { %v3193_v48 = vadd.f32 %v3192_v44, %v3191_v8  ;;  %v2972_v55 = vpop.f32.mrb[5].mxu1  ;;  %v3127_v59 = vmul.f32 %v6324_v47, %v7968_v22 }
 0x401   : > { %v3125_v43 = vmul.f32 %v7968_v22, %v2972_v55  ;;  %v6325_v58 = vpop.f32.mrb[6].mxu1 }
 0x402   : > { %v3195_v60 = vadd.f32 %v3194_v24, %v3193_v48  ;;  %v2975_v50 = vpop.f32.mrb[7].mxu1  ;;  %v3128_v7 = vmul.f32 %v6325_v58, %v7968_v22  ;;  %v8007_v5 = vadd.f32 %v7973_v53, %v3127_v59 }
 0x403   : > { %v8002_v57 = vadd.f32 %v7973_v53, %v3125_v43  ;;  %v3126_v2 = vmul.f32 %v7968_v22, %v2975_v50 }
 0x404   : > { %v3197_v39 = vadd.f32 %v3196_v30, %v3195_v60  ;;  %v8015_v11 = vadd.f32 %v7973_v53, %v3128_v7  ;;  %v3202_v33 = vsel %vm973_vm5, %v8007_v5, 0.0  ;;  %v3264_v7 = vsel %vm973_vm5, %v7983_v23, -inf }
 0x405   : > { %v3198_v9 = vsel %vm973_vm5, %v8002_v57, 0.0  ;;  %v8012_v35 = vadd.f32 %v7973_v53, %v3126_v2  ;;  %v3262_v2 = vsel %vm973_vm5, %v7978_v0, -inf }
 0x406   : > { %v3199_v46 = vadd.f32 %v3198_v9, %v3197_v39  ;;  %v3204_v38 = vsel %vm973_vm5, %v8015_v11, 0.0 }
 0x407   : > { %v3200_v42 = vsel %vm973_vm5, %v8012_v35, 0.0  ;;  %v6328_v12 = vpop.f32.mrb[8].mxu1 }
 0x408   : > { %v3201_v29 = vadd.f32 %v3200_v42, %v3199_v46  ;;  %v2988_v15 = vpop.f32.mrb[9].mxu1  ;;  %v3131_v18 = vmul.f32 %v6328_v12, %v7968_v22 }
 0x409   : > { %v3129_v28 = vmul.f32 %v7968_v22, %v2988_v15  ;;  %v6329_v62 = vpop.f32.mrb[10].mxu1  ;;  %v3270_v15 = vsel %vm973_vm5, %v8007_v5, -inf }
 0x40a   : > { %v3203_v52 = vadd.f32 %v3202_v33, %v3201_v29  ;;  %v2991_v3 = vpop.f32.mrb[11].mxu1  ;;  %v3132_v37 = vmul.f32 %v6329_v62, %v7968_v22  ;;  %v8031_v32 = vadd.f32 %v7973_v53, %v3131_v18  ;;  %v3266_v33 = vsel %vm973_vm5, %v8002_v57, -inf }
 0x40b   : > { %v8026_v13 = vadd.f32 %v7973_v53, %v3129_v28  ;;  %v3130_v27 = vmul.f32 %v7968_v22, %v2991_v3  ;;  %v3272_v18 = vsel %vm973_vm5, %v8015_v11, -inf  ;;  %v3268_v62 = vsel %vm973_vm5, %v8012_v35, -inf }
 0x40c   : > { %v3205_v26 = vadd.f32 %v3204_v38, %v3203_v52  ;;  %v8039_v61 = vadd.f32 %v7973_v53, %v3132_v37  ;;  %v3210_v36 = vsel %vm973_vm5, %v8031_v32, 0.0  ;;  %v3265_v37 = vsel %vm973_vm5, %v7991_v25, -inf }
 0x40d   : > { %v3206_v20 = vsel %vm973_vm5, %v8026_v13, 0.0  ;;  %v8036_v1 = vadd.f32 %v7973_v53, %v3130_v27  ;;  %v3263_v27 = vsel %vm973_vm5, %v7986_v63, -inf }
 0x40e   : > { %v3207_v54 = vadd.f32 %v3206_v20, %v3205_v26  ;;  %v3212_v31 = vsel %vm973_vm5, %v8039_v61, 0.0  ;;  %v3278_v26 = vsel %vm973_vm5, %v8031_v32, -inf }
 0x40f   : > { %v3208_v14 = vsel %vm973_vm5, %v8036_v1, 0.0  ;;  %v6332_v6 = vpop.f32.mrb[12].mxu1 }
 0x410   : > { %v3209_v45 = vadd.f32 %v3208_v14, %v3207_v54  ;;  %v3004_v10 = vpop.f32.mrb[13].mxu1  ;;  %v3135_v16 = vmul.f32 %v6332_v6, %v7968_v22  ;;  %v3271_v54 = vmax.f32 %v3264_v7, %v3270_v15  ;;  %v3274_v14 = vsel %vm973_vm5, %v8026_v13, -inf }
 0x411   : > { %v3133_v17 = vmul.f32 %v7968_v22, %v3004_v10  ;;  %v6333_v41 = vpop.f32.mrb[14].mxu1 }
 0x412   : > { %v3211_v56 = vadd.f32 %v3210_v36, %v3209_v45  ;;  %v3007_v51 = vpop.f32.mrb[15].mxu1  ;;  %v3136_v19 = vmul.f32 %v6333_v41, %v7968_v22  ;;  %v8055_v34 = vadd.f32 %v7973_v53, %v3135_v16  ;;  %v3267_v36 = vmax.f32 %v3262_v2, %v3266_v33 }
 0x413   : > { %v8050_v21 = vadd.f32 %v7973_v53, %v3133_v17  ;;  %v3134_v4 = vmul.f32 %v7968_v22, %v3007_v51  ;;  %v3273_v16 = vmax.f32 %v3265_v37, %v3272_v18  ;;  %v3269_v17 = vmax.f32 %v3263_v27, %v3268_v62 }
 0x414   : > { %v3213_v40 = vadd.f32 %v3212_v31, %v3211_v56  ;;  %v8063_v48 = vadd.f32 %v7973_v53, %v3136_v19  ;;  %v3218_v58 = vsel %vm973_vm5, %v8055_v34, 0.0  ;;  %v3279_v51 = vmax.f32 %v3271_v54, %v3278_v26 }
 0x415   : > { %v3214_v8 = vsel %vm973_vm5, %v8050_v21, 0.0  ;;  %v8060_v44 = vadd.f32 %v7973_v53, %v3134_v4  ;;  %v3282_v7 = vsel %vm973_vm5, %v8050_v21, -inf }
 0x416   : > { %v3215_v47 = vadd.f32 %v3214_v8, %v3213_v40  ;;  %v3220_v46 = vsel %vm973_vm5, %v8063_v48, 0.0  ;;  %v3275_v8 = vmax.f32 %v3267_v36, %v3274_v14  ;;  %v3288_v2 = vsel %vm973_vm5, %v8063_v48, -inf }
 0x417   : > { %v3216_v55 = vsel %vm973_vm5, %v8060_v44, 0.0  ;;  %v6336_v24 = vpop.f32.mrb[16].mxu1 }
 0x418   : > { %v3217_v59 = vadd.f32 %v3216_v55, %v3215_v47  ;;  %v3020_v43 = vpop.f32.mrb[17].mxu1  ;;  %v3139_v60 = vmul.f32 %v6336_v24, %v7968_v22  ;;  %v3280_v47 = vsel %vm973_vm5, %v8039_v61, -inf  ;;  %v3276_v55 = vsel %vm973_vm5, %v8036_v1, -inf }
 0x419   : > { %v3137_v50 = vmul.f32 %v7968_v22, %v3020_v43  ;;  %v6337_v30 = vpop.f32.mrb[18].mxu1  ;;  %v3281_v15 = vmax.f32 %v3273_v16, %v3280_v47  ;;  %v3277_v33 = vmax.f32 %v3269_v17, %v3276_v55 }
 0x41a   : > { %v3219_v39 = vadd.f32 %v3218_v58, %v3217_v59  ;;  %v3023_v9 = vpop.f32.mrb[19].mxu1  ;;  %v3140_v12 = vmul.f32 %v6337_v30, %v7968_v22  ;;  %v8091_v52 = vadd.f32 %v7973_v53, %v3139_v60  ;;  %v3286_v30 = vsel %vm973_vm5, %v8055_v34, -inf }
 0x41b   : > { %v8078_v42 = vadd.f32 %v7973_v53, %v3137_v50  ;;  %v3138_v29 = vmul.f32 %v7968_v22, %v3023_v9  ;;  %v3284_v9 = vsel %vm973_vm5, %v8060_v44, -inf  ;;  %v3287_v62 = vmax.f32 %v3279_v51, %v3286_v30 }
 0x41c   : > { %v3221_v28 = vadd.f32 %v3220_v46, %v3219_v39  ;;  %v8107_v6 = vadd.f32 %v7973_v53, %v3140_v12  ;;  %v3226_v31 = vsel %vm973_vm5, %v8091_v52, 0.0  ;;  %v3294_v18 = vsel %vm973_vm5, %v8091_v52, -inf }
 0x41d   : > { %v3222_v3 = vsel %vm973_vm5, %v8078_v42, 0.0  ;;  %v8096_v38 = vadd.f32 %v7973_v53, %v3138_v29  ;;  %v3289_v54 = vmax.f32 %v3281_v15, %v3288_v2  ;;  %v3285_v14 = vmax.f32 %v3277_v33, %v3284_v9 }
 0x41e   : > { %v3223_v20 = vadd.f32 %v3222_v3, %v3221_v28  ;;  %v3228_v43 = vsel %vm973_vm5, %v8107_v6, 0.0  ;;  %v3290_v3 = vsel %vm973_vm5, %v8078_v42, -inf  ;;  %v3295_v36 = vmax.f32 %v3287_v62, %v3294_v18 }
 0x41f   : > { %v3224_v45 = vsel %vm973_vm5, %v8096_v38, 0.0  ;;  %v6340_v10 = vpop.f32.mrb[20].mxu1 }
 0x420   : > { %v3225_v41 = vadd.f32 %v3224_v45, %v3223_v20  ;;  %v3036_v56 = vpop.f32.mrb[21].mxu1  ;;  %v3143_v19 = vmul.f32 %v6340_v10, %v7968_v22  ;;  %v3283_v20 = vmax.f32 %v3275_v8, %v3282_v7  ;;  %v3292_v8 = vsel %vm973_vm5, %v8096_v38, -inf }
 0x421   : > { %v3141_v4 = vmul.f32 %v7968_v22, %v3036_v56  ;;  %v6341_v40 = vpop.f32.mrb[22].mxu1 }
 0x422   : > { %v3227_v24 = vadd.f32 %v3226_v31, %v3225_v41  ;;  %v3039_v59 = vpop.f32.mrb[23].mxu1  ;;  %v3144_v60 = vmul.f32 %v6341_v40, %v7968_v22  ;;  %v8135_v46 = vadd.f32 %v7973_v53, %v3143_v19  ;;  %v3291_v51 = vmax.f32 %v3283_v20, %v3290_v3 }
 0x423   : > { %v8122_v58 = vadd.f32 %v7973_v53, %v3141_v4  ;;  %v3142_v50 = vmul.f32 %v7968_v22, %v3039_v59  ;;  %v3296_v31 = vsel %vm973_vm5, %v8107_v6, -inf }
 0x424   : > { %v3229_v39 = vadd.f32 %v3228_v43, %v3227_v24  ;;  %v8147_v37 = vadd.f32 %v7973_v53, %v3144_v60  ;;  %v3234_v16 = vsel %vm973_vm5, %v8135_v46, 0.0  ;;  %v3302_v59 = vsel %vm973_vm5, %v8135_v46, -inf }
 0x425   : > { %v3230_v12 = vsel %vm973_vm5, %v8122_v58, 0.0  ;;  %v8140_v29 = vadd.f32 %v7973_v53, %v3142_v50  ;;  %v3298_v43 = vsel %vm973_vm5, %v8122_v58, -inf  ;;  %v3297_v9 = vmax.f32 %v3289_v54, %v3296_v31 }
 0x426   : > { %v3231_v28 = vadd.f32 %v3230_v12, %v3229_v39  ;;  %v3236_v47 = vsel %vm973_vm5, %v8147_v37, 0.0  ;;  %v3304_v60 = vsel %vm973_vm5, %v8147_v37, -inf  ;;  %v3293_v12 = vmax.f32 %v3285_v14, %v3292_v8 }
 0x427   : > { %v3232_v27 = vsel %vm973_vm5, %v8140_v29, 0.0  ;;  %v6344_v26 = vpop.f32.mrb[24].mxu1  ;;  %v3300_v30 = vsel %vm973_vm5, %v8140_v29, -inf  ;;  %v3303_v18 = vmax.f32 %v3295_v36, %v3302_v59 }
 0x428   : > { %v3233_v45 = vadd.f32 %v3232_v27, %v3231_v28  ;;  %v3052_v10 = vpop.f32.mrb[25].mxu1  ;;  %v3147_v17 = vmul.f32 %v6344_v26, %v7968_v22  ;;  %v3299_v28 = vmax.f32 %v3291_v51, %v3298_v43  ;;  %v3305_v27 = vmax.f32 %v3297_v9, %v3304_v60 }
 0x429   : > { %v3145_v41 = vmul.f32 %v7968_v22, %v3052_v10  ;;  %v6345_v56 = vpop.f32.mrb[26].mxu1  ;;  %v3301_v26 = vmax.f32 %v3293_v12, %v3300_v30 }
 0x42a   : > { %v3235_v19 = vadd.f32 %v3234_v16, %v3233_v45  ;;  %v3148_v4 = vmul.f32 %v6345_v56, %v7968_v22  ;;  %v3055_v40 = vpop.f32.mrb[27].mxu1  ;;  %v8175_v7 = vadd.f32 %v7973_v53, %v3147_v17 }
 0x42b   : > { %v8163_v55 = vadd.f32 %v7973_v53, %v3145_v41  ;;  %v3146_v24 = vmul.f32 %v7968_v22, %v3055_v40 }
 0x42c   : > { %v3237_v50 = vadd.f32 %v3236_v47, %v3235_v19  ;;  %v8183_v33 = vadd.f32 %v7973_v53, %v3148_v4  ;;  %v3242_v54 = vsel %vm973_vm5, %v8175_v7, 0.0  ;;  %v3310_v14 = vsel %vm973_vm5, %v8175_v7, -inf }
 0x42d   : > { %v3238_v2 = vsel %vm973_vm5, %v8163_v55, 0.0  ;;  %v8180_v39 = vadd.f32 %v7973_v53, %v3146_v24  ;;  %v3306_v36 = vsel %vm973_vm5, %v8163_v55, -inf  ;;  %v3311_v24 = vmax.f32 %v3303_v18, %v3310_v14 }
 0x42e   : > { %v3239_v15 = vadd.f32 %v3238_v2, %v3237_v50  ;;  %v3312_v41 = vsel %vm973_vm5, %v8183_v33, -inf  ;;  %v3244_v4 = vsel %vm973_vm5, %v8183_v33, 0.0  ;;  %v3307_v12 = vmax.f32 %v3299_v28, %v3306_v36 }
 0x42f   : > { %v3240_v62 = vsel %vm973_vm5, %v8180_v39, 0.0  ;;  %v6348_v3 = vpop.f32.mrb[28].mxu1  ;;  %v3308_v40 = vsel %vm973_vm5, %v8180_v39, -inf  ;;  %v3313_v50 = vmax.f32 %v3305_v27, %v3312_v41 }
 0x430   : > { %v3241_v20 = vadd.f32 %v3240_v62, %v3239_v15  ;;  %v3151_v45 = vmul.f32 %v6348_v3, %v7968_v22  ;;  %v3068_v10 = vpop.f32.mrb[29].mxu1 }
 0x431   : > { %v3149_v16 = vmul.f32 %v7968_v22, %v3068_v10  ;;  %v6349_v17 = vpop.f32.mrb[30].mxu1 }
 0x432   : > { %v3243_v56 = vadd.f32 %v3242_v54, %v3241_v20  ;;  %v8198_v51 = vadd.f32 %v7973_v53, %v3151_v45  ;;  %v3152_v31 = vmul.f32 %v6349_v17, %v7968_v22  ;;  %v3071_v19 = vpop.f32.mrb[31].mxu1 }
 0x433   : > { %v8206_v8 = vadd.f32 %v7973_v53, %v3149_v16  ;;  %v3150_v47 = vmul.f32 %v7968_v22, %v3071_v19  ;;  %v3309_v22 = vmax.f32 %v3301_v26, %v3308_v40 }
 0x434   : > { %v3318_v59 = vsel %vm973_vm5, %v8198_v51, -inf  ;;  %v3245_v43 = vadd.f32 %v3244_v4, %v3243_v56  ;;  %v8212_v60 = vadd.f32 %v7973_v53, %v3152_v31 }
 0x435   : > { %v3246_v30 = vsel %vm973_vm5, %v8206_v8, 0.0  ;;  %v3314_v2 = vsel %vm973_vm5, %v8206_v8, -inf  ;;  %v8219_v9 = vadd.f32 %v7973_v53, %v3150_v47  ;;  %v3319_v62 = vmax.f32 %v3311_v24, %v3318_v59 }
 0x436   : > { %v3247_v15 = vadd.f32 %v3246_v30, %v3245_v43  ;;  %v3320_v18 = vsel %vm973_vm5, %v8212_v60, -inf  ;;  %v3315_v45 = vmax.f32 %v3307_v12, %v3314_v2  ;;  %v3250_v53 = vsel %vm973_vm5, %v8198_v51, 0.0  ;;  %v3395_v12 = vld [vmem:[%s9658_s8] sm:$0x1] }
 0x437   : > { %v3321_v3 = vmax.f32 %v3313_v50, %v3320_v18  ;;  %v3248_v27 = vsel %vm973_vm5, %v8219_v9, 0.0  ;;  %v3316_v20 = vsel %vm973_vm5, %v8219_v9, -inf  ;;  %v3252_v36 = vsel %vm973_vm5, %v8212_v60, 0.0 }
 0x438   : > { %v3249_v10 = vadd.f32 %v3248_v27, %v3247_v15  ;;  %v3317_v54 = vmax.f32 %v3309_v22, %v3316_v20  ;;  %v3401_v18 = vsel %vm560_vm0, %v3395_v12, 0 }
 0x439   : > { %v3323_v28 = vmax.f32 %v3319_v62, %v3321_v3 }
 0x43a   : > { %v3251_v26 = vadd.f32 %v3250_v53, %v3249_v10  ;;  %v3322_v14 = vmax.f32 %v3315_v45, %v3317_v54 }
 0x43c   : > { %v3253_v16 = vadd.f32 %v3252_v36, %v3251_v26  ;;  %v3324_v17 = vmax.f32 %v3322_v14, %v3323_v28 }
 0x43e   : > { %v3254_v41 = vrot.slane %v3253_v16, 4  ;;  %v3325_v56 = vrot.slane %v3324_v17, 4 }
 0x440   : > { %v3255_v31 = vadd.f32 %v3254_v41, %v3253_v16  ;;  %v3326_v19 = vmax.f32 %v3324_v17, %v3325_v56  ;;  %v9661_v56 = vlaneseq }
 0x442   : > { %v3256_v4 = vrot.slane %v3255_v31, 2  ;;  %v3327_v40 = vrot.slane %v3326_v19, 2 }
 0x444   : > { %v3257_v47 = vadd.f32 %v3256_v4, %v3255_v31  ;;  %v3328_v24 = vmax.f32 %v3326_v19, %v3327_v40 }
 0x446   : > { %v3258_v59 = vrot.slane %v3257_v47, 1  ;;  %v3329_v43 = vrot.slane %v3328_v24, 1 }
 0x448   : > { %v3259_v50 = vadd.f32 %v3258_v59, %v3257_v47  ;;  %v3330_v2 = vmax.f32 %v3328_v24, %v3329_v43 }
 0x44a   : > { %v3261_v30 = vmul.f32 0.00390625, %v3259_v50 }
 0x44c   : > { %v3332_v22 = vsel %vm560_vm0, %v3261_v30, %v3330_v2  ;;  %vm4653_vm0 = vcmask 130048  }
 0x44d   : > { %v3333_v15 = vpack.c.bf16 %v3332_v22, %v3332_v22 }
 0x44f   : > { %6355 = vmatmul.mubr.msk.bf16.vlgmr.msra.gmra.mrb[32].mxu1 %vm973_vm5, %v3333_v15 }
 0x450   : > { %6359 = vmatpush3.bf16.msra.mxu1 %v3401_v18  ;;  %6360 = vmatprep.mubr.msk.bf16.mxu1 %vm6769_vm8, %v6768_v49  ;;  %v8240_v49 = vshrl.u32 %v9661_v56, 7 }
 0x452   : > { %v8243_v31 = vsub.s32 0, %v8240_v49 }
 0x454   : > { %9702 = vst [vmem:[#allocation5_spill] sm:$0xff] %v8243_v31 }
 0x522   : > { %v3387_v62 = vpop.f32.mrb[32].mxu1 }
 0x523   : > { %v3393_v3 = vmax.f32 %v3387_v62, 0.0  ;;  %v6356_v27 = vpop.f32.mrb[33].mxu1 }
 0x524   : > { %v3390_v20 = vpop.f32.mrb[34].mxu1 }
 0x525   : > { %v3394_v45 = vpack.c.bf16 %v3393_v3, %v3393_v3  ;;  %v6357_v10 = vpop.f32.mrb[35].mxu1 }
 0x527   : > { %6361 = vmatmul.mubr.msk.bf16.vlgmr.msra.gmra.mrb[36].mxu1 %vm3396_vm9, %v3394_v45 }
 0x5fa   : > { %v3437_v54 = vpop.f32.mrb[36].mxu1 }
 0x5fb   : > { %v3444_v53 = vrot.slane %v3437_v54, 1  ;;  %v6362_v28 = vpop.f32.mrb[37].mxu1 }
 0x5fc   : > { %v3440_v26 = vpop.f32.mrb[38].mxu1 }
 0x5fd   : > { %v3446_v14 = vadd.f32 %v3444_v53, %v3437_v54  ;;  %v6363_v36 = vpop.f32.mrb[39].mxu1 }
 0x5ff   : > { %v5937_v16 = vmul.f32 -1.442695, %v3446_v14 }
 0x601   : > { %6657 = vpow2.f32 %v5937_v16 }
 0x60b   : > { %v6658_v17 = vpop.eup %6657 }
 0x60c   : > { %v3450_v41 = vadd.f32 1.0, %v6658_v17 }
 0x60e   : > { %6659 = vrcp.f32 %v3450_v41 }
 0x618   : > { %v6660_v19 = vpop.eup %6659 }
 0x619   : > { %v8246_v4 = vrot.slane %v6660_v19, %v8243_v31 }
 0x61b   : > { %v8250_v40 = vmul.f32 %v8246_v4, %v7986_v63  ;;  %v8254_v47 = vmul.f32 %v8246_v4, %v7978_v0  ;;  %v8262_v43 = vmul.f32 %v8246_v4, %v8002_v57  ;;  %v8266_v50 = vmul.f32 %v8246_v4, %v7983_v23 }
 0x61c   : > { %v8274_v30 = vmul.f32 %v8246_v4, %v8007_v5  ;;  %v8278_v57 = vmul.f32 %v8246_v4, %v7991_v25  ;;  %v8286_v12 = vmul.f32 %v8246_v4, %v8026_v13  ;;  %v8290_v5 = vmul.f32 %v8246_v4, %v8012_v35 }
 0x61d   : > { %9703 = vst [vmem:[#allocation6_spill] sm:$0xff] %v8250_v40  ;;  %9704 = vst [vmem:[#allocation7_spill] sm:$0xff] %v8254_v47  ;;  %v3492_v24 = vsel %vm973_vm5, %v8250_v40, 0.0  ;;  %v3489_v59 = vsel %vm973_vm5, %v8254_v47, 0.0  ;;  %v3501_v0 = vsel %vm973_vm5, %v8262_v43, 0.0  ;;  %v3495_v63 = vsel %vm973_vm5, %v8266_v50, 0.0 }
 0x61e   : > { %9705 = vst [vmem:[#allocation8_spill] sm:$0xff] %v8262_v43  ;;  %9706 = vst [vmem:[#allocation9_spill] sm:$0xff] %v8266_v50  ;;  %3493 = vadd.xlane.f32.xlu1 %v3492_v24  ;;  %3490 = vadd.xlane.f32.xlu0 %v3489_v59  ;;  %v3507_v23 = vsel %vm973_vm5, %v8274_v30, 0.0  ;;  %v3498_v2 = vsel %vm973_vm5, %v8278_v57, 0.0  ;;  %v3513_v25 = vsel %vm973_vm5, %v8286_v12, 0.0  ;;  %v3504_v22 = vsel %vm973_vm5, %v8290_v5, 0.0 }
 0x61f   : > { %9707 = vst [vmem:[#allocation10_spill] sm:$0xff] %v8274_v30  ;;  %9708 = vst [vmem:[#allocation11_spill] sm:$0xff] %v8278_v57  ;;  %v8298_v15 = vmul.f32 %v8246_v4, %v8031_v32  ;;  %v8302_v13 = vmul.f32 %v8246_v4, %v8015_v11  ;;  %v8310_v62 = vmul.f32 %v8246_v4, %v8050_v21 }
 0x620   : > { %9709 = vst [vmem:[#allocation12_spill] sm:$0xff] %v8286_v12  ;;  %9710 = vst [vmem:[#allocation13_spill] sm:$0xff] %v8290_v5  ;;  %v8314_v32 = vmul.f32 %v8246_v4, %v8036_v1  ;;  %v8322_v27 = vmul.f32 %v8246_v4, %v8055_v34  ;;  %v8326_v21 = vmul.f32 %v8246_v4, %v8039_v61 }
 0x621   : > { %9711 = vst [vmem:[#allocation14_spill] sm:$0xff] %v8298_v15  ;;  %9712 = vst [vmem:[#allocation15_spill] sm:$0xff] %v8302_v13  ;;  %v3519_v35 = vsel %vm973_vm5, %v8298_v15, 0.0  ;;  %v3510_v18 = vsel %vm973_vm5, %v8302_v13, 0.0  ;;  %v3525_v11 = vsel %vm973_vm5, %v8310_v62, 0.0  ;;  %v8334_v45 = vmul.f32 %v8246_v4, %v8078_v42 }
 0x622   : > { %3502 = vadd.xlane.f32.xlu1 %v3501_v0  ;;  %3496 = vadd.xlane.f32.xlu0 %v3495_v63  ;;  %9713 = vst [vmem:[#allocation16_spill] sm:$0xff] %v8310_v62  ;;  %9714 = vst [vmem:[#allocation17_spill] sm:$0xff] %v8314_v32  ;;  %v3516_v3 = vsel %vm973_vm5, %v8314_v32, 0.0  ;;  %v3531_v1 = vsel %vm973_vm5, %v8322_v27, 0.0  ;;  %v3522_v20 = vsel %vm973_vm5, %v8326_v21, 0.0  ;;  %v8338_v34 = vmul.f32 %v8246_v4, %v8060_v44 }
 0x623   : > { %9715 = vst [vmem:[#allocation18_spill] sm:$0xff] %v8322_v27  ;;  %9716 = vst [vmem:[#allocation19_spill] sm:$0xff] %v8326_v21  ;;  %v3537_v61 = vsel %vm973_vm5, %v8334_v45, 0.0  ;;  %v8346_v54 = vmul.f32 %v8246_v4, %v8091_v52  ;;  %v8350_v42 = vmul.f32 %v8246_v4, %v8063_v48  ;;  %v8358_v28 = vmul.f32 %v8246_v4, %v8122_v58 }
 0x624   : > { %9717 = vst [vmem:[#allocation20_spill] sm:$0xff] %v8334_v45  ;;  %9718 = vst [vmem:[#allocation21_spill] sm:$0xff] %v8338_v34  ;;  %v3528_v10 = vsel %vm973_vm5, %v8338_v34, 0.0  ;;  %v8362_v52 = vmul.f32 %v8246_v4, %v8096_v38  ;;  %v8370_v14 = vmul.f32 %v8246_v4, %v8135_v46  ;;  %v8374_v58 = vmul.f32 %v8246_v4, %v8107_v6 }
 0x625   : > { %9719 = vst [vmem:[#allocation22_spill] sm:$0xff] %v8346_v54  ;;  %9720 = vst [vmem:[#allocation23_spill] sm:$0xff] %v8350_v42  ;;  %v3543_v44 = vsel %vm973_vm5, %v8346_v54, 0.0  ;;  %v3534_v53 = vsel %vm973_vm5, %v8350_v42, 0.0  ;;  %v3549_v48 = vsel %vm973_vm5, %v8358_v28, 0.0  ;;  %v8382_v16 = vmul.f32 %v8246_v4, %v8163_v55 }
 0x626   : > { %3508 = vadd.xlane.f32.xlu1 %v3507_v23  ;;  %3499 = vadd.xlane.f32.xlu0 %v3498_v2  ;;  %9721 = vst [vmem:[#allocation24_spill] sm:$0xff] %v8358_v28  ;;  %9722 = vst [vmem:[#allocation25_spill] sm:$0xff] %v8362_v52  ;;  %v3540_v26 = vsel %vm973_vm5, %v8362_v52, 0.0  ;;  %v3555_v38 = vsel %vm973_vm5, %v8370_v14, 0.0  ;;  %v3546_v36 = vsel %vm973_vm5, %v8374_v58, 0.0  ;;  %v8386_v46 = vmul.f32 %v8246_v4, %v8140_v29 }
 0x627   : > { %9723 = vst [vmem:[#allocation26_spill] sm:$0xff] %v8370_v14  ;;  %9724 = vst [vmem:[#allocation27_spill] sm:$0xff] %v8374_v58  ;;  %v3561_v6 = vsel %vm973_vm5, %v8382_v16, 0.0  ;;  %v8394_v41 = vmul.f32 %v8246_v4, %v8175_v7  ;;  %v8398_v55 = vmul.f32 %v8246_v4, %v8147_v37  ;;  %v8406_v24 = vmul.f32 %v8246_v4, %v8206_v8 }
 0x628   : > { %9725 = vst [vmem:[#allocation28_spill] sm:$0xff] %v8382_v16  ;;  %9726 = vst [vmem:[#allocation29_spill] sm:$0xff] %v8386_v46  ;;  %v3552_v17 = vsel %vm973_vm5, %v8386_v46, 0.0  ;;  %v8410_v7 = vmul.f32 %v8246_v4, %v8180_v39  ;;  %v8418_v0 = vmul.f32 %v8246_v4, %v8198_v51  ;;  %v8422_v8 = vmul.f32 %v8246_v4, %v8183_v33 }
 0x629   : > { %9727 = vst [vmem:[#allocation30_spill] sm:$0xff] %v8394_v41  ;;  %9728 = vst [vmem:[#allocation31_spill] sm:$0xff] %v8398_v55  ;;  %v3567_v29 = vsel %vm973_vm5, %v8394_v41, 0.0  ;;  %v3558_v19 = vsel %vm973_vm5, %v8398_v55, 0.0  ;;  %v3573_v37 = vsel %vm973_vm5, %v8406_v24, 0.0  ;;  %v8430_v23 = vmul.f32 %v8246_v4, %v8219_v9 }
 0x62a   : > { %3514 = vadd.xlane.f32.xlu1 %v3513_v25  ;;  %3505 = vadd.xlane.f32.xlu0 %v3504_v22  ;;  %9729 = vst [vmem:[#allocation32_spill] sm:$0xff] %v8406_v24  ;;  %9730 = vst [vmem:[#allocation33_spill] sm:$0xff] %v8410_v7  ;;  %v3564_v59 = vsel %vm973_vm5, %v8410_v7, 0.0  ;;  %v3579_v39 = vsel %vm973_vm5, %v8418_v0, 0.0  ;;  %v3570_v63 = vsel %vm973_vm5, %v8422_v8, 0.0  ;;  %v4008_v51 = vsel %vm973_vm5, %v8254_v47, -inf }
 0x62b   : > { %9731 = vst [vmem:[#allocation34_spill] sm:$0xff] %v8418_v0  ;;  %9732 = vst [vmem:[#allocation35_spill] sm:$0xff] %v8422_v8  ;;  %v3576_v33 = vsel %vm973_vm5, %v8430_v23, 0.0  ;;  %v8438_v2 = vmul.f32 %v8246_v4, %v8212_v60  ;;  %v4014_v25 = vsel %vm973_vm5, %v8266_v50, -inf  ;;  %v4020_v22 = vsel %vm973_vm5, %v8262_v43, -inf }
 0x62c   : > { %9733 = vst [vmem:[#allocation36_spill] sm:$0xff] %v8430_v23  ;;  %v4026_v60 = vsel %vm973_vm5, %v8274_v30, -inf  ;;  %v4017_v4 = vsel %vm973_vm5, %v8278_v57, -inf  ;;  %v6772_v30 = vmov 1934713408  }
 0x62d   : > { %9734 = vst [vmem:[#allocation37_spill] sm:$0xff] %v8438_v2  ;;  %v3582_v9 = vsel %vm973_vm5, %v8438_v2, 0.0 }
 0x62e   : > { %3520 = vadd.xlane.f32.xlu1 %v3519_v35  ;;  %3511 = vadd.xlane.f32.xlu0 %v3510_v18  ;;  %v4011_v35 = vsel %vm973_vm5, %v8250_v40, -inf  ;;  %v4032_v18 = vsel %vm973_vm5, %v8286_v12, -inf }
 0x632   : > { %3526 = vadd.xlane.f32.xlu1 %v3525_v11  ;;  %3517 = vadd.xlane.f32.xlu0 %v3516_v3  ;;  %v4023_v11 = vsel %vm973_vm5, %v8290_v5, -inf  ;;  %v4038_v3 = vsel %vm973_vm5, %v8298_v15, -inf  ;;  %v3944_v5 = vunpack.c.l.s4 %v6772_v30 }
 0x636   : > { %3532 = vadd.xlane.f32.xlu1 %v3531_v1  ;;  %3523 = vadd.xlane.f32.xlu0 %v3522_v20  ;;  %v4029_v1 = vsel %vm973_vm5, %v8302_v13, -inf  ;;  %v4044_v20 = vsel %vm973_vm5, %v8310_v62, -inf }
 0x63a   : > { %3538 = vadd.xlane.f32.xlu1 %v3537_v61  ;;  %3529 = vadd.xlane.f32.xlu0 %v3528_v10  ;;  %v4035_v61 = vsel %vm973_vm5, %v8314_v32, -inf  ;;  %v4050_v10 = vsel %vm973_vm5, %v8322_v27, -inf }
 0x63e   : > { %3544 = vadd.xlane.f32.xlu1 %v3543_v44  ;;  %3535 = vadd.xlane.f32.xlu0 %v3534_v53  ;;  %v4041_v44 = vsel %vm973_vm5, %v8326_v21, -inf  ;;  %v4056_v53 = vsel %vm973_vm5, %v8334_v45, -inf }
 0x642   : > { %3550 = vadd.xlane.f32.xlu1 %v3549_v48  ;;  %3541 = vadd.xlane.f32.xlu0 %v3540_v26  ;;  %v4047_v48 = vsel %vm973_vm5, %v8338_v34, -inf  ;;  %v4062_v26 = vsel %vm973_vm5, %v8346_v54, -inf }
 0x646   : > { %3556 = vadd.xlane.f32.xlu1 %v3555_v38  ;;  %3547 = vadd.xlane.f32.xlu0 %v3546_v36  ;;  %v4053_v38 = vsel %vm973_vm5, %v8350_v42, -inf  ;;  %v4068_v36 = vsel %vm973_vm5, %v8358_v28, -inf }
 0x64a   : > { %3562 = vadd.xlane.f32.xlu1 %v3561_v6  ;;  %3553 = vadd.xlane.f32.xlu0 %v3552_v17  ;;  %v4059_v6 = vsel %vm973_vm5, %v8362_v52, -inf  ;;  %v4074_v17 = vsel %vm973_vm5, %v8370_v14, -inf }
 0x64e   : > { %3568 = vadd.xlane.f32.xlu1 %v3567_v29  ;;  %3559 = vadd.xlane.f32.xlu0 %v3558_v19  ;;  %v4065_v29 = vsel %vm973_vm5, %v8374_v58, -inf  ;;  %v4080_v19 = vsel %vm973_vm5, %v8382_v16, -inf }
 0x652   : > { %3574 = vadd.xlane.f32.xlu1 %v3573_v37  ;;  %3565 = vadd.xlane.f32.xlu0 %v3564_v59  ;;  %v4071_v37 = vsel %vm973_vm5, %v8386_v46, -inf  ;;  %v4086_v59 = vsel %vm973_vm5, %v8394_v41, -inf }
 0x656   : > { %3580 = vadd.xlane.f32.xlu1 %v3579_v39  ;;  %3571 = vadd.xlane.f32.xlu0 %v3570_v63  ;;  %v4077_v39 = vsel %vm973_vm5, %v8398_v55, -inf  ;;  %v4092_v63 = vsel %vm973_vm5, %v8406_v24, -inf }
 0x65a   : > { %4009 = vmax.xlane.f32.xlu1 %v4008_v51  ;;  %3577 = vadd.xlane.f32.xlu0 %v3576_v33  ;;  %v4083_v51 = vsel %vm973_vm5, %v8410_v7, -inf  ;;  %v4098_v33 = vsel %vm973_vm5, %v8418_v0, -inf }
 0x65e   : > { %4015 = vmax.xlane.f32.xlu1 %v4014_v25  ;;  %3583 = vadd.xlane.f32.xlu0 %v3582_v9  ;;  %v4089_v25 = vsel %vm973_vm5, %v8422_v8, -inf  ;;  %v4095_v9 = vsel %vm973_vm5, %v8430_v23, -inf }
 0x662   : > { %4021 = vmax.xlane.f32.xlu1 %v4020_v22  ;;  %4012 = vmax.xlane.f32.xlu0 %v4011_v35  ;;  %v4101_v22 = vsel %vm973_vm5, %v8438_v2, -inf }
 0x666   : > { %4027 = vmax.xlane.f32.xlu1 %v4026_v60  ;;  %4018 = vmax.xlane.f32.xlu0 %v4017_v4 }
 0x66a   : > { %4033 = vmax.xlane.f32.xlu1 %v4032_v18  ;;  %4024 = vmax.xlane.f32.xlu0 %v4023_v11 }
 0x66e   : > { %4039 = vmax.xlane.f32.xlu1 %v4038_v3  ;;  %4030 = vmax.xlane.f32.xlu0 %v4029_v1 }
 0x672   : > { %4045 = vmax.xlane.f32.xlu1 %v4044_v20  ;;  %4036 = vmax.xlane.f32.xlu0 %v4035_v61 }
 0x676   : > { %4051 = vmax.xlane.f32.xlu1 %v4050_v10  ;;  %4042 = vmax.xlane.f32.xlu0 %v4041_v44 }
 0x67a   : > { %4057 = vmax.xlane.f32.xlu1 %v4056_v53  ;;  %4048 = vmax.xlane.f32.xlu0 %v4047_v48 }
 0x67e   : > { %4063 = vmax.xlane.f32.xlu1 %v4062_v26  ;;  %4054 = vmax.xlane.f32.xlu0 %v4053_v38 }
 0x682   : > { %4069 = vmax.xlane.f32.xlu1 %v4068_v36  ;;  %4060 = vmax.xlane.f32.xlu0 %v4059_v6 }
 0x686   : > { %4075 = vmax.xlane.f32.xlu1 %v4074_v17  ;;  %4066 = vmax.xlane.f32.xlu0 %v4065_v29 }
 0x68a   : > { %4081 = vmax.xlane.f32.xlu1 %v4080_v19  ;;  %4072 = vmax.xlane.f32.xlu0 %v4071_v37 }
 0x68e   : > { %4087 = vmax.xlane.f32.xlu1 %v4086_v59  ;;  %4078 = vmax.xlane.f32.xlu0 %v4077_v39 }
 0x692   : > { %4093 = vmax.xlane.f32.xlu1 %v4092_v63  ;;  %4084 = vmax.xlane.f32.xlu0 %v4083_v51 }
 0x696   : > { %4099 = vmax.xlane.f32.xlu1 %v4098_v33  ;;  %4090 = vmax.xlane.f32.xlu0 %v4089_v25 }
 0x69a   : > { %4096 = vmax.xlane.f32.xlu0 %v4095_v9 }
 0x69e   : > { %4102 = vmax.xlane.f32.xlu0 %v4101_v22 }
 0x6ab   : > { %v8504_v35 = vpop.xlane.xlu1 %3493  ;;  %v8506_v60 = vpop.xlane.xlu0 %3490 }
 0x6af   : > { %v8508_v4 = vpop.xlane.xlu1 %3502  ;;  %v8510_v18 = vpop.xlane.xlu0 %3496 }
 0x6b3   : > { %v8512_v11 = vpop.xlane.xlu1 %3508  ;;  %v8514_v3 = vpop.xlane.xlu0 %3499 }
 0x6b7   : > { %v8516_v1 = vpop.xlane.xlu1 %3514  ;;  %v8518_v20 = vpop.xlane.xlu0 %3505 }
 0x6bb   : > { %v8520_v61 = vpop.xlane.xlu1 %3520  ;;  %v8522_v10 = vpop.xlane.xlu0 %3511 }
 0x6bf   : > { %v8524_v44 = vpop.xlane.xlu1 %3526  ;;  %v8526_v53 = vpop.xlane.xlu0 %3517 }
 0x6c3   : > { %v8528_v48 = vpop.xlane.xlu1 %3532  ;;  %v8530_v26 = vpop.xlane.xlu0 %3523 }
 0x6c7   : > { %v8532_v38 = vpop.xlane.xlu1 %3538  ;;  %v8534_v36 = vpop.xlane.xlu0 %3529 }
 0x6cb   : > { %v8536_v6 = vpop.xlane.xlu1 %3544  ;;  %v8538_v17 = vpop.xlane.xlu0 %3535 }
 0x6cf   : > { %v8540_v29 = vpop.xlane.xlu1 %3550  ;;  %v8542_v19 = vpop.xlane.xlu0 %3541 }
 0x6d3   : > { %v8544_v37 = vpop.xlane.xlu1 %3556  ;;  %v8546_v59 = vpop.xlane.xlu0 %3547 }
 0x6d7   : > { %v8548_v39 = vpop.xlane.xlu1 %3562  ;;  %v8550_v63 = vpop.xlane.xlu0 %3553 }
 0x6db   : > { %v8552_v51 = vpop.xlane.xlu1 %3568  ;;  %v8554_v33 = vpop.xlane.xlu0 %3559 }
 0x6df   : > { %v8556_v25 = vpop.xlane.xlu1 %3574  ;;  %v8558_v9 = vpop.xlane.xlu0 %3565 }
 0x6e3   : > { %v8560_v22 = vpop.xlane.xlu1 %3580  ;;  %v8562_v56 = vpop.xlane.xlu0 %3571 }
 0x6e7   : > { %v4010_v0 = vpop.xlane.xlu1 %4009  ;;  %v8564_v2 = vpop.xlane.xlu0 %3577 }
 0x6e8   : > { %4137 = vperm.xlu0 %6587, %v4010_v0  }
 0x6eb   : > { %v4016_v41 = vpop.xlane.xlu1 %4015  ;;  %v8566_v8 = vpop.xlane.xlu0 %3583 }
 0x6ec   : > { %4143 = vperm.xlu0 %6587, %v4016_v41  }
 0x6ef   : > { %v4022_v16 = vpop.xlane.xlu1 %4021  ;;  %v4013_v24 = vpop.xlane.xlu0 %4012 }
 0x6f0   : > { %4149 = vperm.xlu0 %6587, %v4022_v16   ;;  %4140 = vperm.xlu1 %6588, %v4013_v24  }
 0x6f3   : > { %v4028_v23 = vpop.xlane.xlu1 %4027  ;;  %v4019_v7 = vpop.xlane.xlu0 %4018 }
 0x6f4   : > { %4155 = vperm.xlu0 %6587, %v4028_v23   ;;  %4146 = vperm.xlu1 %6588, %v4019_v7  }
 0x6f7   : > { %v4034_v54 = vpop.xlane.xlu1 %4033  ;;  %v4025_v14 = vpop.xlane.xlu0 %4024 }
 0x6f8   : > { %4161 = vperm.xlu0 %6587, %v4034_v54   ;;  %4152 = vperm.xlu1 %6588, %v4025_v14  }
 0x6fb   : > { %v4040_v55 = vpop.xlane.xlu1 %4039  ;;  %v4031_v58 = vpop.xlane.xlu0 %4030 }
 0x6fc   : > { %4167 = vperm.xlu0 %6587, %v4040_v55   ;;  %4158 = vperm.xlu1 %6588, %v4031_v58  }
 0x6ff   : > { %v4046_v0 = vpop.xlane.xlu1 %4045  ;;  %v4037_v45 = vpop.xlane.xlu0 %4036 }
 0x700   : > { %4173 = vperm.xlu0 %6587, %v4046_v0   ;;  %4164 = vperm.xlu1 %6588, %v4037_v45  }
 0x703   : > { %v4052_v41 = vpop.xlane.xlu1 %4051  ;;  %v4043_v52 = vpop.xlane.xlu0 %4042 }
 0x704   : > { %4179 = vperm.xlu0 %6587, %v4052_v41   ;;  %4170 = vperm.xlu1 %6588, %v4043_v52  }
 0x707   : > { %v4058_v16 = vpop.xlane.xlu1 %4057  ;;  %v4049_v24 = vpop.xlane.xlu0 %4048 }
 0x708   : > { %4185 = vperm.xlu0 %6587, %v4058_v16   ;;  %4176 = vperm.xlu1 %6588, %v4049_v24  }
 0x70b   : > { %v4064_v7 = vpop.xlane.xlu1 %4063  ;;  %v4055_v23 = vpop.xlane.xlu0 %4054 }
 0x70c   : > { %4191 = vperm.xlu0 %6587, %v4064_v7   ;;  %4182 = vperm.xlu1 %6588, %v4055_v23   ;;  %v3587_v7 = vmul.f32 0.03125, %v8504_v35  ;;  %v3589_v35 = vmul.f32 0.03125, %v8514_v3  ;;  %v3608_v3 = vmul.f32 0.03125, %v8544_v37  ;;  %v3597_v37 = vmul.f32 0.03125, %v8530_v26 }
 0x70d   : > { %v3607_v26 = vmul.f32 0.03125, %v8550_v63  ;;  %v3615_v63 = vmul.f32 0.03125, %v8564_v2 }
 0x70f   : > { %v4070_v54 = vpop.xlane.xlu1 %4069  ;;  %v4061_v14 = vpop.xlane.xlu0 %4060 }
 0x710   : > { %4197 = vperm.xlu0 %6587, %v4070_v54   ;;  %4188 = vperm.xlu1 %6588, %v4061_v14   ;;  %v3596_v54 = vmul.f32 0.03125, %v8520_v61  ;;  %v3590_v61 = vmul.f32 0.03125, %v8508_v4  ;;  %v3610_v4 = vmul.f32 0.03125, %v8548_v39  ;;  %v3599_v39 = vmul.f32 0.03125, %v8534_v36 }
 0x711   : > { %v3611_v36 = vmul.f32 0.03125, %v8558_v9 }
 0x713   : > { %v4076_v58 = vpop.xlane.xlu1 %4075  ;;  %v4067_v55 = vpop.xlane.xlu0 %4066 }
 0x714   : > { %4203 = vperm.xlu0 %6587, %v4076_v58   ;;  %4194 = vperm.xlu1 %6588, %v4067_v55   ;;  %v3586_v58 = vmul.f32 0.03125, %v8506_v60  ;;  %v3598_v55 = vmul.f32 0.03125, %v8524_v44  ;;  %v3604_v60 = vmul.f32 0.03125, %v8536_v6  ;;  %v3591_v44 = vmul.f32 0.03125, %v8518_v20 }
 0x715   : > { %v3594_v6 = vmul.f32 0.03125, %v8516_v1  ;;  %v3612_v20 = vmul.f32 0.03125, %v8552_v51  ;;  %v3601_v1 = vmul.f32 0.03125, %v8538_v17  ;;  %v3605_v51 = vmul.f32 0.03125, %v8546_v59 }
 0x716   : > { %v3613_v17 = vmul.f32 0.03125, %v8562_v56 }
 0x717   : > { %v4082_v45 = vpop.xlane.xlu1 %4081  ;;  %v4073_v0 = vpop.xlane.xlu0 %4072 }
 0x718   : > { %4209 = vperm.xlu0 %6587, %v4082_v45   ;;  %4200 = vperm.xlu1 %6588, %v4073_v0   ;;  %v3588_v45 = vmul.f32 0.03125, %v8510_v18  ;;  %v3600_v0 = vmul.f32 0.03125, %v8528_v48  ;;  %v3606_v18 = vmul.f32 0.03125, %v8540_v29  ;;  %v3592_v48 = vmul.f32 0.03125, %v8512_v11 }
 0x719   : > { %v3595_v29 = vmul.f32 0.03125, %v8526_v53  ;;  %v3614_v11 = vmul.f32 0.03125, %v8556_v25  ;;  %v3603_v53 = vmul.f32 0.03125, %v8542_v19 }
 0x71b   : > { %v4088_v52 = vpop.xlane.xlu1 %4087  ;;  %v4079_v41 = vpop.xlane.xlu0 %4078 }
 0x71c   : > { %4215 = vperm.xlu0 %6587, %v4088_v52   ;;  %4206 = vperm.xlu1 %6588, %v4079_v41   ;;  %v3602_v52 = vmul.f32 0.03125, %v8532_v38  ;;  %v3593_v38 = vmul.f32 0.03125, %v8522_v10  ;;  %v3616_v10 = vmul.f32 0.03125, %v8560_v22  ;;  %v3609_v22 = vmul.f32 0.03125, %v8554_v33 }
 0x71f   : > { %v4094_v16 = vpop.xlane.xlu1 %4093  ;;  %v4085_v24 = vpop.xlane.xlu0 %4084 }
 0x720   : > { %4221 = vperm.xlu0 %6587, %v4094_v16   ;;  %4212 = vperm.xlu1 %6588, %v4085_v24  }
 0x723   : > { %v4091_v23 = vpop.xlane.xlu0 %4090  ;;  %v4100_v41 = vpop.xlane.xlu1 %4099 }
 0x724   : > { %3654 = vperm.xlu0 %6587, %v3587_v7   ;;  %4218 = vperm.xlu1 %6588, %v4091_v23   ;;  %v3617_v23 = vmul.f32 0.03125, %v8566_v8 }
 0x727   : > { %v4097_v14 = vpop.xlane.xlu0 %4096 }
 0x728   : > { %3681 = vperm.xlu0 %6587, %v3596_v54   ;;  %4224 = vperm.xlu1 %6588, %v4097_v14  }
 0x72b   : > { %v4103_v25 = vpop.xlane.xlu0 %4102 }
 0x72c   : > { %3687 = vperm.xlu0 %6587, %v3598_v55   ;;  %3651 = vperm.xlu1 %6588, %v3586_v58  }
 0x730   : > { %3693 = vperm.xlu0 %6587, %v3600_v0   ;;  %3657 = vperm.xlu1 %6588, %v3588_v45  }
 0x734   : > { %3699 = vperm.xlu0 %6587, %v3602_v52   ;;  %3660 = vperm.xlu1 %6588, %v3589_v35  }
 0x738   : > { %3705 = vperm.xlu0 %6587, %v3604_v60   ;;  %3663 = vperm.xlu1 %6588, %v3590_v61  }
 0x73c   : > { %3711 = vperm.xlu0 %6587, %v3606_v18   ;;  %3666 = vperm.xlu1 %6588, %v3591_v44  }
 0x740   : > { %3717 = vperm.xlu0 %6587, %v3608_v3   ;;  %3669 = vperm.xlu1 %6588, %v3592_v48  }
 0x744   : > { %3723 = vperm.xlu0 %6587, %v3610_v4   ;;  %3672 = vperm.xlu1 %6588, %v3593_v38  }
 0x748   : > { %3729 = vperm.xlu0 %6587, %v3612_v20   ;;  %3675 = vperm.xlu1 %6588, %v3594_v6  }
 0x74c   : > { %3735 = vperm.xlu0 %6587, %v3614_v11   ;;  %3678 = vperm.xlu1 %6588, %v3595_v29  }
 0x750   : > { %3741 = vperm.xlu0 %6587, %v3616_v10   ;;  %3684 = vperm.xlu1 %6588, %v3597_v37  }
 0x754   : > { %4227 = vperm.xlu0 %6587, %v4100_v41   ;;  %3690 = vperm.xlu1 %6588, %v3599_v39   ;;  %v4681_v41 = vld [vmem:[%s9659_s9] sm:$0xff] }
 0x758   : > { %3696 = vperm.xlu1 %6588, %v3601_v1   ;;  %v4682_v1 = vld [vmem:[%s9659_s9 + $0x8] sm:$0xff] }
 0x75c   : > { %3702 = vperm.xlu1 %6588, %v3603_v53   ;;  %v4683_v53 = vld [vmem:[%s9659_s9 + $0x10] sm:$0xff] }
 0x760   : > { %3708 = vperm.xlu1 %6588, %v3605_v51   ;;  %v9689_v51 = vmov 0.0|0.0  }
 0x761   : > { %6364 = vmatprep.subr.bf16.mxu0 %v9689_v51 }
 0x764   : > { %3714 = vperm.xlu1 %6588, %v3607_v26   ;;  %v6365_v26 = vpack.c.bf16 %v4682_v1, %v4681_v41 }
 0x766   : > { %6366 = vmatpush1.bf16.msra.mxu0 %v6365_v26  ;;  %v4688_v26 = vld [vmem:[%s9659_s9 + $0x38] sm:$0xff] }
 0x767   : > { %v8596_v16 = vpop.permute.xlu0 %4137  ;;  %6367 = vmatprep.subr.bf16.mxu0 %v9689_v51 }
 0x768   : > { %3720 = vperm.xlu1 %6588, %v3609_v22  }
 0x76b   : > { %v8599_v24 = vpop.permute.xlu0 %4143 }
 0x76c   : > { %3726 = vperm.xlu1 %6588, %v3611_v36  }
 0x76f   : > { %v8602_v19 = vpop.permute.xlu1 %4140  ;;  %v8604_v59 = vpop.permute.xlu0 %4149 }
 0x770   : > { %3732 = vperm.xlu1 %6588, %v3613_v17   ;;  %v4685_v17 = vld [vmem:[%s9659_s9 + $0x20] sm:$0xff] }
 0x773   : > { %v8607_v7 = vpop.permute.xlu1 %4146  ;;  %v8609_v33 = vpop.permute.xlu0 %4155 }
 0x774   : > { %3738 = vperm.xlu1 %6588, %v3615_v63   ;;  %v4686_v63 = vld [vmem:[%s9659_s9 + $0x28] sm:$0xff] }
 0x775   : > { %v6371_v1 = vpack.c.bf16 %v4686_v63, %v4685_v17  ;;  %v4690_v17 = vld [vmem:[%s9659_s9 + $0x48] sm:$0xff] }
 0x777   : > { %v8612_v9 = vpop.permute.xlu1 %4152  ;;  %v8614_v54 = vpop.permute.xlu0 %4161 }
 0x778   : > { %3744 = vperm.xlu1 %6588, %v3617_v23  }
 0x77b   : > { %v8616_v56 = vpop.permute.xlu1 %4158  ;;  %v8618_v14 = vpop.permute.xlu0 %4167 }
 0x77c   : > { %4230 = vperm.xlu1 %6588, %v4103_v25   ;;  %v4684_v25 = vld [vmem:[%s9659_s9 + $0x18] sm:$0xff] }
 0x77d   : > { %v6368_v36 = vpack.c.bf16 %v4684_v25, %v4683_v53  ;;  %v4687_v53 = vld [vmem:[%s9659_s9 + $0x30] sm:$0xff] }
 0x77e   : > { %v6374_v28 = vpack.c.bf16 %v4688_v26, %v4687_v53  ;;  %v4692_v53 = vld [vmem:[%s9659_s9 + $0x58] sm:$0xff] }
 0x77f   : > { %v8620_v58 = vpop.permute.xlu1 %4164  ;;  %v8622_v2 = vpop.permute.xlu0 %4173  ;;  %6369 = vmatpush1.bf16.msra.mxu0 %v6368_v36  ;;  %v4689_v36 = vld [vmem:[%s9659_s9 + $0x40] sm:$0xff] }
 0x780   : > { %6370 = vmatprep.subr.bf16.mxu0 %v9689_v51  ;;  %v6377_v27 = vpack.c.bf16 %v4690_v17, %v4689_v36  ;;  %v4694_v36 = vld [vmem:[%s9659_s9 + $0x68] sm:$0xff] }
 0x783   : > { %v8624_v55 = vpop.permute.xlu1 %4170  ;;  %v8626_v45 = vpop.permute.xlu0 %4179  ;;  %6372 = vmatpush1.bf16.msra.mxu0 %v6371_v1  ;;  %v4691_v1 = vld [vmem:[%s9659_s9 + $0x50] sm:$0xff] }
 0x784   : > { %6373 = vmatprep.subr.bf16.mxu0 %v9689_v51  ;;  %v6380_v15 = vpack.c.bf16 %v4692_v53, %v4691_v1  ;;  %v4696_v1 = vld [vmem:[%s9659_s9 + $0x78] sm:$0xff] }
 0x787   : > { %v8628_v0 = vpop.permute.xlu1 %4176  ;;  %v8630_v8 = vpop.permute.xlu0 %4185  ;;  %6375 = vmatpush1.bf16.msra.mxu0 %v6374_v28  ;;  %v4693_v28 = vld [vmem:[%s9659_s9 + $0x60] sm:$0xff] }
 0x788   : > { %6376 = vmatprep.subr.bf16.mxu0 %v9689_v51  ;;  %v6383_v21 = vpack.c.bf16 %v4694_v36, %v4693_v28  ;;  %v9735_v36 = vlaneseq }
 0x78a   : > { %v3747_v34 = vand.u32 127, %v9735_v36  ;;  %v6771_v36 = vmov 1983009808  }
 0x78b   : > { %v8632_v35 = vpop.permute.xlu1 %4182  ;;  %v8634_v52 = vpop.permute.xlu0 %4191  ;;  %6378 = vmatpush1.bf16.msra.mxu0 %v6377_v27  ;;  %v4695_v27 = vld [vmem:[%s9659_s9 + $0x70] sm:$0xff] }
 0x78c   : > { %6379 = vmatprep.subr.bf16.mxu0 %v9689_v51  ;;  %v6386_v62 = vpack.c.bf16 %v4696_v1, %v4695_v27  ;;  %v3752_v32 = vadd.s32 4294967288, %v3747_v34  ;;  %v8760_v27 = vsub.s32 %v3747_v34, %v8240_v49 }
 0x78e   : > { %v8755_v50 = vsub.s32 %v3752_v32, %v8240_v49  ;;  %v4262_v32 = vrot.slane %v8609_v33, %v8760_v27  ;;  %v4244_v57 = vrot.slane %v8599_v24, %v8760_v27 }
 0x78f   : > { %v8636_v61 = vpop.permute.xlu1 %4188  ;;  %v8638_v60 = vpop.permute.xlu0 %4197  ;;  %6381 = vmatpush1.bf16.msra.mxu0 %v6380_v15 }
 0x790   : > { %6382 = vmatprep.subr.bf16.mxu0 %v9689_v51  ;;  %v4266_v1 = vrot.slane %v8616_v56, %v8755_v50  ;;  %v4257_v40 = vrot.slane %v8612_v9, %v8755_v50  ;;  %v4302_v34 = vrot.slane %v8632_v35, %v8755_v50  ;;  %v4239_v56 = vrot.slane %v8602_v19, %v8755_v50 }
 0x791   : > { %v4284_v33 = vrot.slane %v8624_v55, %v8755_v50  ;;  %v4298_v35 = vrot.slane %v8626_v45, %v8760_v27  ;;  %v4293_v24 = vrot.slane %v8628_v0, %v8755_v50  ;;  %v4235_v19 = vrot.slane %v8596_v16, %v8760_v27 }
 0x792   : > { %v4267_v30 = vsel %vm3757_vm10, %v4266_v1, %v4262_v32  ;;  %v4280_v1 = vrot.slane %v8618_v14, %v8760_v27  ;;  %v4275_v55 = vrot.slane %v8620_v58, %v8755_v50  ;;  %v4289_v45 = vrot.slane %v8622_v2, %v8760_v27 }
 0x793   : > { %v8640_v44 = vpop.permute.xlu1 %4194  ;;  %v8644_v48 = vpop.permute.xlu0 %4203  ;;  %6384 = vmatpush1.bf16.msra.mxu0 %v6383_v21  ;;  %v4303_v32 = vsel %vm3757_vm10, %v4302_v34, %v4298_v35  ;;  %v4240_v16 = vsel %vm3757_vm10, %v4239_v56, %v4235_v19  ;;  %v3945_v34 = vunpack.c.0.s8 %v3944_v5 }
 0x794   : > { %6385 = vmatprep.subr.bf16.mxu0 %v9689_v51  ;;  %v4294_v14 = vsel %vm3757_vm10, %v4293_v24, %v4289_v45  ;;  %v4334_v5 = vrot.slane %v8644_v48, %v8760_v27  ;;  %v4311_v48 = vrot.slane %v8636_v61, %v8755_v50 }
 0x795   : > { %v8825_v24 = vsub.s32 %v3945_v34, %v8240_v49 }
 0x797   : > { %v8642_v18 = vpop.permute.xlu1 %4200  ;;  %v8648_v38 = vpop.permute.xlu0 %4209  ;;  %6387 = vmatpush1.bf16.msra.mxu0 %v6386_v62  ;;  %v3912_v62 = vunpack.c.l.s4 %v6771_v36 }
 0x798   : > { %6388 = vmatprep.subr.bf16.mxu0 %v9689_v51  ;;  %v4248_v51 = vrot.slane %v8607_v7, %v8755_v50  ;;  %v4253_v7 = vrot.slane %v8604_v59, %v8760_v27 }
 0x799   : > { %v3913_v13 = vunpack.c.0.s8 %v3912_v62 }
 0x79a   : > { %v4249_v59 = vsel %vm3757_vm10, %v4248_v51, %v4244_v57  ;;  %v4258_v31 = vsel %vm3757_vm10, %v4257_v40, %v4253_v7  ;;  %v4271_v57 = vrot.slane %v8614_v54, %v8760_v27  ;;  %v4285_v40 = vsel %vm3757_vm10, %v4284_v33, %v4280_v1 }
 0x79b   : > { %v8646_v3 = vpop.permute.xlu1 %4206  ;;  %v8654_v20 = vpop.permute.xlu0 %4215  ;;  %v4400_v0 = vcombine.low %v4249_v59, %v4267_v30  ;;  %v8808_v51 = vsub.s32 %v3913_v13, %v8240_v49  ;;  %v4392_v58 = vcombine.low %v4240_v16, %v4258_v31  ;;  %v4416_v7 = vcombine.low %v4285_v40, %v4303_v32 }
 0x79c   : > { %v4276_v30 = vsel %vm3757_vm10, %v4275_v55, %v4271_v57  ;;  %v4338_v54 = vrot.slane %v8646_v3, %v8755_v50  ;;  %v4320_v31 = vrot.slane %v8640_v44, %v8755_v50  ;;  %v4329_v59 = vrot.slane %v8642_v18, %v8755_v50 }
 0x79d   : > { %v4407_v35 = vrot.slane %v4400_v0, %v8808_v51  ;;  %v4408_v56 = vcombine.low %v4276_v30, %v4294_v14  ;;  %v4399_v33 = vrot.slane %v4392_v58, %v8808_v51  ;;  %v4423_v13 = vrot.slane %v4416_v7, %v8808_v51 }
 0x79e   : > { %v4316_v55 = vrot.slane %v8634_v52, %v8760_v27  ;;  %v4339_v45 = vsel %vm3757_vm10, %v4338_v54, %v4334_v5  ;;  %v4325_v0 = vrot.slane %v8638_v60, %v8760_v27  ;;  %v4307_v57 = vrot.slane %v8630_v8, %v8760_v27 }
 0x79f   : > { %v8650_v4 = vpop.permute.xlu1 %4212  ;;  %v8658_v11 = vpop.permute.xlu0 %4221  ;;  %v4424_v1 = vcombine.low %v4399_v33, %v4407_v35  ;;  %v4415_v3 = vrot.slane %v4408_v56, %v8808_v51  ;;  %v4343_v7 = vrot.slane %v8648_v38, %v8760_v27  ;;  %v4352_v35 = vrot.slane %v8654_v20, %v8760_v27 }
 0x7a0   : > { %v4321_v18 = vsel %vm3757_vm10, %v4320_v31, %v4316_v55  ;;  %v8845_v52 = vsel %vm3757_vm10, %v4329_v59, %v4325_v0  ;;  %v4347_v14 = vrot.slane %v8650_v4, %v8755_v50  ;;  %v8855_v60 = vsel %vm3757_vm10, %v4311_v48, %v4307_v57 }
 0x7a1   : > { %v4432_v16 = vcombine.low %v4415_v3, %v4423_v13  ;;  %v4449_v40 = vcombine.low %v4321_v18, %v4339_v45  ;;  %v8850_v58 = vrot.slane %v4424_v1, %v8825_v24  ;;  %v4441_v4 = vcombine.low %v8855_v60, %v8845_v52  ;;  %v4698_v52 = vld [vmem:[%s9659_s9 + $0x88] sm:$0xff] }
 0x7a3   : > { %v8652_v6 = vpop.permute.xlu1 %4218  ;;  %v8664_v39 = vpop.permute.xlu0 %3654  ;;  %v8864_v30 = vrot.slane %v4432_v16, %v8825_v24  ;;  %v8873_v38 = vrot.slane %v4449_v40, %v8808_v51 }
 0x7a4   : > { %v3756_v33 = vrot.slane %v8664_v39, %v8755_v50  ;;  %v4356_v13 = vrot.slane %v8652_v6, %v8755_v50  ;;  %v4448_v6 = vrot.slane %v4441_v4, %v8808_v51 }
 0x7a7   : > { %v8656_v29 = vpop.permute.xlu1 %4224  ;;  %v8688_v23 = vpop.permute.xlu0 %3681 }
 0x7a8   : > { %v4365_v8 = vrot.slane %v8656_v29, %v8755_v50  ;;  %v8876_v29 = vsel %vm3757_vm10, %v4347_v14, %v4343_v7  ;;  %v3798_v31 = vrot.slane %v8688_v23, %v8760_v27 }
 0x7ab   : > { %v8660_v37 = vpop.permute.xlu1 %3651  ;;  %v8701_v46 = vpop.permute.xlu0 %3687 }
 0x7ac   : > { %v3751_v34 = vrot.slane %v8660_v37, %v8760_v27  ;;  %v4361_v37 = vrot.slane %v8658_v11, %v8760_v27  ;;  %v3807_v39 = vrot.slane %v8701_v46, %v8760_v27 }
 0x7ae   : > { %v8891_v1 = vsel %vm3757_vm10, %v4365_v8, %v4361_v37  ;;  %v8894_v11 = vsel %vm3757_vm10, %v3756_v33, %v3751_v34 }
 0x7af   : > { %v8662_v10 = vpop.permute.xlu1 %3657  ;;  %v8719_v26 = vpop.permute.xlu0 %3693 }
 0x7b0   : > { %v3816_v23 = vrot.slane %v8719_v26, %v8760_v27 }
 0x7b3   : > { %v8679_v22 = vpop.permute.xlu1 %3660  ;;  %v8732_v12 = vpop.permute.xlu0 %3699 }
 0x7b4   : > { %v3766_v56 = vrot.slane %v8679_v22, %v8755_v50  ;;  %v3762_v22 = vrot.slane %v8662_v10, %v8760_v27 }
 0x7b6   : > { %v8903_v10 = vsel %vm3757_vm10, %v3766_v56, %v3762_v22 }
 0x7b7   : > { %v8690_v41 = vpop.permute.xlu1 %3663  ;;  %v8744_v15 = vpop.permute.xlu0 %3705 }
 0x7b8   : > { %v3771_v55 = vrot.slane %v8690_v41, %v8760_v27  ;;  %v3834_v45 = vrot.slane %v8744_v15, %v8760_v27 }
 0x7bb   : > { %v8699_v25 = vpop.permute.xlu1 %3666  ;;  %v8752_v43 = vpop.permute.xlu0 %3711 }
 0x7bc   : > { %v3775_v5 = vrot.slane %v8699_v25, %v8755_v50  ;;  %v3825_v25 = vrot.slane %v8732_v12, %v8760_v27  ;;  %v3843_v46 = vrot.slane %v8752_v43, %v8760_v27 }
 0x7be   : > { %v8918_v48 = vsel %vm3757_vm10, %v3775_v5, %v3771_v55 }
 0x7bf   : > { %v8710_v63 = vpop.permute.xlu1 %3669  ;;  %v8778_v36 = vpop.permute.xlu0 %3717 }
 0x7c0   : > { %v3852_v12 = vrot.slane %v8778_v36, %v8760_v27 }
 0x7c3   : > { %v8721_v42 = vpop.permute.xlu1 %3672  ;;  %v8810_v2 = vpop.permute.xlu0 %3723 }
 0x7c4   : > { %v3784_v3 = vrot.slane %v8721_v42, %v8755_v50  ;;  %v3780_v42 = vrot.slane %v8710_v63, %v8760_v27  ;;  %v3861_v41 = vrot.slane %v8810_v2, %v8760_v27 }
 0x7c6   : > { %v3785_v16 = vsel %vm3757_vm10, %v3784_v3, %v3780_v42 }
 0x7c7   : > { %v8730_v17 = vpop.permute.xlu1 %3675  ;;  %v8833_v32 = vpop.permute.xlu0 %3729  ;;  %v3918_v3 = vcombine.low %v8903_v10, %v3785_v16  ;;  %v4357_v10 = vsel %vm3757_vm10, %v4356_v13, %v4352_v35 }
 0x7c8   : > { %v3789_v40 = vrot.slane %v8730_v17, %v8760_v27 }
 0x7c9   : > { %v3925_v35 = vrot.slane %v3918_v3, %v8808_v51 }
 0x7cb   : > { %v8741_v53 = vpop.permute.xlu1 %3678  ;;  %v3736_v54 = vpop.permute.xlu0 %3735 }
 0x7cc   : > { %v3879_v36 = vrot.slane %v3736_v54, %v8760_v27  ;;  %v3793_v7 = vrot.slane %v8741_v53, %v8755_v50 }
 0x7cf   : > { %v8746_v28 = vpop.permute.xlu1 %3684  ;;  %v3742_v0 = vpop.permute.xlu0 %3741 }
 0x7d0   : > { %v3802_v63 = vrot.slane %v8746_v28, %v8755_v50  ;;  %v3870_v28 = vrot.slane %v8833_v32, %v8760_v27  ;;  %v3888_v34 = vrot.slane %v3742_v0, %v8760_v27 }
 0x7d2   : > { %v3803_v17 = vsel %vm3757_vm10, %v3802_v63, %v3798_v31 }
 0x7d3   : > { %v8750_v47 = vpop.permute.xlu1 %3690  ;;  %v4228_v54 = vpop.permute.xlu0 %4227 }
 0x7d7   : > { %v8757_v21 = vpop.permute.xlu1 %3696 }
 0x7d8   : > { %v3820_v26 = vrot.slane %v8757_v21, %v8755_v50  ;;  %v3811_v21 = vrot.slane %v8750_v47, %v8755_v50 }
 0x7da   : > { %v3821_v47 = vsel %vm3757_vm10, %v3820_v26, %v3816_v23  ;;  %v3812_v32 = vsel %vm3757_vm10, %v3811_v21, %v3807_v39  ;;  %v3794_v39 = vsel %vm3757_vm10, %v3793_v7, %v3789_v40  ;;  %v9736_v40 = vmov 0.0|0.0  }
 0x7db   : > { %v8780_v9 = vpop.permute.xlu1 %3702  ;;  %v3934_v37 = vcombine.low %v3803_v17, %v3821_v47  ;;  %v3926_v26 = vcombine.low %v3794_v39, %v3812_v32  ;;  %v4700_v47 = vld [vmem:[%s9659_s9 + $0x98] sm:$0xff] }
 0x7df   : > { %v8800_v62 = vpop.permute.xlu1 %3708 }
 0x7e0   : > { %v3838_v2 = vrot.slane %v8800_v62, %v8755_v50  ;;  %v3829_v62 = vrot.slane %v8780_v9, %v8755_v50 }
 0x7e2   : > { %v3839_v53 = vsel %vm3757_vm10, %v3838_v2, %v3834_v45  ;;  %v3830_v23 = vsel %vm3757_vm10, %v3829_v62, %v3825_v25  ;;  %v4370_v45 = vrot.slane %v4228_v54, %v8760_v27  ;;  %v3910_v25 = vcombine.low %v8894_v11, %v8918_v48 }
 0x7e3   : > { %v8816_v19 = vpop.permute.xlu1 %3714  ;;  %v4473_v11 = vcombine.low %v4448_v6, %v8873_v38  ;;  %v4703_v6 = vld [vmem:[%s9659_s9 + $0xb0] sm:$0xff] }
 0x7e4   : > { %v3847_v57 = vrot.slane %v8816_v19, %v8755_v50  ;;  %v3917_v60 = vrot.slane %v3910_v25, %v8808_v51 }
 0x7e6   : > { %v3848_v33 = vsel %vm3757_vm10, %v3847_v57, %v3843_v46  ;;  %v3942_v38 = vcombine.low %v3917_v60, %v3925_v35  ;;  %v4480_v57 = vrot.slane %v4473_v11, %v8825_v24 }
 0x7e7   : > { %v8835_v44 = vpop.permute.xlu1 %3720  ;;  %v3959_v46 = vcombine.low %v3830_v23, %v3848_v33 }
 0x7e8   : > { %v3856_v15 = vrot.slane %v8835_v44, %v8755_v50 }
 0x7e9   : > { %v3966_v13 = vrot.slane %v3959_v46, %v8808_v51 }
 0x7ea   : > { %v3857_v19 = vsel %vm3757_vm10, %v3856_v15, %v3852_v12  ;;  %v3941_v15 = vrot.slane %v3934_v37, %v8808_v51 }
 0x7eb   : > { %v8852_v61 = vpop.permute.xlu1 %3726  ;;  %v3967_v22 = vcombine.low %v3839_v53, %v3857_v19 }
 0x7ec   : > { %v3865_v44 = vrot.slane %v8852_v61, %v8755_v50 }
 0x7ee   : > { %v3866_v9 = vsel %vm3757_vm10, %v3865_v44, %v3861_v41  ;;  %v4457_v41 = vcombine.low %v8876_v29, %v8891_v1  ;;  %v3933_v29 = vrot.slane %v3926_v26, %v8808_v51 }
 0x7ef   : > { %v3733_v59 = vpop.permute.xlu1 %3732 }
 0x7f0   : > { %v3874_v14 = vrot.slane %v3733_v59, %v8755_v50  ;;  %v4464_v48 = vrot.slane %v4457_v41, %v8808_v51 }
 0x7f2   : > { %v3875_v5 = vsel %vm3757_vm10, %v3874_v14, %v3870_v28  ;;  %v4699_v28 = vld [vmem:[%s9659_s9 + $0x90] sm:$0xff] }
 0x7f3   : > { %v3739_v43 = vpop.permute.xlu1 %3738  ;;  %v6392_v62 = vpack.c.bf16 %v4700_v47, %v4699_v28 }
 0x7f4   : > { %v3883_v18 = vrot.slane %v3739_v43, %v8755_v50  ;;  %v3974_v43 = vrot.slane %v3967_v22, %v8808_v51 }
 0x7f6   : > { %v3884_v61 = vsel %vm3757_vm10, %v3883_v18, %v3879_v36  ;;  %v3991_v4 = vcombine.low %v3966_v13, %v3974_v43 }
 0x7f7   : > { %v3745_v8 = vpop.permute.xlu1 %3744  ;;  %v3975_v59 = vcombine.low %v3866_v9, %v3884_v61 }
 0x7f8   : > { %v3892_v56 = vrot.slane %v3745_v8, %v8755_v50  ;;  %v3998_v7 = vrot.slane %v3991_v4, %v8825_v24  ;;  %v3949_v8 = vrot.slane %v3942_v38, %v8825_v24 }
 0x7f9   : > { %v3982_v16 = vrot.slane %v3975_v59, %v8808_v51 }
 0x7fa   : > { %v3893_v31 = vsel %vm3757_vm10, %v3892_v56, %v3888_v34 }
 0x7fb   : > { %v3983_v55 = vcombine.low %v3875_v5, %v3893_v31  ;;  %v4231_v42 = vpop.permute.xlu1 %4230 }
 0x7fc   : > { %v4374_v12 = vrot.slane %v4231_v42, %v8755_v50  ;;  %v4440_v50 = vcombine.low %v8850_v58, %v8864_v30  ;;  %v4697_v58 = vld [vmem:[%s9659_s9 + $0x80] sm:$0xff]  ;;  %v3950_v30 = vcombine.low %v3933_v29, %v3941_v15  ;;  %v4702_v15 = vld [vmem:[%s9659_s9 + $0xa8] sm:$0xff] }
 0x7fd   : > { %v3990_v0 = vrot.slane %v3983_v55, %v8808_v51  ;;  %v6389_v21 = vpack.c.bf16 %v4698_v52, %v4697_v58 }
 0x7fe   : > { %v4375_v20 = vsel %vm3757_vm10, %v4374_v12, %v4370_v45  ;;  %v4503_v36 = vrot.slane %v4440_v50, 5  ;;  %v3957_v14 = vrot.slane %v3950_v30, %v8825_v24 }
 0x7ff   : > { %v4465_v27 = vcombine.low %v4357_v10, %v4375_v20  ;;  %v3999_v1 = vcombine.low %v3982_v16, %v3990_v0  ;;  %6390 = vmatpush1.bf16.msra.mxu0 %v6389_v21  ;;  %v4701_v0 = vld [vmem:[%s9659_s9 + $0xa0] sm:$0xff] }
 0x800   : > { %6391 = vmatprep.subr.bf16.mxu0 %v9736_v40  ;;  %v9013_v61 = vsel %vm4492_vm11, 0.0, %v4503_v36  ;;  %v3958_v32 = vcombine.low %v3949_v8, %v3957_v14  ;;  %v4705_v21 = vld [vmem:[%s9659_s9 + $0xc0] sm:$0xff]  ;;  %v4708_v8 = vld [vmem:[%s9659_s9 + $0xd8] sm:$0xff] }
 0x801   : > { %v4472_v63 = vrot.slane %v4465_v27, %v8808_v51  ;;  %v4006_v2 = vrot.slane %v3999_v1, %v8825_v24  ;;  %v4532_v37 = vrot.slane %v9013_v61, 1  ;;  %v4555_v55 = vrot.slane %v9013_v61, 2  ;;  %v4704_v27 = vld [vmem:[%s9659_s9 + $0xb8] sm:$0xff] }
 0x802   : > { %v4493_v3 = vrot.slane %v3958_v32, 5  ;;  %v4597_v26 = vrot.slane %v9013_v61, 4  ;;  %v4619_v20 = vrot.slane %v9013_v61, 5  ;;  %v6395_v1 = vpack.c.bf16 %v4702_v15, %v4701_v0 }
 0x803   : > { %v4481_v18 = vcombine.low %v4464_v48, %v4472_v63  ;;  %v4007_v17 = vcombine.low %v3998_v7, %v4006_v2  ;;  %6393 = vmatpush1.bf16.msra.mxu0 %v6392_v62  ;;  %v4642_v58 = vrot.slane %v9013_v61, 6  ;;  %v6398_v60 = vpack.c.bf16 %v4704_v27, %v4703_v6 }
 0x804   : > { %6394 = vmatprep.subr.bf16.mxu0 %v9736_v40  ;;  %v9055_v43 = vsel %vm4492_vm11, 0.0, %v4493_v3  ;;  %v4578_v62 = vrot.slane %v9013_v61, 3 }
 0x805   : > { %v4488_v44 = vrot.slane %v4481_v18, %v8825_v24  ;;  %v4494_v53 = vrot.slane %v4007_v17, 5  ;;  %v4520_v52 = vrot.slane %v9055_v43, 1  ;;  %v4706_v18 = vld [vmem:[%s9659_s9 + $0xc8] sm:$0xff]  ;;  %v4544_v47 = vrot.slane %v9055_v43, 2 }
 0x806   : > { %v6401_v14 = vpack.c.bf16 %v4706_v18, %v4705_v21 }
 0x807   : > { %v4489_v19 = vcombine.low %v4480_v57, %v4488_v44  ;;  %v9037_v45 = vsel %vm4492_vm11, %v4493_v3, %v4494_v53  ;;  %v9042_v10 = vsel %vm4492_vm11, %v4494_v53, 0.0  ;;  %6396 = vmatpush1.bf16.msra.mxu0 %v6395_v1 }
 0x808   : > { %v4521_v50 = vrot.slane %v9037_v45, 1  ;;  %v4523_v29 = vrot.slane %v9042_v10, 1  ;;  %v4591_v13 = vrot.slane %v9037_v45, 4  ;;  %v4593_v63 = vrot.slane %v9042_v10, 4  ;;  %6397 = vmatprep.subr.bf16.mxu0 %v9736_v40 }
 0x809   : > { %v4504_v34 = vrot.slane %v4489_v19, 5  ;;  %v4545_v30 = vrot.slane %v9037_v45, 2  ;;  %v4547_v57 = vrot.slane %v9042_v10, 2  ;;  %v4707_v19 = vld [vmem:[%s9659_s9 + $0xd0] sm:$0xff]  ;;  %v4568_v32 = vrot.slane %v9037_v45, 3 }
 0x80a   : > { %v9081_v4 = vsel %vm4589_vm13, %v4591_v13, %v4593_v63  ;;  %v4522_v38 = vsel %vm892_vm2, %v4520_v52, %v4521_v50  ;;  %v4524_v2 = vsel %vm892_vm2, %v4521_v50, %v4523_v29  ;;  %v4609_v53 = vrot.slane %v9037_v45, 5 }
 0x80b   : > { %v9018_v56 = vsel %vm4492_vm11, %v4503_v36, %v4504_v34  ;;  %v9021_v54 = vsel %vm4492_vm11, %v4504_v34, 0.0  ;;  %6399 = vmatpush1.bf16.msra.mxu0 %v6398_v60  ;;  %v6604_v7 = vpack.i.bf16 %v4524_v2, %v4522_v38  ;;  %v4546_v17 = vsel %vm4543_vm12, %v4544_v47, %v4545_v30 }
 0x80c   : > { %v6589_v33 = vpack.i.bf16 %v9018_v56, %v9013_v61  ;;  %v4533_v9 = vrot.slane %v9018_v56, 1  ;;  %v4535_v22 = vrot.slane %v9021_v54, 1  ;;  %v4598_v5 = vrot.slane %v9018_v56, 4  ;;  %6400 = vmatprep.subr.bf16.mxu0 %v9736_v40 }
 0x80d   : > { %v4556_v59 = vrot.slane %v9018_v56, 2  ;;  %v4558_v31 = vrot.slane %v9021_v54, 2  ;;  %v4620_v25 = vrot.slane %v9018_v56, 5  ;;  %v4643_v35 = vrot.slane %v9018_v56, 6 }
 0x80e   : > { %6590 = vrot.lane.b32.xlu0 %v6589_v33, %s6773_s25  ;;  %v4534_v39 = vsel %vm892_vm2, %v4532_v37, %v4533_v9  ;;  %v4536_v23 = vsel %vm892_vm2, %v4533_v9, %v4535_v22  ;;  %v4599_v41 = vsel %vm4589_vm13, %v4597_v26, %v4598_v5  ;;  %v4600_v48 = vrot.slane %v9021_v54, 4 }
 0x80f   : > { %v6594_v42 = vpack.i.bf16 %v4536_v23, %v4534_v39  ;;  %v4557_v46 = vsel %vm4543_vm12, %v4555_v55, %v4556_v59  ;;  %v4559_v12 = vsel %vm4543_vm12, %v4556_v59, %v4558_v31  ;;  %v4621_v11 = vsel %vm4492_vm11, %v4619_v20, %v4620_v25  ;;  %6402 = vmatpush1.bf16.msra.mxu0 %v6401_v14 }
 0x810   : > { %v6599_v16 = vpack.i.bf16 %v4559_v12, %v4557_v46  ;;  %v4644_v36 = vsel %vm4630_vm14, %v4642_v58, %v4643_v35  ;;  %v4601_v44 = vsel %vm4589_vm13, %v4598_v5, %v4600_v48  ;;  %v4579_v28 = vrot.slane %v9018_v56, 3  ;;  %6403 = vmatprep.subr.bf16.mxu0 %v9736_v40 }
 0x811   : > { %6595 = vrot.lane.b32.xlu1 %v6594_v42, %s6774_s26  ;;  %v4548_v34 = vsel %vm4543_vm12, %v4545_v30, %v4547_v57  ;;  %v4570_v37 = vrot.slane %v9042_v10, 3  ;;  %v4567_v33 = vrot.slane %v9055_v43, 3  ;;  %v6404_v9 = vpack.c.bf16 %v4708_v8, %v4707_v19 }
 0x812   : > { %4602 = vrot.lane.b32.xlu0 %v4599_v41, %s6773_s25  ;;  %v4580_v61 = vsel %vm4566_vm15, %v4578_v62, %v4579_v28  ;;  %v6609_v22 = vpack.i.bf16 %v4548_v34, %v4546_v17  ;;  %v4608_v5 = vrot.slane %v9055_v43, 5  ;;  %v4632_v39 = vrot.slane %v9037_v45, 6 }
 0x813   : > { %v4569_v59 = vsel %vm4566_vm15, %v4567_v33, %v4568_v32  ;;  %v4571_v31 = vsel %vm4566_vm15, %v4568_v32, %v4570_v37  ;;  %6405 = vmatpush1.bf16.msra.mxu0 %v6404_v9  ;;  %v4631_v55 = vrot.slane %v9055_v43, 6  ;;  %v4611_v42 = vrot.slane %v9042_v10, 5 }
 0x814   : > { %v4610_v3 = vsel %vm4492_vm11, %v4608_v5, %v4609_v53  ;;  %v6614_v23 = vpack.i.bf16 %v4571_v31, %v4569_v59  ;;  %v4622_v26 = vrot.slane %v9021_v54, 5  ;;  %v4634_v12 = vrot.slane %v9042_v10, 6 }
 0x815   : > { %6600 = vrot.lane.b32.xlu1 %v6599_v16, %s6775_s30  ;;  %v4633_v40 = vsel %vm4630_vm14, %v4631_v55, %v4632_v39  ;;  %v4612_v46 = vsel %vm4492_vm11, %v4609_v53, %v4611_v42  ;;  %v4645_v0 = vrot.slane %v9021_v54, 6  ;;  %v4581_v16 = vrot.slane %v9021_v54, 3 }
 0x816   : > { %4624 = vrot.lane.b32.xlu0 %v4621_v11, %s6774_s26  ;;  %v4623_v41 = vsel %vm4492_vm11, %v4620_v25, %v4622_v26  ;;  %v4635_v15 = vsel %vm4630_vm14, %v4632_v39, %v4634_v12  ;;  %vm4663_vm2 = vcmask 654336  }
 0x817   : > { %v4646_v10 = vsel %vm4630_vm14, %v4643_v35, %v4645_v0  ;;  %v4582_v20 = vsel %vm4566_vm15, %v4579_v28, %v4581_v16  ;;  %v4590_v35 = vrot.slane %v9055_v43, 4 }
 0x819   : > { %4647 = vrot.lane.b32.xlu1 %v4644_v36, %s6775_s30  ;;  %v4592_v30 = vsel %vm4589_vm13, %v4590_v35, %v4591_v13 }
 0x81a   : > { %4604 = vrot.lane.b32.xlu0 %v4601_v44, %s6773_s25  ;;  %s6776_s25 = smov 112  }
 0x81d   : > { %6605 = vrot.lane.b32.xlu1 %v6604_v7, %s6767_s12 }
 0x81e   : > { %4583 = vrot.lane.b32.xlu0 %v4580_v61, %s6776_s25 }
 0x821   : > { %6610 = vrot.lane.b32.xlu1 %v6609_v22, %s6766_s29 }
 0x822   : > { %4613 = vrot.lane.b32.xlu0 %v4610_v3, %s6767_s12 }
 0x825   : > { %6615 = vrot.lane.b32.xlu1 %v6614_v23, %s6777_s27 }
 0x826   : > { %4636 = vrot.lane.b32.xlu0 %v4633_v40, %s6766_s29 }
 0x829   : > { %4615 = vrot.lane.b32.xlu1 %v4612_v46, %s6767_s12 }
 0x82a   : > { %4626 = vrot.lane.b32.xlu0 %v4623_v41, %s6774_s26 }
 0x82d   : > { %4638 = vrot.lane.b32.xlu1 %v4635_v15, %s6766_s29 }
 0x82e   : > { %4649 = vrot.lane.b32.xlu0 %v4646_v10, %s6775_s30  ;;  %s5948_s30 = sshll.u32 %s6856_s17, 10 }
 0x82f   : > { %s9599_s21 = scalar_lea.hbm %s9660_s10, %s5948_s30 }
 0x831   : > { %4585 = vrot.lane.b32.xlu1 %v4582_v20, %s6776_s25 }
 0x880   : > { %v6591_v25 = vpop.permute.xlu0 %6590 }
 0x881   : > { %v6592_v54 = vunpack.i.l.bf16 %v6591_v25  ;;  %v6593_v44 = vunpack.i.h.bf16 %v6591_v25 }
 0x883   : > { %v6596_v50 = vpop.permute.xlu1 %6595  ;;  %v4654_v58 = vsel %vm4653_vm0, %v9055_v43, %v6592_v54  ;;  %v4655_v17 = vsel %vm4653_vm0, %v9037_v45, %v6593_v44 }
 0x884   : > { %v4603_v6 = vpop.permute.xlu0 %4602  ;;  %v6597_v60 = vunpack.i.l.bf16 %v6596_v50  ;;  %v6598_v22 = vunpack.i.h.bf16 %v6596_v50 }
 0x885   : > { %v4671_v18 = vsel %vm4653_vm0, %v4592_v30, %v4603_v6 }
 0x887   : > { %v6601_v27 = vpop.permute.xlu1 %6600 }
 0x888   : > { %v4625_v29 = vpop.permute.xlu0 %4624  ;;  %v6602_v28 = vunpack.i.l.bf16 %v6601_v27  ;;  %v6603_v23 = vunpack.i.h.bf16 %v6601_v27 }
 0x88b   : > { %v4648_v1 = vpop.permute.xlu1 %4647 }
 0x88c   : > { %v4605_v11 = vpop.permute.xlu0 %4604 }
 0x88d   : > { %v4672_v37 = vsel %vm4653_vm0, %v9081_v4, %v4605_v11  ;;  %v4815_v11 = vsub.s32 1, %v8240_v49 }
 0x88f   : > { %v6606_v48 = vpop.permute.xlu1 %6605 }
 0x890   : > { %v6607_v63 = vunpack.i.l.bf16 %v6606_v48  ;;  %v4584_v56 = vpop.permute.xlu0 %4583  ;;  %v6608_v47 = vunpack.i.h.bf16 %v6606_v48  ;;  %v4826_v48 = vsub.s32 2, %v8240_v49 }
 0x892   : > { %v4656_v52 = vsel %vm973_vm5, %v4654_v58, %v6607_v63  ;;  %v4657_v61 = vsel %vm973_vm5, %v4655_v17, %v6608_v47 }
 0x893   : > { %v6611_v21 = vpop.permute.xlu1 %6610  ;;  %v4659_v2 = vsel %vm4658_vm1, %v4656_v52, %v6597_v60  ;;  %v4660_v45 = vsel %vm4658_vm1, %v4657_v61, %v6598_v22  ;;  %v4848_v52 = vsub.s32 4, %v8240_v49  ;;  %v9738_v22 = vld [vmem:[#allocation15_spill] sm:$0xff] }
 0x894   : > { %v6612_v36 = vunpack.i.l.bf16 %v6611_v21  ;;  %v4614_v38 = vpop.permute.xlu0 %4613  ;;  %v6613_v53 = vunpack.i.h.bf16 %v6611_v21  ;;  %v4859_v21 = vsub.s32 5, %v8240_v49 }
 0x895   : > { %v4673_v57 = vsel %vm973_vm5, %v4671_v18, %v4614_v38 }
 0x896   : > { %v4661_v43 = vsel %vm1006_vm6, %v4659_v2, %v6612_v36  ;;  %v4675_v62 = vsel %vm4658_vm1, %v4673_v57, %v4625_v29  ;;  %v4662_v31 = vsel %vm1006_vm6, %v4660_v45, %v6613_v53  ;;  %v9737_v29 = vld [vmem:[#allocation5_spill] sm:$0xff]  ;;  %v4870_v36 = vsub.s32 6, %v8240_v49 }
 0x897   : > { %v6616_v14 = vpop.permute.xlu1 %6615  ;;  %v4664_v19 = vsel %vm4663_vm2, %v4661_v43, %v6602_v28  ;;  %v4665_v26 = vsel %vm4663_vm2, %v4662_v31, %v6603_v23  ;;  %v4881_v2 = vsub.s32 7, %v8240_v49  ;;  %v9740_v31 = vld [vmem:[#allocation13_spill] sm:$0xff]  ;;  %v9741_v23 = vld [vmem:[#allocation10_spill] sm:$0xff] }
 0x898   : > { %v6617_v7 = vunpack.i.l.bf16 %v6616_v14  ;;  %v4637_v13 = vpop.permute.xlu0 %4636  ;;  %v6618_v3 = vunpack.i.h.bf16 %v6616_v14 }
 0x899   : > { %v4677_v8 = vsel %vm1006_vm6, %v4675_v62, %v4637_v13 }
 0x89a   : > { %v4666_v34 = vsel %vm1100_vm7, %v4664_v19, %v6617_v7  ;;  %v4679_v32 = vsel %vm4663_vm2, %v4677_v8, %v4648_v1  ;;  %v4667_v12 = vsel %vm1100_vm7, %v4665_v26, %v6618_v3  ;;  %v9743_v26 = vld [vmem:[#allocation9_spill] sm:$0xff] }
 0x89b   : > { %5938 = vmatprep.mubr.msk.f32.mxu0 %vm1100_vm7, %v4679_v32  ;;  %v4616_v33 = vpop.permute.xlu1 %4615  ;;  %v4669_v9 = vsel %vm4668_vm3, %v4666_v34, %v4584_v56  ;;  %v4837_v56 = vsub.s32 3, %v8240_v49 }
 0x89c   : > { %v4674_v5 = vsel %vm973_vm5, %v4672_v37, %v4616_v33  ;;  %v4627_v59 = vpop.permute.xlu0 %4626  ;;  %4780 = vmatmul.mubr.f32.vlgmr.msra.gmra.mrb[32].mxu0 %v4669_v9 }
 0x89d   : > { %v4676_v4 = vsel %vm4658_vm1, %v4674_v5, %v4627_v59  ;;  %v9739_v59 = vld [vmem:[#allocation11_spill] sm:$0xff] }
 0x89f   : > { %v4639_v39 = vpop.permute.xlu1 %4638 }
 0x8a0   : > { %v4678_v55 = vsel %vm1006_vm6, %v4676_v4, %v4639_v39  ;;  %v4650_v42 = vpop.permute.xlu0 %4649 }
 0x8a1   : > { %v4680_v40 = vsel %vm4663_vm2, %v4678_v55, %v4650_v42  ;;  %v9742_v42 = vld [vmem:[#allocation6_spill] sm:$0xff] }
 0x8a2   : > { %5939 = vmatprep.mubr.msk.f32.mxu0 %vm1100_vm7, %v4680_v40 }
 0x8a3   : > { %v4586_v46 = vpop.permute.xlu1 %4585 }
 0x8a4   : > { %v4670_v41 = vsel %vm4668_vm3, %v4667_v12, %v4586_v46  ;;  %v9744_v12 = vld [vmem:[#allocation8_spill] sm:$0xff] }
 0x8a5   : > { %4785 = vmatmul.mubr.f32.gmra.mrb[34].mxu0 %v4670_v41 }
 0x96f   : > { %v4781_v0 = vpop.f32.mrb[32].mxu0 }
 0x970   : > { %v5940_v15 = vmul.f32 -1.442695, %v4781_v0  ;;  %v4783_v16 = vpop.f32.mrb[33].mxu0  ;;  %v6669_v0 = vld [vmem:[%s6894_s18 + $0x38] sm:$0xff] }
 0x971   : > { %v9745_v16 = vld [vmem:[#allocation7_spill] sm:$0xff] }
 0x972   : > { %6661 = vpow2.f32 %v5940_v15 }
 0x978   : > { %v4786_v10 = vpop.f32.mrb[34].mxu0 }
 0x979   : > { %v4788_v20 = vpop.f32.mrb[35].mxu0  ;;  %v5941_v6 = vmul.f32 -1.442695, %v4786_v10 }
 0x97a   : > { %v6670_v20 = vld [vmem:[%s6894_s18 + $0x18] sm:$0xff] }
 0x97c   : > { %v6662_v25 = vpop.eup %6661 }
 0x97d   : > { %v4796_v50 = vadd.f32 1.0, %v6662_v25 }
 0x97f   : > { %6663 = vrcp.f32 %v4796_v50  ;;  %v6671_v50 = vld [vmem:[%s6894_s18 + $0x28] sm:$0xff] }
 0x980   : > { %6665 = vpow2.f32 %v5941_v6 }
 0x989   : > { %v6664_v27 = vpop.eup %6663 }
 0x98a   : > { %v4805_v1 = vrot.slane %v6664_v27, %v9737_v29  ;;  %v4816_v54 = vrot.slane %v6664_v27, %v4815_v11  ;;  %v4827_v63 = vrot.slane %v6664_v27, %v4826_v48  ;;  %v6666_v35 = vpop.eup %6665  ;;  %v4838_v58 = vrot.slane %v6664_v27, %v4837_v56 }
 0x98b   : > { %v4797_v60 = vadd.f32 1.0, %v6666_v35  ;;  %v4849_v30 = vrot.slane %v6664_v27, %v4848_v52  ;;  %v4860_v18 = vrot.slane %v6664_v27, %v4859_v21  ;;  %v4871_v38 = vrot.slane %v6664_v27, %v4870_v36  ;;  %v9748_v35 = vld [vmem:[#allocation16_spill] sm:$0xff] }
 0x98c   : > { %4811 = vbcast.lane.b32.xlu1 %v4805_v1, 264  ;;  %4807 = vbcast.lane.b32.xlu0 %v4805_v1, 256  ;;  %v4882_v57 = vrot.slane %v6664_v27, %v4881_v2  ;;  %v6672_v1 = vld [vmem:[%s6894_s18 + $0x30] sm:$0xff] }
 0x98d   : > { %6667 = vrcp.f32 %v4797_v60 }
 0x990   : > { %4822 = vbcast.lane.b32.xlu1 %v4816_v54, 264  ;;  %4818 = vbcast.lane.b32.xlu0 %v4816_v54, 256  ;;  %v9746_v54 = vld [vmem:[#allocation17_spill] sm:$0xff] }
 0x994   : > { %4833 = vbcast.lane.b32.xlu1 %v4827_v63, 264  ;;  %4829 = vbcast.lane.b32.xlu0 %v4827_v63, 256  ;;  %v9747_v63 = vld [vmem:[#allocation21_spill] sm:$0xff] }
 0x997   : > { %v6668_v44 = vpop.eup %6667 }
 0x998   : > { %4844 = vbcast.lane.b32.xlu1 %v4838_v58, 264  ;;  %4840 = vbcast.lane.b32.xlu0 %v4838_v58, 256  ;;  %v4893_v43 = vrot.slane %v6668_v44, %v9737_v29  ;;  %v4904_v28 = vrot.slane %v6668_v44, %v4815_v11  ;;  %v4915_v47 = vrot.slane %v6668_v44, %v4826_v48 }
 0x999   : > { %v4926_v14 = vrot.slane %v6668_v44, %v4837_v56  ;;  %v4937_v49 = vrot.slane %v6668_v44, %v4848_v52  ;;  %v4948_v7 = vrot.slane %v6668_v44, %v4859_v21  ;;  %v4959_v62 = vrot.slane %v6668_v44, %v4870_v36  ;;  %v6673_v52 = vld [vmem:[%s6894_s18 + $0x8] sm:$0xff] }
 0x99a   : > { %v4970_v13 = vrot.slane %v6668_v44, %v4881_v2  ;;  %v9749_v2 = vld [vmem:[#allocation12_spill] sm:$0xff]  ;;  %v9750_v44 = vld [vmem:[#allocation19_spill] sm:$0xff] }
 0x99c   : > { %4855 = vbcast.lane.b32.xlu1 %v4849_v30, 264  ;;  %4851 = vbcast.lane.b32.xlu0 %v4849_v30, 256  ;;  %v6674_v30 = vld [vmem:[%s6894_s18 + $0x10] sm:$0xff] }
 0x9a0   : > { %4866 = vbcast.lane.b32.xlu1 %v4860_v18, 264  ;;  %4862 = vbcast.lane.b32.xlu0 %v4860_v18, 256  ;;  %v6675_v18 = vld [vmem:[%s6894_s18 + $0x20] sm:$0xff] }
 0x9a4   : > { %4877 = vbcast.lane.b32.xlu1 %v4871_v38, 264  ;;  %4873 = vbcast.lane.b32.xlu0 %v4871_v38, 256 }
 0x9a8   : > { %4888 = vbcast.lane.b32.xlu1 %v4882_v57, 264  ;;  %4884 = vbcast.lane.b32.xlu0 %v4882_v57, 256 }
 0x9ac   : > { %4899 = vbcast.lane.b32.xlu1 %v4893_v43, 264  ;;  %4895 = vbcast.lane.b32.xlu0 %v4893_v43, 256 }
 0x9b0   : > { %4910 = vbcast.lane.b32.xlu1 %v4904_v28, 264  ;;  %4906 = vbcast.lane.b32.xlu0 %v4904_v28, 256  ;;  %v6676_v28 = vld [vmem:[%s6894_s18 + $0x68] sm:$0xff] }
 0x9b4   : > { %4921 = vbcast.lane.b32.xlu1 %v4915_v47, 264  ;;  %4917 = vbcast.lane.b32.xlu0 %v4915_v47, 256 }
 0x9b8   : > { %4932 = vbcast.lane.b32.xlu1 %v4926_v14, 264  ;;  %4928 = vbcast.lane.b32.xlu0 %v4926_v14, 256  ;;  %v6677_v14 = vld [vmem:[%s6894_s18] sm:$0xff] }
 0x9bc   : > { %4943 = vbcast.lane.b32.xlu1 %v4937_v49, 264  ;;  %4939 = vbcast.lane.b32.xlu0 %v4937_v49, 256 }
 0x9c0   : > { %4954 = vbcast.lane.b32.xlu1 %v4948_v7, 264  ;;  %4950 = vbcast.lane.b32.xlu0 %v4948_v7, 256  ;;  %v9751_v7 = vld [vmem:[#allocation14_spill] sm:$0xff] }
 0x9c4   : > { %4965 = vbcast.lane.b32.xlu1 %v4959_v62, 264  ;;  %4961 = vbcast.lane.b32.xlu0 %v4959_v62, 256 }
 0x9c8   : > { %4976 = vbcast.lane.b32.xlu1 %v4970_v13, 264  ;;  %4972 = vbcast.lane.b32.xlu0 %v4970_v13, 256 }
 0x9fe   : > { %v4812_v19 = vpop.permute.xlu1 %4811  ;;  %v4808_v8 = vpop.permute.xlu0 %4807 }
 0x9ff   : > { %v4979_v40 = vmul.f32 %v4812_v19, %v9742_v42  ;;  %v4978_v10 = vmul.f32 %v4808_v8, %v9745_v16 }
 0xa01   : > { %v5011_v60 = vadd.f32 %v6673_v52, %v4979_v40  ;;  %v9224_v49 = vadd.f32 %v6677_v14, %v4978_v10 }
 0xa02   : > { %v4823_v17 = vpop.permute.xlu1 %4822  ;;  %v4819_v34 = vpop.permute.xlu0 %4818 }
 0xa03   : > { %v4981_v45 = vmul.f32 %v4823_v17, %v9739_v59  ;;  %v4980_v46 = vmul.f32 %v4819_v34, %v9743_v26  ;;  %v6678_v34 = vld [vmem:[%s6894_s18 + $0x48] sm:$0xff]  ;;  %v6683_v26 = vld [vmem:[%s6894_s18 + $0x78] sm:$0xff] }
 0xa05   : > { %v5013_v25 = vadd.f32 %v6670_v20, %v4981_v45  ;;  %v9214_v21 = vadd.f32 %v6674_v30, %v4980_v46 }
 0xa06   : > { %v4834_v32 = vpop.permute.xlu1 %4833  ;;  %v4830_v37 = vpop.permute.xlu0 %4829 }
 0xa07   : > { %v4983_v3 = vmul.f32 %v4834_v32, %v9740_v31  ;;  %v4982_v41 = vmul.f32 %v4830_v37, %v9744_v12  ;;  %v6679_v37 = vld [vmem:[%s6894_s18 + $0x60] sm:$0xff]  ;;  %v6684_v12 = vld [vmem:[%s6894_s18 + $0x70] sm:$0xff] }
 0xa08   : > { %v6680_v31 = vld [vmem:[%s6894_s18 + $0x40] sm:$0xff] }
 0xa09   : > { %v9204_v6 = vadd.f32 %v6671_v50, %v4983_v3  ;;  %v9217_v36 = vadd.f32 %v6675_v18, %v4982_v41 }
 0xa0a   : > { %v4845_v61 = vpop.permute.xlu1 %4844  ;;  %v4841_v53 = vpop.permute.xlu0 %4840 }
 0xa0b   : > { %v4985_v5 = vmul.f32 %v4845_v61, %v9738_v22  ;;  %v4984_v55 = vmul.f32 %v4841_v53, %v9741_v23  ;;  %v5314_v8 = vcombine.low %v5011_v60, %v9204_v6  ;;  %v5042_v53 = vcombine.low %v9224_v49, %v9217_v36 }
 0xa0c   : > { %v5315_v16 = vcombine.high %v5011_v60, %v9204_v6 }
 0xa0d   : > { %v9199_v15 = vadd.f32 %v6669_v0, %v4985_v5  ;;  %v9207_v11 = vadd.f32 %v6672_v1, %v4984_v55  ;;  %v9753_v5 = vld [vmem:[#allocation18_spill] sm:$0xff]  ;;  %v6682_v55 = vld [vmem:[%s6894_s18 + $0x50] sm:$0xff]  ;;  %v9251_v10 = vrot.slane %v5314_v8, %v8808_v51  ;;  %v5050_v50 = vrot.slane %v5042_v53, %v8808_v51 }
 0xa0e   : > { %v4856_v33 = vpop.permute.xlu1 %4855  ;;  %v4852_v9 = vpop.permute.xlu0 %4851 }
 0xa0f   : > { %v4987_v48 = vmul.f32 %v4856_v33, %v9746_v54  ;;  %v5330_v38 = vcombine.low %v5013_v25, %v9199_v15  ;;  %v4986_v57 = vmul.f32 %v4852_v9, %v9749_v2  ;;  %v5058_v17 = vcombine.low %v9214_v21, %v9207_v11  ;;  %v9752_v9 = vld [vmem:[#allocation23_spill] sm:$0xff] }
 0xa10   : > { %v5331_v33 = vcombine.high %v5013_v25, %v9199_v15  ;;  %v5059_v6 = vcombine.high %v9214_v21, %v9207_v11 }
 0xa11   : > { %v5019_v32 = vadd.f32 %v6678_v34, %v4987_v48  ;;  %v9238_v45 = vrot.slane %v5330_v38, %v8808_v51  ;;  %v5018_v3 = vadd.f32 %v6680_v31, %v4986_v57  ;;  %v5066_v20 = vrot.slane %v5058_v17, %v8808_v51 }
 0xa12   : > { %v4867_v4 = vpop.permute.xlu1 %4866  ;;  %v4863_v39 = vpop.permute.xlu0 %4862  ;;  %v9256_v54 = vrot.slane %v5331_v33, %v8808_v51  ;;  %v9279_v38 = vrot.slane %v5315_v16, %v8808_v51 }
 0xa13   : > { %v4989_v43 = vmul.f32 %v4867_v4, %v9750_v44  ;;  %v4988_v62 = vmul.f32 %v4863_v39, %v9751_v7  ;;  %v6681_v4 = vld [vmem:[%s6894_s18 + $0x58] sm:$0xff]  ;;  %v5378_v48 = vcombine.low %v9251_v10, %v9238_v45  ;;  %v5106_v18 = vcombine.low %v5050_v50, %v5066_v20 }
 0xa14   : > { %v5043_v44 = vcombine.high %v9224_v49, %v9217_v36  ;;  %v5394_v14 = vcombine.low %v9279_v38, %v9256_v54  ;;  %v5073_v7 = vrot.slane %v5059_v6, %v8808_v51  ;;  %v5107_v17 = vcombine.high %v5050_v50, %v5066_v20 }
 0xa15   : > { %v5021_v39 = vadd.f32 %v6681_v4, %v4989_v43  ;;  %v5020_v42 = vadd.f32 %v6682_v55, %v4988_v62  ;;  %v9298_v36 = vrot.slane %v5106_v18, %v8825_v24  ;;  %v9754_v55 = vld [vmem:[#allocation29_spill] sm:$0xff]  ;;  %v5395_v20 = vcombine.high %v9279_v38, %v9256_v54 }
 0xa16   : > { %v4878_v27 = vpop.permute.xlu1 %4877  ;;  %v4874_v29 = vpop.permute.xlu0 %4873  ;;  %v5121_v4 = vrot.slane %v5107_v17, %v8825_v24  ;;  %v6688_v17 = vld [vmem:[%s6894_s18 + $0x80] sm:$0xff] }
 0xa17   : > { %v4991_v56 = vmul.f32 %v4878_v27, %v9747_v63  ;;  %v4990_v58 = vmul.f32 %v4874_v29, %v9748_v35 }
 0xa19   : > { %v5023_v47 = vadd.f32 %v6676_v28, %v4991_v56  ;;  %v5022_v61 = vadd.f32 %v6679_v37, %v4990_v58 }
 0xa1a   : > { %v4889_v13 = vpop.permute.xlu1 %4888  ;;  %v4885_v19 = vpop.permute.xlu0 %4884 }
 0xa1b   : > { %v4993_v22 = vmul.f32 %v4889_v13, %v9752_v9  ;;  %v4992_v59 = vmul.f32 %v4885_v19, %v9753_v5  ;;  %v5346_v23 = vcombine.low %v5019_v32, %v5023_v47  ;;  %v5347_v40 = vcombine.high %v5019_v32, %v5023_v47 }
 0xa1c   : > { %v5074_v25 = vcombine.low %v5018_v3, %v5022_v61  ;;  %v5075_v43 = vcombine.high %v5018_v3, %v5022_v61  ;;  %v9291_v19 = vrot.slane %v5378_v48, %v8825_v24  ;;  %v5057_v61 = vrot.slane %v5043_v44, %v8808_v51 }
 0xa1d   : > { %v5025_v46 = vadd.f32 %v6683_v26, %v4993_v22  ;;  %v5024_v41 = vadd.f32 %v6684_v12, %v4992_v59  ;;  %v9263_v63 = vrot.slane %v5346_v23, %v8808_v51  ;;  %v9266_v56 = vrot.slane %v5347_v40, %v8808_v51 }
 0xa1e   : > { %v9245_v0 = vpop.permute.xlu1 %4899  ;;  %v9247_v15 = vpop.permute.xlu0 %4895  ;;  %v5082_v11 = vrot.slane %v5074_v25, %v8808_v51  ;;  %v5089_v53 = vrot.slane %v5075_v43, %v8808_v51  ;;  %v9315_v59 = vrot.slane %v5394_v14, %v8825_v24  ;;  %v5122_v31 = vcombine.low %v5057_v61, %v5073_v7  ;;  %v9756_v25 = vld [vmem:[#allocation25_spill] sm:$0xff]  ;;  %v9760_v14 = vld [vmem:[#allocation26_spill] sm:$0xff] }
 0xa1f   : > { %v5362_v27 = vcombine.low %v5021_v39, %v5025_v46  ;;  %v5363_v29 = vcombine.high %v5021_v39, %v5025_v46  ;;  %v5090_v1 = vcombine.low %v5020_v42, %v5024_v41  ;;  %v5091_v21 = vcombine.high %v5020_v42, %v5024_v41  ;;  %v9755_v46 = vld [vmem:[#allocation24_spill] sm:$0xff] }
 0xa20   : > { %v5123_v39 = vcombine.high %v5057_v61, %v5073_v7  ;;  %v5379_v26 = vcombine.high %v9251_v10, %v9238_v45  ;;  %v4995_v50 = vmul.f32 %v9245_v0, %v9756_v25  ;;  %v6685_v0 = vld [vmem:[%s6894_s18 + $0xa8] sm:$0xff] }
 0xa21   : > { %v9269_v35 = vrot.slane %v5362_v27, %v8808_v51  ;;  %v9272_v58 = vrot.slane %v5363_v29, %v8808_v51  ;;  %v5098_v52 = vrot.slane %v5090_v1, %v8808_v51  ;;  %v5105_v34 = vrot.slane %v5091_v21, %v8808_v51  ;;  %v9757_v1 = vld [vmem:[#allocation20_spill] sm:$0xff]  ;;  %v9758_v21 = vld [vmem:[#allocation27_spill] sm:$0xff] }
 0xa22   : > { %v4911_v60 = vpop.permute.xlu1 %4910  ;;  %v9275_v30 = vpop.permute.xlu0 %4906  ;;  %v9332_v27 = vrot.slane %v5122_v31, %v8825_v24  ;;  %v4994_v48 = vmul.f32 %v9247_v15, %v9757_v1  ;;  %v9342_v54 = vrot.slane %v5123_v39, %v8825_v24  ;;  %v9355_v43 = vrot.slane %v5379_v26, %v8825_v24 }
 0xa23   : > { %v5410_v2 = vcombine.low %v9263_v63, %v9269_v35  ;;  %v5426_v57 = vcombine.low %v9266_v56, %v9272_v58  ;;  %v5138_v28 = vcombine.low %v5082_v11, %v5098_v52  ;;  %v5139_v47 = vcombine.high %v5082_v11, %v5098_v52 }
 0xa24   : > { %v5154_v3 = vcombine.low %v5089_v53, %v5105_v34  ;;  %v5411_v10 = vcombine.high %v9263_v63, %v9269_v35  ;;  %v5155_v29 = vcombine.high %v5089_v53, %v5105_v34  ;;  %v4997_v63 = vmul.f32 %v4911_v60, %v9758_v21  ;;  %v6686_v35 = vld [vmem:[%s6894_s18 + $0xa0] sm:$0xff] }
 0xa25   : > { %v9294_v8 = vrot.slane %v5410_v2, %v8825_v24  ;;  %v9301_v49 = vrot.slane %v5138_v28, %v8825_v24  ;;  %v9306_v37 = vrot.slane %v5426_v57, %v8825_v24  ;;  %v5153_v9 = vrot.slane %v5139_v47, %v8825_v24  ;;  %v9759_v2 = vld [vmem:[#allocation31_spill] sm:$0xff]  ;;  %v6687_v28 = vld [vmem:[%s6894_s18 + $0x88] sm:$0xff] }
 0xa26   : > { %v4922_v62 = vpop.permute.xlu1 %4921  ;;  %v4918_v13 = vpop.permute.xlu0 %4917  ;;  %v9335_v45 = vrot.slane %v5154_v3, %v8825_v24  ;;  %v5027_v47 = vadd.f32 %v6687_v28, %v4995_v50  ;;  %v9367_v34 = vadd.f32 %v6688_v17, %v4994_v48  ;;  %v9372_v53 = vrot.slane %v5155_v29, %v8825_v24  ;;  %v6690_v3 = vld [vmem:[%s6894_s18 + $0xb8] sm:$0xff]  ;;  %v6692_v50 = vld [vmem:[%s6894_s18 + $0x90] sm:$0xff]  ;;  %v9767_v28 = vld [vmem:[#allocation30_spill] sm:$0xff] }
 0xa27   : > { %v5443_v32 = vcombine.high %v9291_v19, %v9294_v8  ;;  %v5171_v33 = vcombine.high %v9298_v36, %v9301_v49  ;;  %v5447_v23 = vcombine.high %v9315_v59, %v9306_v37  ;;  %v4999_v42 = vmul.f32 %v4922_v62, %v9754_v55  ;;  %v6691_v55 = vld [vmem:[%s6894_s18 + $0xb0] sm:$0xff]  ;;  %v6694_v17 = vld [vmem:[%s6894_s18 + $0xc8] sm:$0xff] }
 0xa28   : > { %v5172_v40 = vcombine.low %v5121_v4, %v5153_v9  ;;  %v4998_v12 = vmul.f32 %v4918_v13, %v9755_v46  ;;  %v5173_v52 = vcombine.high %v5121_v4, %v5153_v9  ;;  %v5442_v18 = vcombine.low %v9291_v19, %v9294_v8  ;;  %v9763_v46 = vld [vmem:[#allocation36_spill] sm:$0xff] }
 0xa29   : > { %5636 = vrot.lane.b32.xlu1 %v5443_v32, %s6767_s12  ;;  %5588 = vrot.lane.b32.xlu0 %v5171_v33, %s6767_s12  ;;  %v5031_v6 = vadd.f32 %v6685_v0, %v4999_v42  ;;  %v5170_v11 = vcombine.low %v9298_v36, %v9301_v49  ;;  %v5446_v60 = vcombine.low %v9315_v59, %v9306_v37  ;;  %v9761_v32 = vld [vmem:[#allocation22_spill] sm:$0xff]  ;;  %v9765_v0 = vld [vmem:[#allocation28_spill] sm:$0xff] }
 0xa2a   : > { %v4933_v22 = vpop.permute.xlu1 %4932  ;;  %v4929_v5 = vpop.permute.xlu0 %4928  ;;  %v9351_v38 = vadd.f32 %v6686_v35, %v4998_v12  ;;  %v5174_v62 = vcombine.low %v9332_v27, %v9335_v45  ;;  %v5427_v13 = vcombine.high %v9266_v56, %v9272_v58  ;;  %v4996_v61 = vmul.f32 %v9275_v30, %v9761_v32  ;;  %v6689_v58 = vld [vmem:[%s6894_s18 + $0x98] sm:$0xff]  ;;  %v6695_v32 = vld [vmem:[%s6894_s18 + $0xe0] sm:$0xff] }
 0xa2b   : > { %v5001_v15 = vmul.f32 %v4933_v22, %v9759_v2  ;;  %v5000_v7 = vmul.f32 %v4929_v5, %v9760_v14  ;;  %v5450_v33 = vcombine.low %v5027_v47, %v5031_v6  ;;  %v5175_v9 = vcombine.high %v9332_v27, %v9335_v45  ;;  %v9766_v2 = vld [vmem:[#allocation35_spill] sm:$0xff] }
 0xa2c   : > { %v9377_v22 = vrot.slane %v5411_v10, %v8825_v24  ;;  %v9380_v56 = vrot.slane %v5395_v20, %v8825_v24  ;;  %v9383_v5 = vadd.f32 %v6689_v58, %v4997_v63  ;;  %v5451_v31 = vcombine.high %v5027_v47, %v5031_v6  ;;  %v9764_v20 = vld [vmem:[#allocation32_spill] sm:$0xff] }
 0xa2d   : > { %5660 = vrot.lane.b32.xlu1 %v5447_v23, %s6767_s12  ;;  %5596 = vrot.lane.b32.xlu0 %v5172_v40, %s6766_s29  ;;  %v5178_v30 = vcombine.low %v9367_v34, %v9351_v38  ;;  %v5033_v4 = vadd.f32 %v6690_v3, %v5001_v15  ;;  %v5032_v42 = vadd.f32 %v6691_v55, %v5000_v7  ;;  %v9762_v40 = vld [vmem:[#allocation33_spill] sm:$0xff] }
 0xa2e   : > { %v4944_v41 = vpop.permute.xlu1 %4943  ;;  %v4940_v16 = vpop.permute.xlu0 %4939  ;;  %v5028_v10 = vadd.f32 %v6692_v50, %v4996_v61  ;;  %v5179_v29 = vcombine.high %v9367_v34, %v9351_v38  ;;  %v5176_v1 = vcombine.low %v9342_v54, %v9372_v53  ;;  %v9399_v48 = vrot.slane %v5427_v13, %v8825_v24  ;;  %v6696_v3 = vld [vmem:[%s6894_s18 + $0xc0] sm:$0xff]  ;;  %v6700_v50 = vld [vmem:[%s6894_s18 + $0xf0] sm:$0xff] }
 0xa2f   : > { %v5003_v26 = vmul.f32 %v4944_v41, %v9762_v40  ;;  %v9402_v41 = vrot.slane %v5450_v33, %v8808_v51  ;;  %v5002_v6 = vmul.f32 %v4940_v16, %v9765_v0  ;;  %v5444_v63 = vcombine.low %v9355_v43, %v9377_v22  ;;  %v9768_v33 = vld [vmem:[#allocation37_spill] sm:$0xff]  ;;  %v6697_v40 = vld [vmem:[%s6894_s18 + $0xd8] sm:$0xff] }
 0xa30   : > { %v9409_v35 = vrot.slane %v5451_v31, %v8808_v51  ;;  %v9412_v38 = vrot.slane %v5178_v30, %v8808_v51  ;;  %v5466_v16 = vcombine.low %v9383_v5, %v5033_v4  ;;  %v5194_v13 = vcombine.low %v5028_v10, %v5032_v42 }
 0xa31   : > { %5604 = vrot.lane.b32.xlu0 %v5173_v52, %s6777_s27  ;;  %v6693_v52 = vld [vmem:[%s6894_s18 + $0xe8] sm:$0xff]  ;;  %v5035_v34 = vadd.f32 %v6694_v17, %v5003_v26  ;;  %v5448_v31 = vcombine.low %v9380_v56, %v9399_v48  ;;  %v5195_v30 = vcombine.high %v5028_v10, %v5032_v42 }
 0xa32   : > { %v4955_v57 = vpop.permute.xlu1 %4954  ;;  %v4951_v44 = vpop.permute.xlu0 %4950 }
 0xa33   : > { %v5005_v15 = vmul.f32 %v4955_v57, %v9766_v2  ;;  %v5004_v47 = vmul.f32 %v4951_v44, %v9767_v28  ;;  %v5467_v57 = vcombine.high %v9383_v5, %v5033_v4  ;;  %v9769_v44 = vld [vmem:[#allocation34_spill] sm:$0xff]  ;;  %v9431_v4 = vrot.slane %v5466_v16, %v8808_v51 }
 0xa35   : > { %5612 = vrot.lane.b32.xlu0 %v5175_v9, %s6767_s12  ;;  %v5037_v26 = vadd.f32 %v6697_v40, %v5005_v15  ;;  %v9436_v2 = vrot.slane %v5467_v57, %v8808_v51  ;;  %v5209_v15 = vrot.slane %v5195_v30, %v8808_v51 }
 0xa36   : > { %v4966_v39 = vpop.permute.xlu1 %4965  ;;  %v4962_v23 = vpop.permute.xlu0 %4961 }
 0xa37   : > { %v5007_v12 = vmul.f32 %v4966_v39, %v9763_v46  ;;  %v5006_v25 = vmul.f32 %v4962_v23, %v9764_v20  ;;  %v5034_v39 = vadd.f32 %v6696_v3, %v5002_v6  ;;  %v6698_v46 = vld [vmem:[%s6894_s18 + $0xd0] sm:$0xff]  ;;  %v6699_v20 = vld [vmem:[%s6894_s18 + $0xf8] sm:$0xff]  ;;  %s350_s18 = sand.u32 1, %s6755_s14  }
 0xa38   : > { %s5794_s26 = sshll.u32 %s350_s18, 6  ;;  %s9608_s17 = scalar_lea.sflag [#allocation3], %s350_s18 }
 0xa39   : > { %v5039_v21 = vadd.f32 %v6693_v52, %v5007_v12  ;;  %v5038_v61 = vadd.f32 %v6695_v32, %v5006_v25  ;;  %5620 = vrot.lane.b32.xlu0 %v5176_v1, %s6766_s29  ;;  %v5036_v12 = vadd.f32 %v6698_v46, %v5004_v47  ;;  %v5202_v1 = vrot.slane %v5194_v13, %v8808_v51 }
 0xa3a   : > { %v4977_v14 = vpop.permute.xlu1 %4976  ;;  %v4973_v7 = vpop.permute.xlu0 %4972  ;;  %v5193_v13 = vrot.slane %v5179_v29, %v8808_v51  ;;  %v5530_v29 = vcombine.low %v9409_v35, %v9436_v2 }
 0xa3b   : > { %v5009_v9 = vmul.f32 %v4977_v14, %v9768_v33  ;;  %v5008_v58 = vmul.f32 %v4973_v7, %v9769_v44  ;;  %v5482_v23 = vcombine.low %v5035_v34, %v5039_v21  ;;  %v5483_v55 = vcombine.high %v5035_v34, %v5039_v21 }
 0xa3c   : > { %v5210_v0 = vcombine.low %v5034_v39, %v5038_v61  ;;  %v5211_v52 = vcombine.high %v5034_v39, %v5038_v61  ;;  %v5242_v17 = vcombine.low %v9412_v38, %v5202_v1  ;;  %v5514_v61 = vcombine.low %v9402_v41, %v9431_v4 }
 0xa3d   : > { %v5041_v25 = vadd.f32 %v6699_v20, %v5009_v9  ;;  %v5040_v5 = vadd.f32 %v6700_v50, %v5008_v58  ;;  %5644 = vrot.lane.b32.xlu0 %v5444_v63, %s6766_s29  ;;  %v5490_v28 = vrot.slane %v5482_v23, %v8808_v51  ;;  %v9441_v47 = vrot.slane %v5483_v55, %v8808_v51 }
 0xa3e   : > { %v5218_v34 = vrot.slane %v5210_v0, %v8808_v51  ;;  %v5225_v32 = vrot.slane %v5211_v52, %v8808_v51  ;;  %v5177_v9 = vcombine.high %v9342_v54, %v9372_v53  ;;  %v5258_v3 = vcombine.low %v5193_v13, %v5209_v15 }
 0xa3f   : > { %v5498_v42 = vcombine.low %v5037_v26, %v5041_v25  ;;  %v5499_v10 = vcombine.high %v5037_v26, %v5041_v25  ;;  %v5226_v6 = vcombine.low %v5036_v12, %v5040_v5  ;;  %v5227_v21 = vcombine.high %v5036_v12, %v5040_v5 }
 0xa40   : > { %v5445_v53 = vcombine.high %v9355_v43, %v9377_v22  ;;  %v9484_v40 = vrot.slane %v5514_v61, %v8825_v24  ;;  %v9488_v46 = vrot.slane %v5530_v29, %v8825_v24  ;;  %v9492_v20 = vrot.slane %v5258_v3, %v8825_v24 }
 0xa41   : > { %v5506_v14 = vrot.slane %v5498_v42, %v8808_v51  ;;  %v9445_v7 = vrot.slane %v5499_v10, %v8808_v51  ;;  %v5234_v63 = vrot.slane %v5226_v6, %v8808_v51  ;;  %v5241_v16 = vrot.slane %v5227_v21, %v8808_v51  ;;  %5668 = vrot.lane.b32.xlu0 %v5448_v31, %s6766_s29 }
 0xa42   : > { %v5243_v51 = vcombine.high %v9412_v38, %v5202_v1  ;;  %v9465_v31 = vrot.slane %v5242_v17, %v8825_v24  ;;  %v5259_v10 = vcombine.high %v5193_v13, %v5209_v15  ;;  %v5449_v21 = vcombine.high %v9380_v56, %v9399_v48 }
 0xa43   : > { %v5546_v57 = vcombine.low %v5490_v28, %v5506_v14  ;;  %v5562_v33 = vcombine.low %v9441_v47, %v9445_v7  ;;  %v5274_v44 = vcombine.low %v5218_v34, %v5234_v63  ;;  %v5275_v58 = vcombine.high %v5218_v34, %v5234_v63 }
 0xa44   : > { %v5290_v30 = vcombine.low %v5225_v32, %v5241_v16  ;;  %v5257_v12 = vrot.slane %v5243_v51, %v8825_v24  ;;  %v5291_v0 = vcombine.high %v5225_v32, %v5241_v16  ;;  %v5547_v6 = vcombine.high %v5490_v28, %v5506_v14 }
 0xa45   : > { %5628 = vrot.lane.b32.xlu0 %v5177_v9, %s6777_s27  ;;  %v9468_v39 = vrot.slane %v5274_v44, %v8825_v24  ;;  %v9471_v23 = vrot.slane %v5546_v57, %v8825_v24  ;;  %v9474_v54 = vrot.slane %v5562_v33, %v8825_v24  ;;  %v5289_v26 = vrot.slane %v5275_v58, %v8825_v24 }
 0xa46   : > { %v9479_v38 = vrot.slane %v5290_v30, %v8825_v24  ;;  %v5305_v17 = vrot.slane %v5291_v0, %v8825_v24  ;;  %v5515_v16 = vcombine.high %v9402_v41, %v9431_v4  ;;  %v5273_v15 = vrot.slane %v5259_v10, %v8825_v24 }
 0xa47   : > { %v5307_v55 = vcombine.high %v9465_v31, %v9468_v39  ;;  %v5306_v43 = vcombine.low %v9465_v31, %v9468_v39  ;;  %v5578_v22 = vcombine.low %v9484_v40, %v9471_v23  ;;  %v5582_v25 = vcombine.low %v9488_v46, %v9474_v54 }
 0xa48   : > { %v5310_v50 = vcombine.low %v9492_v20, %v9479_v38  ;;  %v5579_v5 = vcombine.high %v9484_v40, %v9471_v23  ;;  %v5308_v1 = vcombine.low %v5257_v12, %v5289_v26  ;;  %v5583_v52 = vcombine.high %v9488_v46, %v9474_v54 }
 0xa49   : > { %5652 = vrot.lane.b32.xlu0 %v5445_v53, %s6777_s27  ;;  %5590 = vrot.lane.b32.xlu1 %v5307_v55, %s6767_s12  ;;  %v5309_v42 = vcombine.high %v5257_v12, %v5289_v26  ;;  %v5311_v63 = vcombine.high %v9492_v20, %v9479_v38  ;;  %v5563_v28 = vcombine.high %v9441_v47, %v9445_v7 }
 0xa4a   : > { %v5312_v14 = vcombine.low %v5273_v15, %v5305_v17  ;;  %v5561_v56 = vrot.slane %v5547_v6, %v8825_v24  ;;  %v5531_v48 = vcombine.high %v9409_v35, %v9436_v2  ;;  %v5529_v41 = vrot.slane %v5515_v16, %v8825_v24 }
 0xa4b   : > { %v5577_v13 = vrot.slane %v5563_v28, %v8825_v24  ;;  %v5313_v7 = vcombine.high %v5273_v15, %v5305_v17 }
 0xa4c   : > { %v5580_v4 = vcombine.low %v5529_v41, %v5561_v56  ;;  %v5545_v34 = vrot.slane %v5531_v48, %v8825_v24  ;;  %v5581_v35 = vcombine.high %v5529_v41, %v5561_v56 }
 0xa4d   : > { %5638 = vrot.lane.b32.xlu0 %v5579_v5, %s6767_s12  ;;  %5598 = vrot.lane.b32.xlu1 %v5308_v1, %s6766_s29 }
 0xa4e   : > { %v5584_v47 = vcombine.low %v5545_v34, %v5577_v13  ;;  %v5585_v2 = vcombine.high %v5545_v34, %v5577_v13 }
 0xa51   : > { %5662 = vrot.lane.b32.xlu0 %v5583_v52, %s6767_s12  ;;  %5606 = vrot.lane.b32.xlu1 %v5309_v42, %s6777_s27 }
 0xa55   : > { %5676 = vrot.lane.b32.xlu0 %v5449_v21, %s6777_s27  ;;  %5614 = vrot.lane.b32.xlu1 %v5311_v63, %s6767_s12 }
 0xa59   : > { %5622 = vrot.lane.b32.xlu1 %v5312_v14, %s6766_s29 }
 0xa5d   : > { %5646 = vrot.lane.b32.xlu1 %v5580_v4, %s6766_s29 }
 0xa61   : > { %5670 = vrot.lane.b32.xlu1 %v5584_v47, %s6766_s29  ;;  %s9545_s29 = scalar_lea.vmem [#allocation2], %s5794_s26 }
 0xa62   : > { %s5728_s28 = sshll.u32 %s9545_s29, 4  ;;  %s9602_s28 = int_to_ptr.vmem [resolvable:$true] %s5728_s28 }
 0xa63   : > { %s6701_s25 = scalar_lea.vmem %s9602_s28, 1024 }
 0xa64   : > { %p6702_p11 = scmp.ne.s32.totalorder %s9602_s28, %s6701_s25 }
 0xa65   : > { %5630 = vrot.lane.b32.xlu1 %v5313_v7, %s6777_s27 }
 0xa66   : > { %p6703_p12 = pnand %p6702_p11, %p6873_p5 }
 0xa68   : > { %p6704_p13 = pneg %p6703_p12 }
 0xa69   : > { %5654 = vrot.lane.b32.xlu1 %v5581_v35, %s6777_s27 }
 0xa6d   : > { %5678 = vrot.lane.b32.xlu1 %v5585_v2, %s6777_s27  ;;  %s6778_s27 = smov [#allocation2]  }
 0xa6e   : > { %s6705_s26 = sshll.u32 %s6778_s27, 4  ;;  %s6706_s26 = int_to_ptr.vmem [resolvable:$false] %s6705_s26 }
 0xa6f   : > { %s6707_s30 = scalar_lea.vmem %s6706_s26, 2048  ;;  %p6708_p0 = scmp.lt.s32.totalorder %s9602_s28, %s6706_s26 }
 0xa70   : > { %p6709_p1 = scmp.lt.s32.totalorder %s6707_s30, %s6701_s25 }
 0xa72   : > { %p6710_p2 = por %p6709_p1, %p6708_p0 }
 0xa74   : > { %p6711_p3 = pnand %p6710_p2, %p6704_p13 }
 0xa9b   : > { %v5589_v32 = vpop.permute.xlu0 %5588  ;;  %v5637_v30 = vpop.permute.xlu1 %5636 }
 0xa9c   : > { %v5682_v24 = vsel %vm973_vm5, %v5170_v11, %v5589_v32  ;;  %v5694_v55 = vsel %vm973_vm5, %v5442_v18, %v5637_v30 }
 0xa9f   : > { %v5597_v61 = vpop.permute.xlu0 %5596  ;;  %v5661_v49 = vpop.permute.xlu1 %5660 }
 0xaa0   : > { %v5684_v57 = vsel %vm1006_vm6, %v5682_v24, %v5597_v61  ;;  %v5700_v52 = vsel %vm973_vm5, %v5446_v60, %v5661_v49 }
 0xaa3   : > { %v5605_v33 = vpop.permute.xlu0 %5604 }
 0xaa4   : > { %v5686_v9 = vsel %vm1100_vm7, %v5684_v57, %v5605_v33 }
 0xaa5   : > { %5706 = vst [vmem:[%s9545_s29] sm:$0xff] %v5686_v9 }
 0xaa7   : > { %v5613_v29 = vpop.permute.xlu0 %5612 }
 0xaa8   : > { %v5688_v36 = vsel %vm973_vm5, %v5174_v62, %v5613_v29 }
 0xaab   : > { %v5621_v44 = vpop.permute.xlu0 %5620 }
 0xaac   : > { %v5690_v11 = vsel %vm1006_vm6, %v5688_v36, %v5621_v44 }
 0xaaf   : > { %v5645_v58 = vpop.permute.xlu0 %5644 }
 0xab0   : > { %v5696_v26 = vsel %vm1006_vm6, %v5694_v55, %v5645_v58 }
 0xab3   : > { %v5669_v51 = vpop.permute.xlu0 %5668 }
 0xab4   : > { %v5702_v42 = vsel %vm1006_vm6, %v5700_v52, %v5669_v51 }
 0xab7   : > { %v5629_v3 = vpop.permute.xlu0 %5628 }
 0xab8   : > { %v5692_v53 = vsel %vm1100_vm7, %v5690_v11, %v5629_v3 }
 0xab9   : > { %5707 = vst [vmem:[%s9545_s29 + $0x8] sm:$0xff] %v5692_v53 }
 0xabb   : > { %v5591_v12 = vpop.permute.xlu1 %5590  ;;  %v5653_v5 = vpop.permute.xlu0 %5652 }
 0xabc   : > { %v5698_v27 = vsel %vm1100_vm7, %v5696_v26, %v5653_v5  ;;  %v5683_v1 = vsel %vm973_vm5, %v5306_v43, %v5591_v12 }
 0xabd   : > { %5708 = vst [vmem:[%s9545_s29 + $0x10] sm:$0xff] %v5698_v27 }
 0xabf   : > { %v5599_v45 = vpop.permute.xlu1 %5598  ;;  %v5639_v62 = vpop.permute.xlu0 %5638 }
 0xac0   : > { %v5685_v0 = vsel %vm1006_vm6, %v5683_v1, %v5599_v45  ;;  %v5695_v17 = vsel %vm973_vm5, %v5578_v22, %v5639_v62 }
 0xac3   : > { %v5607_v19 = vpop.permute.xlu1 %5606  ;;  %v5663_v8 = vpop.permute.xlu0 %5662 }
 0xac4   : > { %v5687_v18 = vsel %vm1100_vm7, %v5685_v0, %v5607_v19  ;;  %v5701_v20 = vsel %vm973_vm5, %v5582_v25, %v5663_v8 }
 0xac5   : > { %5710 = vst [vmem:[%s9545_s29 + $0x20] sm:$0xff] %v5687_v18 }
 0xac7   : > { %v5615_v10 = vpop.permute.xlu1 %5614  ;;  %v5677_v31 = vpop.permute.xlu0 %5676 }
 0xac8   : > { %v5704_v39 = vsel %vm1100_vm7, %v5702_v42, %v5677_v31  ;;  %v5689_v37 = vsel %vm973_vm5, %v5310_v50, %v5615_v10 }
 0xac9   : > { %5709 = vst [vmem:[%s9545_s29 + $0x18] sm:$0xff] %v5704_v39 }
 0xacb   : > { %v5623_v43 = vpop.permute.xlu1 %5622 }
 0xacc   : > { %v5691_v59 = vsel %vm1006_vm6, %v5689_v37, %v5623_v43 }
 0xacf   : > { %v5647_v6 = vpop.permute.xlu1 %5646 }
 0xad0   : > { %v5697_v16 = vsel %vm1006_vm6, %v5695_v17, %v5647_v6 }
 0xad3   : > { %v5671_v21 = vpop.permute.xlu1 %5670 }
 0xad4   : > { %v5703_v23 = vsel %vm1006_vm6, %v5701_v20, %v5671_v21 }
 0xad7   : > { %v5631_v60 = vpop.permute.xlu1 %5630 }
 0xad8   : > { %v5693_v63 = vsel %vm1100_vm7, %v5691_v59, %v5631_v60 }
 0xad9   : > { %5711 = vst [vmem:[%s9545_s29 + $0x28] sm:$0xff] %v5693_v63 }
 0xadb   : > { %v5655_v15 = vpop.permute.xlu1 %5654 }
 0xadc   : > { %v5699_v38 = vsel %vm1100_vm7, %v5697_v16, %v5655_v15 }
 0xadd   : > { %5712 = vst [vmem:[%s9545_s29 + $0x30] sm:$0xff] %v5699_v38 }
 0xadf   : > { %v5679_v40 = vpop.permute.xlu1 %5678 }
 0xae0   : > { %v5705_v22 = vsel %vm1100_vm7, %v5703_v23, %v5679_v40 }
 0xae1   : > { %5713 = vst [vmem:[%s9545_s29 + $0x38] sm:$0xff] %v5705_v22 }
 0xae2   : > { %6714 = shalt.err (!%p6711_p3)
}
 0xae3   : > { %s6715_s18 = scalar_lea.hbm %s9599_s21, 1024  ;;  %s6719_s20 = scalar_lea.hbm %s9660_s10, 2048 }
 0xae4   : > { %p6716_p4 = scmp.ne.s32.totalorder %s9599_s21, %s6715_s18  ;;  %p6720_p9 = scmp.lt.u32.totalorder %s9599_s21, %s9660_s10 }
 0xae5   : > { %p6721_p10 = scmp.lt.u32.totalorder %s6719_s20, %s6715_s18  ;;  %p6723_p12 = scmp.lt.u32.totalorder %s6715_s18, %s9599_s21 }
 0xae6   : > { %p6717_p7 = pnand %p6716_p4, %p6873_p5 }
 0xae7   : > { %p6722_p11 = por %p6721_p10, %p6720_p9 }
 0xae8   : > { %p6718_p8 = pneg %p6717_p7 }
 0xae9   : > { %p6724_p13 = por %p6723_p12, %p6722_p11 }
 0xaeb   : > { %p6725_p0 = pnand %p6724_p13, %p6718_p8 }
 0xaed   : > { %6728 = shalt.err (!%p6725_p0)
}
 0xaee   : > { %s6779_s25 = smov 512  }
 0xaef   : > { %6534 = dma.vmem_to_hbm [thread:$0]  (%p6873_p5), %s9602_s28, 1024, %s9599_s21, %s9608_s17, %s6779_s25, %s6779_s25, %s6767_s12  }
 0xaf0 PF: > { %p6540_p1 = scmp.ge.s32.totalorder %s6763_s16, 2  ;;  %s5743_s30 = sand.u32 1, %s6751_s13  }
 0xaf1   : > { %s5744_s18 = scalar_lea.sflag [#allocation3], %s5743_s30 }
 0xaf2   : > { %p6537_p2 = pnand %p6540_p1, %p6877_p6 }
 0xaf4   : > { %6746 = dma.done.wait (!%p6537_p2), %s5744_s18, 1024  }
 0xaf5   : > { %6748 = vsyncadd (!%p6537_p2), %s5744_s18, 4294966272  ;;  %p20_p3 = scmp.ge.s32.totalorder %s6860_s19, 4   ;;  %s9770_s13 = smov %s6755_s14 }
 0xaf6   : > { %s9771_s14 = smov %s6759_s15  ;;  %s9772_s15 = smov %s6871_s22 }
 0xaf7   : > { %s9773_s16 = smov %s6860_s19  ;;  %22 = sbr.rel (!%p20_p3) target bundleno = 3 (0x3), region = 95 }
 0xafe   :  { %5749 = vsyncpa [#allocation3], 1 }
 0xaff   :  { %5751 = vsyncpa [#allocation3 + $0x1], 1 }

</bundles_post_ra>
